<compile_context>
chip_gen: v7x
topology: tpu7x:2x2x1
jax: 0.10.0
libtpu: 0.0.40
codegen_flags: <defaults>
</compile_context>

<pallas_src>
import functools

import jax
import jax.numpy as jnp
import numpy as np
from jax import lax
from jax.experimental import pallas as pl
from jax.experimental.pallas import tpu as pltpu

EPS = 1e-5
LANE = 128


def _instance_norm(x_npc):
    """x_npc: (Nb, P, C) f32. Per-sample/per-channel stats over P, biased var,
    single pass (mean & E[x^2])."""
    m = jnp.mean(x_npc, axis=1, keepdims=True)
    ms = jnp.mean(x_npc * x_npc, axis=1, keepdims=True)
    var = jnp.maximum(ms - m * m, 0.0)
    return (x_npc - m) * lax.rsqrt(var + EPS)


def block_kernel(x_ref, w1_ref, w2_ref, out_ref, scr, *, Nb, Ho, Wo, Cin, Cp,
                 stride, fuse_sc):
    P = Ho * Wo
    M = Nb * P

    def im2col(src, C, s):
        # src: (Nb, Hp, Wp, C) bf16, already zero-padded by 1.
        # Returns (M, 9*C) bf16 with K ordered (ky, kx, cin) to match the
        # (3,3,Cin,Cout) -> (9*Cin, Cout) weight reshape done in the wrapper.
        # With C a multiple of 128 the 9-way concat lands at tile-aligned
        # lane offsets.
        taps = []
        for dy in range(3):
            for dx in range(3):
                if s == 1:
                    t = src[:, dy:dy + Ho, dx:dx + Wo, :]
                else:
                    t = src[:, dy:dy + s * (Ho - 1) + 1:s,
                               dx:dx + s * (Wo - 1) + 1:s, :]
                taps.append(t.reshape(M, C))
        return jnp.concatenate(taps, axis=1)

    xp = x_ref[...]                                      # (Nb, H+2, W+2, Cin) bf16

    # ---- conv1 (3x3, stride) [+ fused 1x1 shortcut] : one bf16 MXU matmul
    p1 = im2col(xp, Cin, stride)                         # (M, 9*Cin) bf16
    acc1 = jnp.dot(p1, w1_ref[...], preferred_element_type=jnp.float32)
    acc1 = acc1.reshape(Nb, P, -1)                       # (Nb, P, Cp or 2*Cp)
    out1 = jnp.maximum(_instance_norm(acc1[:, :, :Cp]), 0.0)

    # ---- shortcut
    if fuse_sc:
        # 1x1-conv shortcut fused into the conv1 matmul (its input is exactly
        # the centre im2col tap); last Cp columns of acc1 hold the pre-norm.
        sc = _instance_norm(acc1[:, :, Cp:])             # (Nb, P, Cp) f32
    else:
        # identity shortcut (stride == 1, Cin == Cm); zero-pad channels to Cp.
        xs = xp[:, 1:1 + Ho, 1:1 + Wo, :].reshape(Nb, P, Cin)
        if Cp > Cin:
            xs = jnp.concatenate(
                [xs, jnp.zeros((Nb, P, Cp - Cin), xs.dtype)], axis=-1)
        sc = xs                                          # bf16; promotes on add

    # ---- zero-pad out1 (padding=1) into the bf16 VMEM scratch:
    #      only the 1-element halo is zeroed; interior is fully overwritten.
    zrow = jnp.zeros((Nb, 1, Wo + 2, Cp), jnp.bfloat16)
    zcol = jnp.zeros((Nb, Ho, 1, Cp), jnp.bfloat16)
    scr[:, 0:1, :, :] = zrow
    scr[:, Ho + 1:Ho + 2, :, :] = zrow
    scr[:, 1:Ho + 1, 0:1, :] = zcol
    scr[:, 1:Ho + 1, Wo + 1:Wo + 2, :] = zcol
    scr[:, 1:Ho + 1, 1:Wo + 1, :] = out1.astype(jnp.bfloat16).reshape(Nb, Ho, Wo, Cp)

    # ---- conv2 (3x3, stride 1) -> instance-norm : one bf16 MXU matmul
    p2 = im2col(scr[...], Cp, 1)                         # (M, 9*Cp) bf16
    acc2 = jnp.dot(p2, w2_ref[...], preferred_element_type=jnp.float32)
    out2 = _instance_norm(acc2.reshape(Nb, P, Cp))

    out_ref[...] = jnp.maximum(out2 + sc, 0.0).astype(out_ref.dtype)


def _hw_params():
    """VMEM budget / grid-step policy from the detected chip generation."""
    cap = None
    try:
        info = pltpu.get_tpu_info()
        cap = getattr(info, "vmem_capacity_bytes", None)
    except Exception:
        cap = None
    if cap is None:
        cap = 64 << 20                      # conservative (v7x per-TC) fallback
    if cap <= (64 << 20):
        # v7x-like: 64 MiB/TC, 2 TCs -> keep >=2 (even) grid steps.
        return dict(budget=20 << 20, min_steps=2,
                    vmem_limit=int(cap * 3 // 4))
    # v5e / v6e: 1 TC, 128 MiB physical VMEM -> one big block is best.
    return dict(budget=40 << 20, min_steps=1, vmem_limit=64 << 20)


def _per_sample_vmem_bytes(H, W, Ho, Wo, Cin, Cp, n_out1, out_itemsize):
    bf2, f4 = 2, 4
    b = 2 * (H + 2) * (W + 2) * Cin * bf2       # double-buffered bf16 input
    b += 2 * Ho * Wo * Cp * out_itemsize        # double-buffered output
    b += (Ho + 2) * (Wo + 2) * Cp * bf2         # bf16 padded scratch
    b += Ho * Wo * 9 * Cin * bf2                # p1 patches
    b += Ho * Wo * n_out1 * f4                  # acc1 (conv1 [+ fused shortcut])
    b += Ho * Wo * 9 * Cp * bf2                 # p2 patches
    b += 6 * Ho * Wo * Cp * f4                  # acc2 / out1 / norm temps
    return b


def _pick_nb(N, per, budget, min_steps):
    """Largest divisor of N whose block fits the VMEM budget, respecting the
    per-chip minimum grid-step count (>=2, preferably even, on v7x)."""
    feas = [d for d in range(1, N + 1)
            if N % d == 0 and d * per <= budget and N // d >= min_steps]
    if not feas:
        return 1
    if min_steps > 1:
        even = [d for d in feas if (N // d) % 2 == 0]
        if even:
            return max(even)
    return max(feas)


def block_forward(x_nchw, w1, w2, ws=None, stride=1, *, nb=None,
                  out_dtype=jnp.bfloat16):
    """Residual BasicBlock forward. x_nchw: (N, Cin, H, W) -> (N, planes, Ho, Wo)."""
    x = jnp.transpose(x_nchw, (0, 2, 3, 1))               # NCHW -> NHWC
    N, H, W, Cin = x.shape
    Cm = w1.shape[-1]
    Cp = ((Cm + LANE - 1) // LANE) * LANE                  # lane-padded channels
    Ho = (H + 2 - 3) // stride + 1
    Wo = (W + 2 - 3) // stride + 1
    has_sc_conv = (stride != 1) or (Cin != Cm)

    # bf16 input: halves input DMA; MXU operands are bf16 in-kernel anyway.
    xpad = jnp.pad(x.astype(jnp.bfloat16), ((0, 0), (1, 1), (1, 1), (0, 0)))

    # Weights, channel-padded to Cp and reshaped to (K, Nout) with K=(ky,kx,ci).
    w1p = jnp.pad(w1, ((0, 0), (0, 0), (0, 0), (0, Cp - Cm)))
    if has_sc_conv:
        assert ws is not None
        wsp = jnp.pad(ws, ((0, 0), (0, Cp - Cm)))          # (Cin, Cp)
        sc_taps = jnp.zeros((3, 3, Cin, Cp), w1.dtype).at[1, 1].set(wsp)
        w1f = jnp.concatenate([w1p, sc_taps], axis=-1)     # (3,3,Cin,2*Cp)
        w1f = w1f.astype(jnp.bfloat16).reshape(9 * Cin, 2 * Cp)
        n_out1 = 2 * Cp
    else:
        w1f = w1p.astype(jnp.bfloat16).reshape(9 * Cin, Cp)
        n_out1 = Cp
    w2f = jnp.pad(w2, ((0, 0), (0, 0), (0, Cp - Cm), (0, Cp - Cm)))
    w2f = w2f.astype(jnp.bfloat16).reshape(9 * Cp, Cp)

    hw = _hw_params()
    if nb is None:
        per = _per_sample_vmem_bytes(H, W, Ho, Wo, Cin, Cp, n_out1,
                                     jnp.dtype(out_dtype).itemsize)
        nb = _pick_nb(N, per, hw["budget"], hw["min_steps"])
    assert N % nb == 0

    kern = functools.partial(block_kernel, Nb=nb, Ho=Ho, Wo=Wo, Cin=Cin, Cp=Cp,
                             stride=stride, fuse_sc=has_sc_conv)

    in_specs = [
        pl.BlockSpec((nb, H + 2, W + 2, Cin), lambda n: (n, 0, 0, 0)),
        pl.BlockSpec((9 * Cin, n_out1), lambda n: (0, 0)),
        pl.BlockSpec((9 * Cp, Cp), lambda n: (0, 0)),
    ]

    out_flat = pl.pallas_call(
        kern,
        out_shape=jax.ShapeDtypeStruct((N, Ho * Wo, Cp), out_dtype),
        grid_spec=pltpu.PrefetchScalarGridSpec(
            num_scalar_prefetch=0,
            grid=(N // nb,),
            in_specs=in_specs,
            out_specs=pl.BlockSpec((nb, Ho * Wo, Cp), lambda n: (n, 0, 0)),
            scratch_shapes=[pltpu.VMEM((nb, Ho + 2, Wo + 2, Cp), jnp.bfloat16)],
        ),
        compiler_params=pltpu.CompilerParams(
            dimension_semantics=("parallel",),
            vmem_limit_bytes=int(hw["vmem_limit"]),
        ),
    )(xpad, w1f, w2f)

    out_nhwc = out_flat[:, :, :Cm].reshape(N, Ho, Wo, Cm)   # drop lane padding
    return jnp.transpose(out_nhwc, (0, 3, 1, 2))             # NHWC -> NCHW


# ---------------- pure-JAX reference (mirrors kernel numerics: bf16 MXU
# operands, f32 accumulation / statistics) ----------------
def _block_ref(x_nchw, w1, w2, ws, stride):
    x = jnp.transpose(x_nchw, (0, 2, 3, 1)).astype(jnp.bfloat16)

    def inorm(y):  # (N, H, W, C) f32
        m = jnp.mean(y, axis=(1, 2), keepdims=True)
        ms = jnp.mean(y * y, axis=(1, 2), keepdims=True)
        var = jnp.maximum(ms - m * m, 0.0)
        return (y - m) * lax.rsqrt(var + EPS)

    def conv(y, w, s, p):
        return lax.conv_general_dilated(
            y.astype(jnp.bfloat16), w.astype(jnp.bfloat16), (s, s),
            [(p, p), (p, p)],
            dimension_numbers=("NHWC", "HWIO", "NHWC"),
            preferred_element_type=jnp.float32)

    out = jax.nn.relu(inorm(conv(x, w1, stride, 1)))
    out = inorm(conv(out, w2, 1, 1))
    Cin, Cm = x.shape[-1], w1.shape[-1]
    if stride != 1 or Cin != Cm:
        sc = inorm(conv(x, ws[None, None], stride, 0))
    else:
        sc = x.astype(jnp.float32)
    out = jax.nn.relu(out + sc)
    return jnp.transpose(out, (0, 3, 1, 2))


if __name__ == "__main__":
    key = jax.random.PRNGKey(0)
    k1, k2, k3, kx, k4, k5, ky = jax.random.split(key, 7)

    # Case 1: BasicBlock(in_planes=4, planes=8, stride=1) -> 1x1-conv shortcut
    N, Cin, planes, H, W, stride = 2, 4, 8, 16, 16, 1
    w1 = jax.random.normal(k1, (3, 3, Cin, planes), jnp.float32) / (3.0 * Cin ** 0.5)
    w2 = jax.random.normal(k2, (3, 3, planes, planes), jnp.float32) / (3.0 * planes ** 0.5)
    ws = jax.random.normal(k3, (Cin, planes), jnp.float32) / (Cin ** 0.5)
    x = jax.random.normal(kx, (N, Cin, H, W), jnp.float32)      # NCHW, like PyTorch

    out = jax.block_until_ready(block_forward(x, w1, w2, ws, stride))
    ref = jax.block_until_ready(_block_ref(x, w1, w2, ws, stride))
    assert out.shape == (N, planes, H, W)
    np.testing.assert_allclose(np.asarray(out.astype(jnp.float32)),
                               np.asarray(ref), atol=3e-2, rtol=3e-2)

    # Case 2: identity shortcut (in_planes == planes, stride=1)
    Cin2 = planes
    w1b = jax.random.normal(k4, (3, 3, Cin2, planes), jnp.float32) / (3.0 * Cin2 ** 0.5)
    w2b = jax.random.normal(k5, (3, 3, planes, planes), jnp.float32) / (3.0 * planes ** 0.5)
    xb = jax.random.normal(ky, (N, Cin2, H, W), jnp.float32)
    out_id = jax.block_until_ready(block_forward(xb, w1b, w2b, None, 1))
    ref_id = jax.block_until_ready(_block_ref(xb, w1b, w2b, None, 1))
    assert out_id.shape == (N, planes, H, W)
    np.testing.assert_allclose(np.asarray(out_id.astype(jnp.float32)),
                               np.asarray(ref_id), atol=3e-2, rtol=3e-2)

    print("KERNEL_OK")
</pallas_src>

<mosaic_0001>
module attributes {stable_mosaic.version = 11 : i64} {
  func.func @block_kernel(%arg0: i32, %arg1: memref<1x18x18x4xbf16, #tpu.memory_space<vmem>>, %arg2: memref<36x256xbf16, #tpu.memory_space<vmem>>, %arg3: memref<1152x128xbf16, #tpu.memory_space<vmem>>, %arg4: memref<1x256x128xbf16, #tpu.memory_space<vmem>>, %arg5: memref<1x18x18x128xbf16, #tpu.memory_space<vmem>>) attributes {dimension_semantics = [#tpu.dimension_semantics<parallel>], iteration_bounds = array<i64: 2>, scalar_prefetch = 0 : i64, scratch_operands = 1 : i64, tpu.core_type = #tpu.core_type<tc>, window_params = [{transform_indices = @transform_0, window_bounds = array<i64: 1, 18, 18, 4>}, {pipeline_mode = #tpu.pipeline_mode<synchronous>, transform_indices = @transform_1, window_bounds = array<i64: 36, 256>}, {pipeline_mode = #tpu.pipeline_mode<synchronous>, transform_indices = @transform_2, window_bounds = array<i64: 1152, 128>}, {transform_indices = @transform_3, window_bounds = array<i64: 1, 256, 128>}]} {
    %c0 = arith.constant 0 : index
    %c0_0 = arith.constant 0 : index
    %c0_1 = arith.constant 0 : index
    %c0_2 = arith.constant 0 : index
    %0 = vector.load %arg1[%c0, %c0_0, %c0_1, %c0_2] : memref<1x18x18x4xbf16, #tpu.memory_space<vmem>>, vector<1x18x18x4xbf16>
    %1 = vector.extract_strided_slice %0 {offsets = [0, 0, 0, 0], sizes = [1, 16, 16, 4], strides = [1, 1, 1, 1]} : vector<1x18x18x4xbf16> to vector<1x16x16x4xbf16>
    %2 = vector.shape_cast %1 : vector<1x16x16x4xbf16> to vector<256x4xbf16>
    %3 = vector.extract_strided_slice %0 {offsets = [0, 0, 1, 0], sizes = [1, 16, 16, 4], strides = [1, 1, 1, 1]} : vector<1x18x18x4xbf16> to vector<1x16x16x4xbf16>
    %4 = vector.shape_cast %3 : vector<1x16x16x4xbf16> to vector<256x4xbf16>
    %5 = vector.extract_strided_slice %0 {offsets = [0, 0, 2, 0], sizes = [1, 16, 16, 4], strides = [1, 1, 1, 1]} : vector<1x18x18x4xbf16> to vector<1x16x16x4xbf16>
    %6 = vector.shape_cast %5 : vector<1x16x16x4xbf16> to vector<256x4xbf16>
    %7 = vector.extract_strided_slice %0 {offsets = [0, 1, 0, 0], sizes = [1, 16, 16, 4], strides = [1, 1, 1, 1]} : vector<1x18x18x4xbf16> to vector<1x16x16x4xbf16>
    %8 = vector.shape_cast %7 : vector<1x16x16x4xbf16> to vector<256x4xbf16>
    %9 = vector.extract_strided_slice %0 {offsets = [0, 1, 1, 0], sizes = [1, 16, 16, 4], strides = [1, 1, 1, 1]} : vector<1x18x18x4xbf16> to vector<1x16x16x4xbf16>
    %10 = vector.shape_cast %9 : vector<1x16x16x4xbf16> to vector<256x4xbf16>
    %11 = vector.extract_strided_slice %0 {offsets = [0, 1, 2, 0], sizes = [1, 16, 16, 4], strides = [1, 1, 1, 1]} : vector<1x18x18x4xbf16> to vector<1x16x16x4xbf16>
    %12 = vector.shape_cast %11 : vector<1x16x16x4xbf16> to vector<256x4xbf16>
    %13 = vector.extract_strided_slice %0 {offsets = [0, 2, 0, 0], sizes = [1, 16, 16, 4], strides = [1, 1, 1, 1]} : vector<1x18x18x4xbf16> to vector<1x16x16x4xbf16>
    %14 = vector.shape_cast %13 : vector<1x16x16x4xbf16> to vector<256x4xbf16>
    %15 = vector.extract_strided_slice %0 {offsets = [0, 2, 1, 0], sizes = [1, 16, 16, 4], strides = [1, 1, 1, 1]} : vector<1x18x18x4xbf16> to vector<1x16x16x4xbf16>
    %16 = vector.shape_cast %15 : vector<1x16x16x4xbf16> to vector<256x4xbf16>
    %17 = vector.extract_strided_slice %0 {offsets = [0, 2, 2, 0], sizes = [1, 16, 16, 4], strides = [1, 1, 1, 1]} : vector<1x18x18x4xbf16> to vector<1x16x16x4xbf16>
    %18 = vector.shape_cast %17 : vector<1x16x16x4xbf16> to vector<256x4xbf16>
    %19 = tpu.concatenate %2, %4, %6, %8, %10, %12, %14, %16, %18 in 1 : vector<256x4xbf16>, vector<256x4xbf16>, vector<256x4xbf16>, vector<256x4xbf16>, vector<256x4xbf16>, vector<256x4xbf16>, vector<256x4xbf16>, vector<256x4xbf16>, vector<256x4xbf16> -> vector<256x36xbf16>
    %c0_3 = arith.constant 0 : index
    %c0_4 = arith.constant 0 : index
    %20 = vector.load %arg2[%c0_3, %c0_4] : memref<36x256xbf16, #tpu.memory_space<vmem>>, vector<36x256xbf16>
    %cst = arith.constant dense<0.000000e+00> : vector<256x256xf32>
    %21 = tpu.matmul %19, %20, %cst {dimension_numbers = #tpu.dot_dimension_numbers<[1], [0], [0], [1], [0, 0, 1, 1], [], []>} : vector<256x36xbf16>, vector<36x256xbf16>, vector<256x256xf32> -> vector<256x256xf32>
    %22 = vector.shape_cast %21 : vector<256x256xf32> to vector<1x256x256xf32>
    %23 = vector.extract_strided_slice %22 {offsets = [0, 0, 0], sizes = [1, 256, 128], strides = [1, 1, 1]} : vector<1x256x256xf32> to vector<1x256x128xf32>
    %cst_5 = arith.constant dense<0.000000e+00> : vector<1x128xf32>
    %24 = vector.multi_reduction <add>, %23, %cst_5 [1] : vector<1x256x128xf32> to vector<1x128xf32>
    %25 = vector.shape_cast %24 : vector<1x128xf32> to vector<1x1x128xf32>
    %cst_6 = arith.constant 2.560000e+02 : f32
    %26 = vector.broadcast %cst_6 : f32 to vector<1x1x128xf32>
    %27 = arith.divf %25, %26 : vector<1x1x128xf32>
    %28 = arith.mulf %23, %23 : vector<1x256x128xf32>
    %cst_7 = arith.constant dense<0.000000e+00> : vector<1x128xf32>
    %29 = vector.multi_reduction <add>, %28, %cst_7 [1] : vector<1x256x128xf32> to vector<1x128xf32>
    %30 = vector.shape_cast %29 : vector<1x128xf32> to vector<1x1x128xf32>
    %cst_8 = arith.constant 2.560000e+02 : f32
    %31 = vector.broadcast %cst_8 : f32 to vector<1x1x128xf32>
    %32 = arith.divf %30, %31 : vector<1x1x128xf32>
    %33 = arith.mulf %27, %27 : vector<1x1x128xf32>
    %34 = arith.subf %32, %33 : vector<1x1x128xf32>
    %cst_9 = arith.constant 0.000000e+00 : f32
    %35 = vector.broadcast %cst_9 : f32 to vector<1x1x128xf32>
    %36 = arith.maximumf %34, %35 : vector<1x1x128xf32>
    %37 = vector.broadcast %27 : vector<1x1x128xf32> to vector<1x256x128xf32>
    %38 = arith.subf %23, %37 : vector<1x256x128xf32>
    %cst_10 = arith.constant 9.99999974E-6 : f32
    %39 = vector.broadcast %cst_10 : f32 to vector<1x1x128xf32>
    %40 = arith.addf %36, %39 : vector<1x1x128xf32>
    %41 = math.rsqrt %40 : vector<1x1x128xf32>
    %42 = vector.broadcast %41 : vector<1x1x128xf32> to vector<1x256x128xf32>
    %43 = arith.mulf %38, %42 : vector<1x256x128xf32>
    %cst_11 = arith.constant 0.000000e+00 : f32
    %44 = vector.broadcast %cst_11 : f32 to vector<1x256x128xf32>
    %45 = arith.maximumf %43, %44 : vector<1x256x128xf32>
    %46 = vector.extract_strided_slice %22 {offsets = [0, 0, 128], sizes = [1, 256, 128], strides = [1, 1, 1]} : vector<1x256x256xf32> to vector<1x256x128xf32>
    %cst_12 = arith.constant dense<0.000000e+00> : vector<1x128xf32>
    %47 = vector.multi_reduction <add>, %46, %cst_12 [1] : vector<1x256x128xf32> to vector<1x128xf32>
    %48 = vector.shape_cast %47 : vector<1x128xf32> to vector<1x1x128xf32>
    %cst_13 = arith.constant 2.560000e+02 : f32
    %49 = vector.broadcast %cst_13 : f32 to vector<1x1x128xf32>
    %50 = arith.divf %48, %49 : vector<1x1x128xf32>
    %51 = arith.mulf %46, %46 : vector<1x256x128xf32>
    %cst_14 = arith.constant dense<0.000000e+00> : vector<1x128xf32>
    %52 = vector.multi_reduction <add>, %51, %cst_14 [1] : vector<1x256x128xf32> to vector<1x128xf32>
    %53 = vector.shape_cast %52 : vector<1x128xf32> to vector<1x1x128xf32>
    %cst_15 = arith.constant 2.560000e+02 : f32
    %54 = vector.broadcast %cst_15 : f32 to vector<1x1x128xf32>
    %55 = arith.divf %53, %54 : vector<1x1x128xf32>
    %56 = arith.mulf %50, %50 : vector<1x1x128xf32>
    %57 = arith.subf %55, %56 : vector<1x1x128xf32>
    %cst_16 = arith.constant 0.000000e+00 : f32
    %58 = vector.broadcast %cst_16 : f32 to vector<1x1x128xf32>
    %59 = arith.maximumf %57, %58 : vector<1x1x128xf32>
    %60 = vector.broadcast %50 : vector<1x1x128xf32> to vector<1x256x128xf32>
    %61 = arith.subf %46, %60 : vector<1x256x128xf32>
    %cst_17 = arith.constant 9.99999974E-6 : f32
    %62 = vector.broadcast %cst_17 : f32 to vector<1x1x128xf32>
    %63 = arith.addf %59, %62 : vector<1x1x128xf32>
    %64 = math.rsqrt %63 : vector<1x1x128xf32>
    %65 = vector.broadcast %64 : vector<1x1x128xf32> to vector<1x256x128xf32>
    %66 = arith.mulf %61, %65 : vector<1x256x128xf32>
    %cst_18 = arith.constant 0.000000e+00 : bf16
    %67 = vector.broadcast %cst_18 : bf16 to vector<1x1x18x128xbf16>
    %cst_19 = arith.constant 0.000000e+00 : bf16
    %68 = vector.broadcast %cst_19 : bf16 to vector<1x16x1x128xbf16>
    %c0_20 = arith.constant 0 : index
    %c0_21 = arith.constant 0 : index
    %c0_22 = arith.constant 0 : index
    %c0_23 = arith.constant 0 : index
    %69 = vector.load %arg5[%c0_20, %c0_21, %c0_22, %c0_23] : memref<1x18x18x128xbf16, #tpu.memory_space<vmem>>, vector<1x1x18x128xbf16>
    tpu.vector_store %arg5[%c0_20, %c0_21, %c0_22, %c0_23], %67 {strides = array<i32>} : memref<1x18x18x128xbf16, #tpu.memory_space<vmem>>, vector<1x1x18x128xbf16>,
    %c0_24 = arith.constant 0 : index
    %c17 = arith.constant 17 : index
    %c0_25 = arith.constant 0 : index
    %c0_26 = arith.constant 0 : index
    %70 = vector.load %arg5[%c0_24, %c17, %c0_25, %c0_26] : memref<1x18x18x128xbf16, #tpu.memory_space<vmem>>, vector<1x1x18x128xbf16>
    tpu.vector_store %arg5[%c0_24, %c17, %c0_25, %c0_26], %67 {strides = array<i32>} : memref<1x18x18x128xbf16, #tpu.memory_space<vmem>>, vector<1x1x18x128xbf16>,
    %c0_27 = arith.constant 0 : index
    %c1 = arith.constant 1 : index
    %c0_28 = arith.constant 0 : index
    %c0_29 = arith.constant 0 : index
    %71 = vector.load %arg5[%c0_27, %c1, %c0_28, %c0_29] : memref<1x18x18x128xbf16, #tpu.memory_space<vmem>>, vector<1x16x1x128xbf16>
    tpu.vector_store %arg5[%c0_27, %c1, %c0_28, %c0_29], %68 {strides = array<i32>} : memref<1x18x18x128xbf16, #tpu.memory_space<vmem>>, vector<1x16x1x128xbf16>,
    %c0_30 = arith.constant 0 : index
    %c1_31 = arith.constant 1 : index
    %c17_32 = arith.constant 17 : index
    %c0_33 = arith.constant 0 : index
    %72 = vector.load %arg5[%c0_30, %c1_31, %c17_32, %c0_33] : memref<1x18x18x128xbf16, #tpu.memory_space<vmem>>, vector<1x16x1x128xbf16>
    tpu.vector_store %arg5[%c0_30, %c1_31, %c17_32, %c0_33], %68 {strides = array<i32>} : memref<1x18x18x128xbf16, #tpu.memory_space<vmem>>, vector<1x16x1x128xbf16>,
    %73 = arith.truncf %45 : vector<1x256x128xf32> to vector<1x256x128xbf16>
    %74 = vector.shape_cast %73 : vector<1x256x128xbf16> to vector<1x16x16x128xbf16>
    %c0_34 = arith.constant 0 : index
    %c1_35 = arith.constant 1 : index
    %c1_36 = arith.constant 1 : index
    %c0_37 = arith.constant 0 : index
    %75 = vector.load %arg5[%c0_34, %c1_35, %c1_36, %c0_37] : memref<1x18x18x128xbf16, #tpu.memory_space<vmem>>, vector<1x16x16x128xbf16>
    tpu.vector_store %arg5[%c0_34, %c1_35, %c1_36, %c0_37], %74 {strides = array<i32>} : memref<1x18x18x128xbf16, #tpu.memory_space<vmem>>, vector<1x16x16x128xbf16>,
    %c0_38 = arith.constant 0 : index
    %c0_39 = arith.constant 0 : index
    %c0_40 = arith.constant 0 : index
    %c0_41 = arith.constant 0 : index
    %76 = vector.load %arg5[%c0_38, %c0_39, %c0_40, %c0_41] : memref<1x18x18x128xbf16, #tpu.memory_space<vmem>>, vector<1x18x18x128xbf16>
    %77 = vector.extract_strided_slice %76 {offsets = [0, 0, 0, 0], sizes = [1, 16, 16, 128], strides = [1, 1, 1, 1]} : vector<1x18x18x128xbf16> to vector<1x16x16x128xbf16>
    %78 = vector.shape_cast %77 : vector<1x16x16x128xbf16> to vector<256x128xbf16>
    %79 = vector.extract_strided_slice %76 {offsets = [0, 0, 1, 0], sizes = [1, 16, 16, 128], strides = [1, 1, 1, 1]} : vector<1x18x18x128xbf16> to vector<1x16x16x128xbf16>
    %80 = vector.shape_cast %79 : vector<1x16x16x128xbf16> to vector<256x128xbf16>
    %81 = vector.extract_strided_slice %76 {offsets = [0, 0, 2, 0], sizes = [1, 16, 16, 128], strides = [1, 1, 1, 1]} : vector<1x18x18x128xbf16> to vector<1x16x16x128xbf16>
    %82 = vector.shape_cast %81 : vector<1x16x16x128xbf16> to vector<256x128xbf16>
    %83 = vector.extract_strided_slice %76 {offsets = [0, 1, 0, 0], sizes = [1, 16, 16, 128], strides = [1, 1, 1, 1]} : vector<1x18x18x128xbf16> to vector<1x16x16x128xbf16>
    %84 = vector.shape_cast %83 : vector<1x16x16x128xbf16> to vector<256x128xbf16>
    %85 = vector.extract_strided_slice %76 {offsets = [0, 1, 1, 0], sizes = [1, 16, 16, 128], strides = [1, 1, 1, 1]} : vector<1x18x18x128xbf16> to vector<1x16x16x128xbf16>
    %86 = vector.shape_cast %85 : vector<1x16x16x128xbf16> to vector<256x128xbf16>
    %87 = vector.extract_strided_slice %76 {offsets = [0, 1, 2, 0], sizes = [1, 16, 16, 128], strides = [1, 1, 1, 1]} : vector<1x18x18x128xbf16> to vector<1x16x16x128xbf16>
    %88 = vector.shape_cast %87 : vector<1x16x16x128xbf16> to vector<256x128xbf16>
    %89 = vector.extract_strided_slice %76 {offsets = [0, 2, 0, 0], sizes = [1, 16, 16, 128], strides = [1, 1, 1, 1]} : vector<1x18x18x128xbf16> to vector<1x16x16x128xbf16>
    %90 = vector.shape_cast %89 : vector<1x16x16x128xbf16> to vector<256x128xbf16>
    %91 = vector.extract_strided_slice %76 {offsets = [0, 2, 1, 0], sizes = [1, 16, 16, 128], strides = [1, 1, 1, 1]} : vector<1x18x18x128xbf16> to vector<1x16x16x128xbf16>
    %92 = vector.shape_cast %91 : vector<1x16x16x128xbf16> to vector<256x128xbf16>
    %93 = vector.extract_strided_slice %76 {offsets = [0, 2, 2, 0], sizes = [1, 16, 16, 128], strides = [1, 1, 1, 1]} : vector<1x18x18x128xbf16> to vector<1x16x16x128xbf16>
    %94 = vector.shape_cast %93 : vector<1x16x16x128xbf16> to vector<256x128xbf16>
    %95 = tpu.concatenate %78, %80, %82, %84, %86, %88, %90, %92, %94 in 1 : vector<256x128xbf16>, vector<256x128xbf16>, vector<256x128xbf16>, vector<256x128xbf16>, vector<256x128xbf16>, vector<256x128xbf16>, vector<256x128xbf16>, vector<256x128xbf16>, vector<256x128xbf16> -> vector<256x1152xbf16>
    %c0_42 = arith.constant 0 : index
    %c0_43 = arith.constant 0 : index
    %96 = vector.load %arg3[%c0_42, %c0_43] : memref<1152x128xbf16, #tpu.memory_space<vmem>>, vector<1152x128xbf16>
    %cst_44 = arith.constant dense<0.000000e+00> : vector<256x128xf32>
    %97 = tpu.matmul %95, %96, %cst_44 {dimension_numbers = #tpu.dot_dimension_numbers<[1], [0], [0], [1], [0, 0, 1, 1], [], []>} : vector<256x1152xbf16>, vector<1152x128xbf16>, vector<256x128xf32> -> vector<256x128xf32>
    %98 = vector.shape_cast %97 : vector<256x128xf32> to vector<1x256x128xf32>
    %cst_45 = arith.constant dense<0.000000e+00> : vector<1x128xf32>
    %99 = vector.multi_reduction <add>, %98, %cst_45 [1] : vector<1x256x128xf32> to vector<1x128xf32>
    %100 = vector.shape_cast %99 : vector<1x128xf32> to vector<1x1x128xf32>
    %cst_46 = arith.constant 2.560000e+02 : f32
    %101 = vector.broadcast %cst_46 : f32 to vector<1x1x128xf32>
    %102 = arith.divf %100, %101 : vector<1x1x128xf32>
    %103 = arith.mulf %98, %98 : vector<1x256x128xf32>
    %cst_47 = arith.constant dense<0.000000e+00> : vector<1x128xf32>
    %104 = vector.multi_reduction <add>, %103, %cst_47 [1] : vector<1x256x128xf32> to vector<1x128xf32>
    %105 = vector.shape_cast %104 : vector<1x128xf32> to vector<1x1x128xf32>
    %cst_48 = arith.constant 2.560000e+02 : f32
    %106 = vector.broadcast %cst_48 : f32 to vector<1x1x128xf32>
    %107 = arith.divf %105, %106 : vector<1x1x128xf32>
    %108 = arith.mulf %102, %102 : vector<1x1x128xf32>
    %109 = arith.subf %107, %108 : vector<1x1x128xf32>
    %cst_49 = arith.constant 0.000000e+00 : f32
    %110 = vector.broadcast %cst_49 : f32 to vector<1x1x128xf32>
    %111 = arith.maximumf %109, %110 : vector<1x1x128xf32>
    %112 = vector.broadcast %102 : vector<1x1x128xf32> to vector<1x256x128xf32>
    %113 = arith.subf %98, %112 : vector<1x256x128xf32>
    %cst_50 = arith.constant 9.99999974E-6 : f32
    %114 = vector.broadcast %cst_50 : f32 to vector<1x1x128xf32>
    %115 = arith.addf %111, %114 : vector<1x1x128xf32>
    %116 = math.rsqrt %115 : vector<1x1x128xf32>
    %117 = vector.broadcast %116 : vector<1x1x128xf32> to vector<1x256x128xf32>
    %118 = arith.mulf %113, %117 : vector<1x256x128xf32>
    %119 = arith.addf %118, %66 : vector<1x256x128xf32>
    %cst_51 = arith.constant 0.000000e+00 : f32
    %120 = vector.broadcast %cst_51 : f32 to vector<1x256x128xf32>
    %121 = arith.maximumf %119, %120 : vector<1x256x128xf32>
    %122 = arith.truncf %121 : vector<1x256x128xf32> to vector<1x256x128xbf16>
    %c0_52 = arith.constant 0 : index
    %c0_53 = arith.constant 0 : index
    %c0_54 = arith.constant 0 : index
    %123 = vector.load %arg4[%c0_52, %c0_53, %c0_54] : memref<1x256x128xbf16, #tpu.memory_space<vmem>>, vector<1x256x128xbf16>
    tpu.vector_store %arg4[%c0_52, %c0_53, %c0_54], %122 {strides = array<i32>} : memref<1x256x128xbf16, #tpu.memory_space<vmem>>, vector<1x256x128xbf16>,
    return
  }
  func.func @transform_0(%arg0: i32) -> (i32, i32, i32, i32) {
    %c0_i32 = arith.constant 0 : i32
    %c0_i32_0 = arith.constant 0 : i32
    %c0_i32_1 = arith.constant 0 : i32
    %c0_i32_2 = arith.constant 0 : i32
    return %arg0, %c0_i32, %c0_i32_0, %c0_i32_1 : i32, i32, i32, i32
  }
  func.func @transform_1(%arg0: i32) -> (i32, i32) {
    %c0_i32 = arith.constant 0 : i32
    %c0_i32_0 = arith.constant 0 : i32
    %c0_i32_1 = arith.constant 0 : i32
    return %c0_i32, %c0_i32_0 : i32, i32
  }
  func.func @transform_2(%arg0: i32) -> (i32, i32) {
    %c0_i32 = arith.constant 0 : i32
    %c0_i32_0 = arith.constant 0 : i32
    %c0_i32_1 = arith.constant 0 : i32
    return %c0_i32, %c0_i32_0 : i32, i32
  }
  func.func @transform_3(%arg0: i32) -> (i32, i32, i32) {
    %c0_i32 = arith.constant 0 : i32
    %c0_i32_0 = arith.constant 0 : i32
    %c0_i32_1 = arith.constant 0 : i32
    return %arg0, %c0_i32, %c0_i32_0 : i32, i32, i32
  }
}

</mosaic_0001>

<bundles_post_ra>
// kernel: tpu_custom_call.1
= control target key start
LH: loop header
LB: loop body
LE: loop exit
PB: predicated region body
PF: predicated region fallthrough
CT: control target
= control target key end

     0   :  { %8 = vsyncpa [#allocation4], 0  ;;  %s10356_s0 = inlined_call_operand.vmem [shape: bf16[2,18,18,4], index: 0, kind: input, shape index: {}]   ;;  %s10357_s1 = inlined_call_operand.vmem [shape: bf16[36,256], index: 1, kind: input, shape index: {}]   ;;  %s10358_s2 = inlined_call_operand.hbm [shape: bf16[1152,128], index: 2, kind: input, shape index: {}]   ;;  %s10359_s3 = inlined_call_operand.hbm [shape: bf16[2,256,128], index: 3, kind: output, shape index: {}]  }
   0x1   :  { %9 = vsyncpa [#allocation5], 0 }
   0x2   :  { %11 = vsyncpa [#allocation5 + $0x1], 0  ;;  %s6916_s12 = smov 0   ;;  %s6918_s13 = smov 0  }
   0x3   :  { %s6920_s14 = smov 0   ;;  %s6922_s15 = smov 0  }
   0x4 LB: > { %s6937_s16 = sadd.s32 4294967295, %s6880_s15   ;;  %s5598_s17 = sadd.s32 4294967294, %s6880_s15   ;;  %s6880_s15 = sphi %s6922_s15, %s10767_s15   ;;  %s6876_s14 = sphi %s6920_s14, %s10766_s14   ;;  %s6872_s13 = sphi %s6918_s13, %s10765_s13   ;;  %s6868_s12 = sphi %s6916_s12, %s10764_s12  }
   0x5   : > { %s6941_s18 = sadd.s32 1, %s6880_s15   ;;  %s92_s19 = sadd.s32 1, %s6876_s14 }
   0x6   : > { %s89_s20 = ssub.s32 %s6880_s15, %s6941_s18  ;;  %p102_p0 = scmp.ne.s32.totalorder %s6876_s14, %s6872_s13 }
   0x7   : > { %p90_p1 = scmp.eq.s32.totalorder %s89_s20, 0  ;;  %p103_p2 = scmp.eq.s32.totalorder %s6937_s16, 1 }
   0x8   : > { %p108_p3 = scmp.ne.s32.totalorder %s6872_s13, %s6868_s12  ;;  %p109_p4 = scmp.eq.s32.totalorder %s5598_s17, 1 }
   0x9   : > { %s6952_s21 = scalar_select %p90_p1, %s6876_s14, %s92_s19  }
   0xa   : > { %p6954_p5 = por %p103_p2, %p102_p0  ;;  %p6958_p6 = por %p109_p4, %p108_p3 }
   0xb   : > { %p5599_p7 = scmp.ge.s32.totalorder %s6880_s15, 1  ;;  %p116_p8 = scmp.lt.s32.totalorder %s6880_s15, 3 }
   0xc   : > { %s10452_s22 = scalar_select %p6954_p5, 1, 0 }
   0xd   : > { %s10453_s23 = scalar_select %p6958_p6, 1, 0 }
   0xe   : > { %p10360_p9 = scmp.eq.s32.totalorder %s6937_s16, 0  ;;  %p6965_p10 = pnand %p5599_p7, %p116_p8 }
   0xf   : > { %s6882_s25 = smov [#allocation3]   ;;  %s6786_s30 = scalar_lea.hbm %s10358_s2, 9216 }
  0x10   : > { %s10454_s24 = scalar_select %p6965_p10, 1, 0 }
  0x11   : > { %s131_s26 = sshll.u32 %s6882_s25, 4  ;;  %p6607_p11 = pneg %p6965_p10  ;;  %s132_s26 = int_to_ptr.vmem [resolvable:$true] %s131_s26 }
  0x12   : > { %p6787_p13 = scmp.ne.s32.totalorder %s10358_s2, %s6786_s30  ;;  %p6793_p3 = scmp.lt.u32.totalorder %s6786_s30, %s10358_s2 }
  0x13   : > { %p6973_p12 = pnand %p10360_p9, %p6607_p11 }
  0x15   : > { %p6788_p0 = pneg %p6973_p12 }
  0x17   : > { %p6789_p1 = pnand %p6788_p0, %p6787_p13 }
  0x19   : > { %p6790_p2 = pneg %p6789_p1 }
  0x1b   : > { %p6795_p4 = pnand %p6793_p3, %p6790_p2 }
  0x1d   : > { %6798 = shalt.err (!%p6795_p4)
}
  0x1e   : > { %s6799_s8 = scalar_lea.vmem %s132_s26, 9216  ;;  %p6807_p9 = scmp.lt.s32.totalorder %s132_s26, %s132_s26 }
  0x1f   : > { %p6800_p7 = scmp.ne.s32.totalorder %s132_s26, %s6799_s8  ;;  %p6808_p6 = scmp.lt.s32.totalorder %s6799_s8, %s6799_s8 }
  0x21   : > { %p6802_p8 = pnand %p6800_p7, %p6788_p0  ;;  %p6809_p5 = por %p6808_p6, %p6807_p9 }
  0x23   : > { %p6803_p11 = pneg %p6802_p8 }
  0x25   : > { %p6810_p10 = pnand %p6809_p5, %p6803_p11 }
  0x27   : > { %6813 = shalt.err (!%p6810_p10)
}
  0x28   : > { %s6883_s9 = smov 64   ;;  %s6884_s10 = smov 4  }
  0x29   : > { %6610 = dma.hbm_to_vmem [thread:$0]  (!%p6973_p12), %s10358_s2, 9216, %s132_s26, [#allocation4], %s6883_s9, %s6883_s9, %s6884_s10  }
  0x2a   : > { %p10456_p13 = scmp.ne.s32.totalorder %s10454_s24, 0 }
  0x2c   : > { %155 = sbr.rel (%p10456_p13) target bundleno = 1424 (0x590), region = 32 }
  0x33   : > { %p10457_p1 = scmp.eq.s32.totalorder %s6937_s16, 0 }
  0x35   : > { %6859 = dma.done.wait (%p10457_p1), [#allocation4], 9216   ;;  %p10458_p0 = pmov %p10457_p1 }
  0x36   : > { %p179_p5 = scmp.lt.s32.totalorder %s6937_s16, 1  ;;  %vm674_vm0 = vcmask 1042432   ;;  %vm675_vm1 = vcmask 1046532   ;;  %vm239_vm2 = vsmask.f32 3328  ;;  %s6885_s24 = smov 12  }
  0x37   : > { %6861 = vsyncadd (%p10458_p0), [#allocation4], 4294958080  ;;  %vm240_vm3 = vsmask.f32 7440  ;;  %v10459_v18 = vmov 0  ;;  %s6886_s26 = smov 24  }
  0x38   : > { %s180_s19 = scalar_select %p179_p5, %s6937_s16, 1  ;;  %vm7041_vm4 = vmor %vm674_vm0, %vm675_vm1  ;;  %v10462_v57 = vmov 0  ;;  %vm1618_vm6 = vcmask 1041408   ;;  %vm1275_vm7 = vcmask 31744   ;;  %vm1324_vm8 = vcmask 64512  }
  0x39   : > { %v10460_v18 = vsel %vm7041_vm4, 4294967295, %v10459_v18  ;;  %s6887_s29 = smov 8   ;;  %s6888_s30 = smov 32   ;;  %vm7080_vm5 = vmor %vm239_vm2, %vm240_vm3  ;;  %vm1357_vm9 = vcmask 97280   ;;  %vm1390_vm10 = vcmask 130048   ;;  %vm1423_vm11 = vcmask 162816  }
  0x3a   : > { %s6600_s20 = smul.u32 216, %s180_s19  ;;  %10461 = vst [vmem:[#allocation9_spill] sm:$0xff] %v10460_v18  ;;  %v10463_v57 = vsel %vm7080_vm5, 4294967295, %v10462_v57  ;;  %s6889_s4 = smov 20   ;;  %vm1456_vm12 = vcmask 195584   ;;  %vm1489_vm13 = vcmask 228352  }
  0x3b   : > { %10464 = vst [vmem:[#allocation10_spill] sm:$0xff] %v10463_v57  ;;  %s6890_s9 = smov 4   ;;  %s6891_s10 = smov 16   ;;  %vm1522_vm14 = vcmask 261120   ;;  %vm1585_vm15 = vcmask 293888   ;;  %vm2213_vm0 = vcmask 1040384  }
  0x3c   : > { %s7004_s28 = scalar_lea.vmem %s10356_s0, %s6600_s20  ;;  %s6892_s25 = smov 28   ;;  %vm2214_vm1 = vsmask.f32 256  ;;  %vm2264_vm3 = vsmask.f32 7938 }
  0x3d   : > { %v188_v0 = vld [vmem:[%s7004_s28 + $0xc] sm:$0xf]  ;;  %v7008_v1 = vld [vmem:[%s7004_s28 + $0x10] sm:$0xf]  ;;  %v7011_v2 = vld [vmem:[%s7004_s28 + $0x18] sm:$0xf] }
  0x3e   : > { %v276_v3 = vshll.u32 %v7008_v1, 16  ;;  %v280_v4 = vshrl.u32 %v7008_v1, 16  ;;  %v7016_v5 = vcombine.low %v188_v0, %v7008_v1  ;;  %v267_v6 = vshrl.u32 %v188_v0, 16  ;;  %v7019_v7 = vld [vmem:[%s7004_s28 + $0x1c] sm:$0xf]  ;;  %vm7663_vm2 = vmand %vm2213_vm0, %vm2214_vm1  ;;  %p10762_p9 = scmp.ne.s32.totalorder %s10452_s22, 0 }
  0x3f   : > { %v270_v8 = vshll.u32 %v188_v0, 16  ;;  %v291_v9 = vshrl.u32 %v7011_v2, 16  ;;  %v294_v10 = vshll.u32 %v7011_v2, 16  ;;  %v304_v11 = vshrl.u32 %v7019_v7, 16  ;;  %v7025_v12 = vld [vmem:[%s7004_s28] sm:$0xf] }
  0x40   : > { %v7027_v13 = vrot.slane %v280_v4, 4  ;;  %1068 = vrot.lane.b32.xlu1 %v7016_v5, %s6885_s24  ;;  %v269_v14 = vrot.slane %v267_v6, 4  ;;  %v7033_v15 = vcombine.low %v7011_v2, %v7019_v7  ;;  %v7036_v16 = vld [vmem:[%s7004_s28 + $0x4] sm:$0xf]  ;;  %v187_v17 = vld [vmem:[%s7004_s28 + $0x8] sm:$0x1] }
  0x41   : > { %v272_v19 = vrot.slane %v270_v8, 5  ;;  %v262_v20 = vshll.u32 %v187_v17, 16  ;;  %v5606_v21 = vrot.slane %v7025_v12, 9  ;;  %v679_v22 = vrot.slane %v7036_v16, 5  ;;  %v7048_v23 = vld [vmem:[%s7004_s28 + $0x20] sm:$0x1] }
  0x42   : > { %v682_v24 = vrot.slane %v187_v17, 5  ;;  %v5608_v25 = vrot.slane %v7011_v2, 9  ;;  %v693_v26 = vrot.slane %v7019_v7, 5  ;;  %v696_v27 = vrot.slane %v7048_v23, 5  ;;  %v190_v28 = vld [vmem:[%s7004_s28 + $0x14] sm:$0x1] }
  0x43   : > { %v680_v29 = vsel %vm7041_vm4, %v5606_v21, %v679_v22  ;;  %v681_v30 = vrot.slane %v679_v22, 4  ;;  %v5607_v31 = vrot.slane %v188_v0, 9  ;;  %v686_v32 = vrot.slane %v7008_v1, 5  ;;  %v194_v2 = vld [vmem:[%s7004_s28 + $0x24] sm:$0xf] }
  0x44   : > { %1173 = vrot.lane.b32.xlu1 %v7033_v15, %s6886_s26  ;;  %v694_v33 = vsel %vm7041_vm4, %v5608_v25, %v693_v26  ;;  %v695_v34 = vrot.slane %v693_v26, 4  ;;  %v689_v35 = vrot.slane %v190_v28, 5  ;;  %v243_v36 = vshrl.u32 %v7025_v12, 16  ;;  %v196_v26 = vld [vmem:[%s7004_s28 + $0x2c] sm:$0x1] }
  0x45   : > { %v683_v37 = vsel %vm7041_vm4, %v681_v30, %v682_v24  ;;  %v687_v38 = vsel %vm7041_vm4, %v5607_v31, %v686_v32  ;;  %v688_v39 = vrot.slane %v686_v32, 4  ;;  %v246_v40 = vshll.u32 %v7025_v12, 16 }
  0x46   : > { %v5656_v41 = vcombine.low %v680_v29, %v683_v37  ;;  %v697_v42 = vsel %vm7041_vm4, %v695_v34, %v696_v27  ;;  %v245_v43 = vrot.slane %v243_v36, 4  ;;  %v252_v44 = vshll.u32 %v7036_v16, 16 }
  0x47   : > { %v7070_v45 = vcombine.low %v694_v33, %v697_v42  ;;  %v690_v46 = vsel %vm7041_vm4, %v688_v39, %v689_v35  ;;  %v248_v47 = vrot.slane %v246_v40, 5  ;;  %v256_v48 = vshrl.u32 %v7036_v16, 16  ;;  %v6674_v33 = vld [vmem:[%s10357_s1] ss:$8 sps:$4 sm:$0xff]  }
  0x48   : > { %1033 = vrot.lane.b32.xlu0 %v5656_v41, %s6887_s29  ;;  %v5657_v49 = vcombine.low %v687_v38, %v690_v46  ;;  %v254_v50 = vrot.slane %v252_v44, 5  ;;  %v264_v51 = vrot.slane %v262_v20, 5  ;;  %v273_v52 = vor.u32 %v272_v19, %v269_v14  ;;  %v6676_v38 = vld [vmem:[%s10357_s1 + $0x14] ss:$8 sps:$4 sm:$0xff]   ;;  %v6678_v44 = vld [vmem:[%s10357_s1 + $0x10] ss:$8 sps:$4 sm:$0xff]  }
  0x49   : > { %1243 = vrot.lane.b32.xlu1 %v7070_v45, %s6888_s30  ;;  %v249_v53 = vor.u32 %v248_v47, %v245_v43  ;;  %v258_v54 = vrot.slane %v256_v48, 4  ;;  %v278_v55 = vrot.slane %v276_v3, 5  ;;  %v286_v56 = vshll.u32 %v190_v28, 16 }
  0x4a   : > { %v274_v58 = vrot.slane %v273_v52, 4  ;;  %v293_v59 = vrot.slane %v291_v9, 4  ;;  %v296_v60 = vrot.slane %v294_v10, 5  ;;  %v300_v61 = vshll.u32 %v7019_v7, 16  ;;  %v195_v9 = vld [vmem:[%s7004_s28 + $0x28] sm:$0xf] }
  0x4b   : > { %v250_v62 = vrot.slane %v249_v53, 4  ;;  %v259_v63 = vor.u32 %v258_v54, %v254_v50  ;;  %v283_v0 = vor.u32 %v7027_v13, %v278_v55  ;;  %v288_v1 = vrot.slane %v286_v56, 5  ;;  %v197_v53 = vld [vmem:[%s7004_s28 + $0x30] sm:$0xf] }
  0x4c   : > { %1138 = vrot.lane.b32.xlu0 %v5657_v49, %s6889_s4  ;;  %v279_v3 = vsel %vm7080_vm5, %v274_v58, %v278_v55  ;;  %v297_v4 = vor.u32 %v296_v60, %v293_v59  ;;  %v302_v6 = vrot.slane %v300_v61, 5  ;;  %v306_v8 = vrot.slane %v304_v11, 4  ;;  %v198_v58 = vld [vmem:[%s7004_s28 + $0x34] sm:$0xf]  ;;  %v199_v59 = vld [vmem:[%s7004_s28 + $0x38] sm:$0x1] }
  0x4d   : > { %1035 = vrot.lane.b32.xlu1 %v5657_v49, %s6887_s29  ;;  %v255_v10 = vsel %vm7080_vm5, %v250_v62, %v254_v50  ;;  %v260_v13 = vrot.slane %v259_v63, 4  ;;  %v284_v14 = vrot.slane %v283_v0, 4  ;;  %v310_v17 = vshll.u32 %v7048_v23, 16  ;;  %v6672_v23 = vld [vmem:[%s10357_s1 + $0x4] ss:$8 sps:$4 sm:$0xff]  }
  0x4e   : > { %v298_v19 = vrot.slane %v297_v4, 4  ;;  %v307_v20 = vor.u32 %v306_v8, %v302_v6  ;;  %v315_v21 = vshrl.u32 %v194_v2, 16  ;;  %v318_v22 = vshll.u32 %v194_v2, 16  ;;  %1625 = vmatprep.subr.bf16.mxu0 %v6672_v23  ;;  %6594 = vmatprep.subr.bf16.mxu1 %v6672_v23 }
  0x4f   : > { %v265_v24 = vsel %vm7080_vm5, %v260_v13, %v264_v51  ;;  %v289_v7 = vsel %vm7080_vm5, %v284_v14, %v288_v1  ;;  %v312_v11 = vrot.slane %v310_v17, 5  ;;  %v328_v25 = vshrl.u32 %v195_v9, 16  ;;  %1626 = vmatpush1.bf16.msra.mxu0 %v6674_v33  ;;  %6597 = vmatpush1.bf16.msra.mxu1 %v6674_v33 }
  0x50   : > { %v5640_v27 = vcombine.low %v255_v10, %v265_v24  ;;  %v5641_v28 = vcombine.low %v279_v3, %v289_v7  ;;  %v303_v29 = vsel %vm7080_vm5, %v298_v19, %v302_v6  ;;  %v308_v30 = vrot.slane %v307_v20, 4  ;;  %1627 = vmatprep.subr.bf16.mxu0 %v6676_v38  ;;  %6595 = vmatprep.subr.bf16.mxu1 %v6676_v38  ;;  %v200_v7 = vld [vmem:[%s7004_s28 + $0x3c] sm:$0xf] }
  0x51   : > { %v5609_v31 = vrot.slane %v194_v2, 9  ;;  %v700_v32 = vrot.slane %v195_v9, 5  ;;  %v703_v35 = vrot.slane %v196_v26, 5  ;;  %v317_v36 = vrot.slane %v315_v21, 4 }
  0x52   : > { %953 = vrot.lane.b32.xlu0 %v5640_v27, %s6890_s9  ;;  %1103 = vrot.lane.b32.xlu1 %v5641_v28, %s6891_s10  ;;  %v313_v34 = vsel %vm7080_vm5, %v308_v30, %v312_v11  ;;  %v324_v37 = vshll.u32 %v195_v9, 16  ;;  %v320_v41 = vrot.slane %v318_v22, 5  ;;  %v330_v42 = vrot.slane %v328_v25, 4  ;;  %v201_v11 = vld [vmem:[%s7004_s28 + $0x40] sm:$0xf] }
  0x53   : > { %v5642_v39 = vcombine.low %v303_v29, %v313_v34  ;;  %v702_v40 = vrot.slane %v700_v32, 4  ;;  %v7122_v46 = vcombine.low %v194_v2, %v195_v9  ;;  %v701_v47 = vsel %vm7041_vm4, %v5609_v31, %v700_v32  ;;  %1628 = vmatpush1.bf16.msra.mxu0 %v6678_v44  ;;  %6598 = vmatpush1.bf16.msra.mxu1 %v6678_v44 }
  0x54   : > { %v326_v43 = vrot.slane %v324_v37, 5  ;;  %v321_v49 = vor.u32 %v320_v41, %v317_v36  ;;  %v334_v51 = vshll.u32 %v196_v26, 16  ;;  %v339_v60 = vshrl.u32 %v197_v53, 16 }
  0x55   : > { %v704_v48 = vsel %vm7041_vm4, %v702_v40, %v703_v35  ;;  %v342_v61 = vshll.u32 %v197_v53, 16  ;;  %v707_v62 = vrot.slane %v198_v58, 5  ;;  %v352_v1 = vshrl.u32 %v198_v58, 16 }
  0x56   : > { %1208 = vrot.lane.b32.xlu0 %v5642_v39, %s6892_s25  ;;  %1105 = vrot.lane.b32.xlu1 %v5642_v39, %s6891_s10  ;;  %v331_v50 = vor.u32 %v330_v42, %v326_v43  ;;  %v5659_v52 = vcombine.low %v701_v47, %v704_v48  ;;  %v322_v54 = vrot.slane %v321_v49, 4  ;;  %v336_v56 = vrot.slane %v334_v51, 5 }
  0x57   : > { %v348_v2 = vshll.u32 %v198_v58, 16  ;;  %v5610_v3 = vrot.slane %v197_v53, 9  ;;  %v710_v4 = vrot.slane %v199_v59, 5  ;;  %v709_v8 = vrot.slane %v707_v62, 4 }
  0x58   : > { %v332_v55 = vrot.slane %v331_v50, 4  ;;  %v327_v63 = vsel %vm7080_vm5, %v322_v54, %v326_v43  ;;  %v341_v9 = vrot.slane %v339_v60, 4  ;;  %v344_v10 = vrot.slane %v342_v61, 5  ;;  %v1559_v54 = vld [vmem:[%s10357_s1 + $0x20] sm:$0x33] }
  0x59   : > { %v350_v13 = vrot.slane %v348_v2, 5  ;;  %v354_v14 = vrot.slane %v352_v1, 4  ;;  %v7147_v17 = vcombine.low %v197_v53, %v198_v58  ;;  %v708_v19 = vsel %vm7041_vm4, %v5610_v3, %v707_v62  ;;  %v204_v53 = vld [vmem:[%s7004_s28 + $0x4c] sm:$0xf] }
  0x5a   : > { %955 = vrot.lane.b32.xlu0 %v5641_v28, %s6890_s9  ;;  %1175 = vrot.lane.b32.xlu1 %v7122_v46, %s6886_s26  ;;  %v337_v0 = vsel %vm7080_vm5, %v332_v55, %v336_v56  ;;  %v345_v20 = vor.u32 %v344_v10, %v341_v9  ;;  %v358_v22 = vshll.u32 %v199_v59, 16  ;;  %v202_v28 = vld [vmem:[%s7004_s28 + $0x44] sm:$0x1]  ;;  %v363_v29 = vshrl.u32 %v200_v7, 16 }
  0x5b   : > { %v5643_v6 = vcombine.low %v327_v63, %v337_v0  ;;  %v355_v21 = vor.u32 %v354_v14, %v350_v13  ;;  %v366_v30 = vshll.u32 %v200_v7, 16  ;;  %v714_v23 = vrot.slane %v201_v11, 5 }
  0x5c   : > { %v346_v25 = vrot.slane %v345_v20, 4  ;;  %v360_v27 = vrot.slane %v358_v22, 5  ;;  %v376_v33 = vshrl.u32 %v201_v11, 16  ;;  %v372_v34 = vshll.u32 %v201_v11, 16 }
  0x5d   : > { %v356_v26 = vrot.slane %v355_v21, 4  ;;  %v5611_v35 = vrot.slane %v200_v7, 9  ;;  %v717_v36 = vrot.slane %v202_v28, 5  ;;  %v716_v38 = vrot.slane %v714_v23, 4 }
  0x5e   : > { %1070 = vrot.lane.b32.xlu0 %v7033_v15, %s6885_s24  ;;  %1245 = vrot.lane.b32.xlu1 %v5659_v52, %s6888_s30  ;;  %v351_v31 = vsel %vm7080_vm5, %v346_v25, %v350_v13  ;;  %v368_v40 = vrot.slane %v366_v30, 5  ;;  %v374_v41 = vrot.slane %v372_v34, 5  ;;  %v378_v42 = vrot.slane %v376_v33, 4 }
  0x5f   : > { %v361_v32 = vsel %vm7080_vm5, %v356_v26, %v360_v27  ;;  %v7177_v43 = vcombine.low %v200_v7, %v201_v11  ;;  %v715_v44 = vsel %vm7041_vm4, %v5611_v35, %v714_v23  ;;  %v718_v48 = vsel %vm7041_vm4, %v716_v38, %v717_v36  ;;  %v208_v38 = vld [vmem:[%s7004_s28 + $0x5c] sm:$0x1] }
  0x60   : > { %v7171_v37 = vcombine.low %v351_v31, %v361_v32  ;;  %v379_v49 = vor.u32 %v378_v42, %v374_v41  ;;  %v382_v50 = vshll.u32 %v202_v28, 16  ;;  %v5624_v51 = vcombine.low %v7025_v12, %v7036_v16  ;;  %v206_v28 = vld [vmem:[%s7004_s28 + $0x54] sm:$0xf] }
  0x61   : > { %v7193_v55 = vcombine.low %v715_v44, %v718_v48  ;;  %v5683_v61 = vcombine.high %v1559_v54, %v1559_v54  ;;  %v400_v63 = vshrl.u32 %v204_v53, 16  ;;  %v5682_v0 = vcombine.low %v1559_v54, %v1559_v54 }
  0x62   : > { %1140 = vrot.lane.b32.xlu0 %v7070_v45, %s6889_s4  ;;  %1037 = vrot.lane.b32.xlu1 %v7070_v45, %s6887_s29  ;;  %v711_v45 = vsel %vm7041_vm4, %v709_v8, %v710_v4  ;;  %v380_v58 = vrot.slane %v379_v49, 4  ;;  %v384_v59 = vrot.slane %v382_v50, 5  ;;  %v721_v3 = vrot.slane %v204_v53, 5  ;;  %v205_v8 = vld [vmem:[%s7004_s28 + $0x50] sm:$0x1] }
  0x63   : > { %v7156_v24 = vcombine.low %v708_v19, %v711_v45  ;;  %v396_v4 = vshll.u32 %v204_v53, 16  ;;  %5684 = vmatprep.subr.msk.bf16.mxu0 %vm1618_vm6, %v5683_v61  ;;  %v1620_v9 = vsel %vm1618_vm6, %v5682_v0, 0  ;;  %6596 = vmatprep.subr.msk.bf16.mxu1 %vm1618_vm6, %v5683_v61  ;;  %v724_v20 = vrot.slane %v205_v8, 5  ;;  %v210_v61 = vld [vmem:[%s7004_s28 + $0x64] sm:$0xf]  ;;  %vm7670_vm6 = vmand %vm2213_vm0, %vm2264_vm3 }
  0x64   : > { %v385_v2 = vsel %vm7080_vm5, %v380_v58, %v384_v59  ;;  %1630 = vmatpush1.bf16.msra.mxu0 %v1620_v9  ;;  %6599 = vmatpush1.bf16.msra.mxu1 %v1620_v9  ;;  %v723_v45 = vrot.slane %v721_v3, 4  ;;  %v402_v22 = vrot.slane %v400_v63, 4  ;;  %v406_v27 = vshll.u32 %v205_v8, 16 }
  0x65   : > { %v398_v21 = vrot.slane %v396_v4, 5  ;;  %v411_v33 = vshrl.u32 %v206_v28, 16  ;;  %v414_v34 = vshll.u32 %v206_v28, 16  ;;  %v731_v44 = vrot.slane %v208_v38, 5 }
  0x66   : > { %1210 = vrot.lane.b32.xlu0 %v5643_v6, %s6892_s25  ;;  %1107 = vrot.lane.b32.xlu1 %v5643_v6, %s6891_s10  ;;  %v725_v25 = vsel %vm7041_vm4, %v723_v45, %v724_v20  ;;  %v408_v32 = vrot.slane %v406_v27, 5  ;;  %v430_v54 = vshll.u32 %v208_v38, 16  ;;  %v735_v8 = vrot.slane %v210_v61, 5 }
  0x67   : > { %v403_v26 = vor.u32 %v402_v22, %v398_v21  ;;  %v416_v49 = vrot.slane %v414_v34, 5 }
  0x68   : > { %v432_v63 = vrot.slane %v430_v54, 5 }
  0x69   : > { %v404_v31 = vrot.slane %v403_v26, 4 }
  0x6a   : > { %957 = vrot.lane.b32.xlu0 %v5642_v39, %s6890_s9  ;;  %1177 = vrot.lane.b32.xlu1 %v7147_v17, %s6886_s26  ;;  %v365_v39 = vrot.slane %v363_v29, 4  ;;  %v207_v29 = vld [vmem:[%s7004_s28 + $0x58] sm:$0xf] }
  0x6b   : > { %v424_v35 = vshrl.u32 %v207_v29, 16 }
  0x6c   : > { %v369_v47 = vor.u32 %v368_v40, %v365_v39  ;;  %v728_v39 = vrot.slane %v207_v29, 5  ;;  %v420_v40 = vshll.u32 %v207_v29, 16 }
  0x6e   : > { %1072 = vrot.lane.b32.xlu0 %v7122_v46, %s6885_s24  ;;  %1247 = vrot.lane.b32.xlu1 %v7156_v24, %s6888_s30  ;;  %v370_v56 = vrot.slane %v369_v47, 4  ;;  %v413_v47 = vrot.slane %v411_v33, 4  ;;  %v730_v48 = vrot.slane %v728_v39, 4  ;;  %v422_v50 = vrot.slane %v420_v40, 5  ;;  %v213_v33 = vld [vmem:[%s7004_s28 + $0x70] sm:$0xf] }
  0x6f   : > { %v742_v40 = vrot.slane %v213_v33, 5 }
  0x70   : > { %v375_v1 = vsel %vm7080_vm5, %v370_v56, %v374_v41  ;;  %v5613_v41 = vrot.slane %v206_v28, 9  ;;  %v732_v56 = vsel %vm7041_vm4, %v730_v48, %v731_v44  ;;  %v417_v58 = vor.u32 %v416_v49, %v413_v47 }
  0x71   : > { %v5645_v10 = vcombine.low %v375_v1, %v385_v2  ;;  %v744_v49 = vrot.slane %v742_v40, 4 }
  0x72   : > { %1142 = vrot.lane.b32.xlu0 %v5659_v52, %s6889_s4  ;;  %1039 = vrot.lane.b32.xlu1 %v5659_v52, %s6887_s29  ;;  %v203_v52 = vld [vmem:[%s7004_s28 + $0x48] sm:$0xf]  ;;  %v418_v0 = vrot.slane %v417_v58, 4 }
  0x73   : > { %v387_v60 = vshrl.u32 %v203_v52, 16  ;;  %v390_v62 = vshll.u32 %v203_v52, 16  ;;  %v5612_v13 = vrot.slane %v203_v52, 9  ;;  %v7221_v7 = vcombine.low %v203_v52, %v204_v53 }
  0x74   : > { %v426_v52 = vrot.slane %v424_v35, 4  ;;  %v7247_v53 = vcombine.low %v206_v28, %v207_v29  ;;  %v423_v9 = vsel %vm7080_vm5, %v418_v0, %v422_v50 }
  0x75   : > { %v389_v14 = vrot.slane %v387_v60, 4  ;;  %v392_v19 = vrot.slane %v390_v62, 5  ;;  %v209_v60 = vld [vmem:[%s7004_s28 + $0x60] sm:$0xf] }
  0x76   : > { %1212 = vrot.lane.b32.xlu0 %v7171_v37, %s6892_s25  ;;  %1109 = vrot.lane.b32.xlu1 %v7171_v37, %s6891_s10  ;;  %v427_v59 = vor.u32 %v426_v52, %v422_v50  ;;  %v435_v2 = vshrl.u32 %v209_v60, 16  ;;  %v438_v4 = vshll.u32 %v209_v60, 16  ;;  %v7270_v26 = vcombine.low %v209_v60, %v210_v61 }
  0x77   : > { %v393_v11 = vor.u32 %v392_v19, %v389_v14  ;;  %v444_v14 = vshll.u32 %v210_v61, 16  ;;  %v5614_v19 = vrot.slane %v209_v60, 9 }
  0x78   : > { %v428_v1 = vrot.slane %v427_v59, 4  ;;  %v437_v22 = vrot.slane %v435_v2, 4 }
  0x79   : > { %v394_v23 = vrot.slane %v393_v11, 4  ;;  %v440_v11 = vrot.slane %v438_v4, 5  ;;  %v736_v28 = vsel %vm7041_vm4, %v5614_v19, %v735_v8  ;;  %v216_v19 = vld [vmem:[%s7004_s28 + $0x7c] sm:$0xf] }
  0x7a   : > { %959 = vrot.lane.b32.xlu0 %v5643_v6, %s6890_s9  ;;  %1179 = vrot.lane.b32.xlu1 %v7177_v43, %s6886_s26  ;;  %v6893_v6 = vmov 0  }
  0x7b   : > { %1657 = vmatprep.mubr.bf16.mxu0 %v6893_v6  ;;  %2205 = vst [vmem:[#allocation2] sm:$0xf] %v6893_v6  ;;  %2206 = vst [vmem:[#allocation2 + $0x4] sm:$0xf] %v6893_v6  ;;  %1777 = vmatprep.mubr.bf16.mxu1 %v6893_v6  ;;  %v399_v36 = vsel %vm7080_vm5, %v394_v23, %v398_v21  ;;  %v737_v21 = vrot.slane %v735_v8, 4 }
  0x7c   : > { %2207 = vst [vmem:[#allocation2 + $0x8] sm:$0x1] %v6893_v6  ;;  %2209 = vst [vmem:[#allocation2 + $0xcc] sm:$0xf] %v6893_v6 }
  0x7d   : > { %2210 = vst [vmem:[#allocation2 + $0xd0] sm:$0xf] %v6893_v6  ;;  %2211 = vst [vmem:[#allocation2 + $0xd4] sm:$0x1] %v6893_v6 }
  0x7e   : > { %1074 = vrot.lane.b32.xlu0 %v7147_v17, %s6885_s24  ;;  %1249 = vrot.lane.b32.xlu1 %v7193_v55, %s6888_s30 }
  0x82   : > { %1144 = vrot.lane.b32.xlu0 %v7156_v24, %s6889_s4  ;;  %1041 = vrot.lane.b32.xlu1 %v7156_v24, %s6887_s29  ;;  %v722_v24 = vsel %vm7041_vm4, %v5612_v13, %v721_v3  ;;  %v211_v3 = vld [vmem:[%s7004_s28 + $0x68] sm:$0x1]  ;;  %v448_v13 = vshrl.u32 %v210_v61, 16 }
  0x83   : > { %v5662_v30 = vcombine.low %v722_v24, %v725_v25  ;;  %v738_v45 = vrot.slane %v211_v3, 5  ;;  %v446_v24 = vrot.slane %v444_v14, 5  ;;  %v454_v27 = vshll.u32 %v211_v3, 16  ;;  %v215_v14 = vld [vmem:[%s7004_s28 + $0x78] sm:$0xf] }
  0x84   : > { %v450_v25 = vrot.slane %v448_v13, 4 }
  0x85   : > { %v739_v29 = vsel %vm7041_vm4, %v737_v21, %v738_v45  ;;  %v483_v21 = vshrl.u32 %v215_v14, 16 }
  0x86   : > { %1214 = vrot.lane.b32.xlu0 %v5645_v10, %s6892_s25  ;;  %1111 = vrot.lane.b32.xlu1 %v5645_v10, %s6891_s10  ;;  %v451_v23 = vor.u32 %v450_v25, %v446_v24  ;;  %v496_v25 = vshrl.u32 %v216_v19, 16 }
  0x88   : > { %v452_v35 = vrot.slane %v451_v23, 4  ;;  %v5616_v23 = vrot.slane %v215_v14, 9 }
  0x8a   : > { %961 = vrot.lane.b32.xlu0 %v7171_v37, %s6890_s9  ;;  %1181 = vrot.lane.b32.xlu1 %v7221_v7, %s6886_s26  ;;  %v409_v37 = vsel %vm7080_vm5, %v404_v31, %v408_v32  ;;  %v5664_v31 = vcombine.low %v736_v28, %v739_v29  ;;  %v212_v32 = vld [vmem:[%s7004_s28 + $0x6c] sm:$0xf]  ;;  %v749_v28 = vrot.slane %v216_v19, 5  ;;  %v492_v29 = vshll.u32 %v216_v19, 16 }
  0x8b   : > { %v5646_v42 = vcombine.low %v399_v36, %v409_v37  ;;  %v456_v36 = vrot.slane %v454_v27, 5  ;;  %v214_v37 = vld [vmem:[%s7004_s28 + $0x74] sm:$0x1]  ;;  %v459_v38 = vshrl.u32 %v212_v32, 16  ;;  %v5615_v48 = vrot.slane %v212_v32, 9 }
  0x8c   : > { %v745_v50 = vrot.slane %v214_v37, 5  ;;  %v7299_v61 = vcombine.low %v212_v32, %v213_v33  ;;  %v478_v2 = vshll.u32 %v214_v37, 16  ;;  %v217_v27 = vld [vmem:[%s7004_s28 + $0x80] sm:$0x1]  ;;  %v498_v37 = vrot.slane %v496_v25, 4 }
  0x8d   : > { %v457_v47 = vsel %vm7080_vm5, %v452_v35, %v456_v36  ;;  %v461_v52 = vrot.slane %v459_v38, 4  ;;  %v7329_v36 = vrot.slane %v492_v29, 5  ;;  %v750_v12 = vsel %vm7041_vm4, %v5616_v23, %v749_v28  ;;  %v7380_v25 = vld [vmem:[%s7004_s28 + $0x98] sm:$0x1] }
  0x8e   : > { %1076 = vrot.lane.b32.xlu0 %v7177_v43, %s6885_s24  ;;  %1251 = vrot.lane.b32.xlu1 %v5662_v30, %s6888_s30  ;;  %v746_v0 = vsel %vm7041_vm4, %v744_v49, %v745_v50  ;;  %v480_v13 = vrot.slane %v478_v2, 5  ;;  %v502_v16 = vshll.u32 %v217_v27, 16  ;;  %v7352_v49 = vld [vmem:[%s7004_s28 + $0x94] sm:$0xf] }
  0x8f   : > { %v540_v2 = vshll.u32 %v7352_v49, 16 }
  0x91   : > { %v7386_v29 = vrot.slane %v540_v2, 5  ;;  %v7419_v2 = vld [vmem:[%s7004_s28 + $0xa0] sm:$0xf] }
  0x92   : > { %1146 = vrot.lane.b32.xlu0 %v7193_v55, %s6889_s4  ;;  %1043 = vrot.lane.b32.xlu1 %v7193_v55, %s6887_s29  ;;  %v729_v55 = vsel %vm7041_vm4, %v5613_v41, %v728_v39  ;;  %v462_v39 = vshll.u32 %v212_v32, 16  ;;  %v472_v41 = vshrl.u32 %v213_v33, 16  ;;  %v752_v32 = vrot.slane %v217_v27, 5 }
  0x93   : > { %v5663_v62 = vcombine.low %v729_v55, %v732_v56 }
  0x94   : > { %v464_v56 = vrot.slane %v462_v39, 5  ;;  %v474_v59 = vrot.slane %v472_v41, 4  ;;  %v7340_v41 = vcombine.low %v215_v14, %v216_v19 }
  0x96   : > { %1216 = vrot.lane.b32.xlu0 %v5646_v42, %s6892_s25  ;;  %1113 = vrot.lane.b32.xlu1 %v5646_v42, %s6891_s10 }
  0x9a   : > { %963 = vrot.lane.b32.xlu0 %v5645_v10, %s6890_s9  ;;  %1183 = vrot.lane.b32.xlu1 %v7247_v53, %s6886_s26  ;;  %v433_v10 = vsel %vm7080_vm5, %v428_v1, %v432_v63  ;;  %v465_v63 = vor.u32 %v464_v56, %v461_v52 }
  0x9b   : > { %v5647_v20 = vcombine.low %v423_v9, %v433_v10 }
  0x9c   : > { %v466_v8 = vrot.slane %v465_v63, 4  ;;  %v218_v63 = vld [vmem:[%s7004_s28 + $0x84] sm:$0xf] }
  0x9e   : > { %1078 = vrot.lane.b32.xlu0 %v7221_v7, %s6885_s24  ;;  %1253 = vrot.lane.b32.xlu1 %v5663_v62, %s6888_s30 }
  0xa2   : > { %1148 = vrot.lane.b32.xlu0 %v5662_v30, %s6889_s4  ;;  %1045 = vrot.lane.b32.xlu1 %v5662_v30, %s6887_s29  ;;  %v441_v30 = vor.u32 %v440_v11, %v437_v22  ;;  %v486_v22 = vshll.u32 %v215_v14, 16  ;;  %v504_v14 = vrot.slane %v502_v16, 5 }
  0xa4   : > { %v442_v34 = vrot.slane %v441_v30, 4  ;;  %v488_v35 = vrot.slane %v486_v22, 5 }
  0xa6   : > { %1218 = vrot.lane.b32.xlu0 %v5647_v20, %s6892_s25  ;;  %1115 = vrot.lane.b32.xlu1 %v5647_v20, %s6891_s10  ;;  %v447_v44 = vsel %vm7080_vm5, %v442_v34, %v446_v24  ;;  %v751_v34 = vrot.slane %v749_v28, 4 }
  0xa7   : > { %v7291_v54 = vcombine.low %v447_v44, %v457_v47 }
  0xa8   : > { %v753_v44 = vsel %vm7041_vm4, %v751_v34, %v752_v32  ;;  %v5617_v34 = vrot.slane %v218_v63, 9 }
  0xaa   : > { %965 = vrot.lane.b32.xlu0 %v5646_v42, %s6890_s9  ;;  %1185 = vrot.lane.b32.xlu1 %v7270_v26, %s6886_s26  ;;  %v468_v42 = vshll.u32 %v213_v33, 16  ;;  %v485_v33 = vrot.slane %v483_v21, 4 }
  0xac   : > { %v470_v58 = vrot.slane %v468_v42, 5  ;;  %v489_v47 = vor.u32 %v488_v35, %v485_v33 }
  0xae   : > { %1080 = vrot.lane.b32.xlu0 %v7247_v53, %s6885_s24  ;;  %1255 = vrot.lane.b32.xlu1 %v5664_v31, %s6888_s30  ;;  %v475_v1 = vor.u32 %v474_v59, %v470_v58 }
  0xb0   : > { %v476_v10 = vrot.slane %v475_v1, 4  ;;  %v7366_v1 = vcombine.low %v750_v12, %v753_v44 }
  0xb2   : > { %1150 = vrot.lane.b32.xlu0 %v5663_v62, %s6889_s4  ;;  %1047 = vrot.lane.b32.xlu1 %v5663_v62, %s6887_s29  ;;  %v1069_v55 = vpop.permute.xlu1 %1068  ;;  %v743_v62 = vsel %vm7041_vm4, %v5615_v48, %v742_v40  ;;  %v481_v24 = vsel %vm7080_vm5, %v476_v10, %v480_v13  ;;  %v499_v48 = vor.u32 %v498_v37, %v7329_v36  ;;  %v490_v10 = vrot.slane %v489_v47, 4 }
  0xb3   : > { %v7308_v4 = vcombine.low %v743_v62, %v746_v0 }
  0xb4   : > { %v500_v13 = vrot.slane %v499_v48, 4 }
  0xb6   : > { %1220 = vrot.lane.b32.xlu0 %v7291_v54, %s6892_s25  ;;  %1117 = vrot.lane.b32.xlu1 %v7291_v54, %s6891_s10  ;;  %v7297_v60 = vpop.permute.xlu1 %1173  ;;  %v505_v33 = vsel %vm7080_vm5, %v500_v13, %v504_v14  ;;  %v763_v14 = vrot.slane %v7352_v49, 5 }
  0xba   : > { %967 = vrot.lane.b32.xlu0 %v5647_v20, %s6890_s9  ;;  %v1034_v3 = vpop.permute.xlu0 %1033  ;;  %1187 = vrot.lane.b32.xlu1 %v7299_v61, %s6886_s26  ;;  %v471_v20 = vsel %vm7080_vm5, %v466_v8, %v470_v58  ;;  %v219_v58 = vld [vmem:[%s7004_s28 + $0x88] sm:$0xf] }
  0xbb   : > { %v7310_v9 = vpop.permute.xlu1 %1243  ;;  %v7327_v30 = vcombine.low %v471_v20, %v481_v24  ;;  %v7374_v20 = vld [vmem:[%s7004_s28 + $0x8c] sm:$0x1]  ;;  %v756_v21 = vrot.slane %v219_v58, 5  ;;  %v510_v24 = vshll.u32 %v218_v63, 16  ;;  %v516_v32 = vshll.u32 %v219_v58, 16 }
  0xbd   : > { %v7406_v47 = vrot.slane %v516_v32, 5 }
  0xbe   : > { %1082 = vrot.lane.b32.xlu0 %v7270_v26, %s6885_s24  ;;  %v1139_v45 = vpop.permute.xlu0 %1138  ;;  %1257 = vrot.lane.b32.xlu1 %v7308_v4, %s6888_s30 }
  0xbf   : > { %v7320_v11 = vpop.permute.xlu1 %1035 }
  0xc2   : > { %1152 = vrot.lane.b32.xlu0 %v5664_v31, %s6889_s4  ;;  %1049 = vrot.lane.b32.xlu1 %v5664_v31, %s6887_s29 }
  0xc4   : > { %v954_v38 = vpop.permute.xlu0 %953  ;;  %v1104_v39 = vpop.permute.xlu1 %1103 }
  0xc5   : > { %v1278_v31 = vsel %vm1275_vm7, %v5624_v51, %v954_v38  ;;  %v7345_v51 = vld [vmem:[%s7004_s28 + $0x90] sm:$0xf] }
  0xc6   : > { %v1326_v40 = vsel %vm1324_vm8, %v1278_v31, %v1034_v3  ;;  %1222 = vrot.lane.b32.xlu0 %v7327_v30, %s6892_s25  ;;  %1119 = vrot.lane.b32.xlu1 %v7327_v30, %s6891_s10  ;;  %v534_v62 = vshll.u32 %v7345_v51, 16  ;;  %v544_v3 = vshrl.u32 %v7352_v49, 16  ;;  %v759_v31 = vrot.slane %v7374_v20, 5 }
  0xc7   : > { %v1359_v42 = vsel %vm1357_vm9, %v1326_v40, %v1069_v55  ;;  %v531_v55 = vshrl.u32 %v7345_v51, 16  ;;  %v550_v40 = vshll.u32 %v7380_v25, 16 }
  0xc8   : > { %v1392_v50 = vsel %vm1390_vm10, %v1359_v42, %v1104_v39  ;;  %v1209_v52 = vpop.permute.xlu0 %1208  ;;  %v1106_v56 = vpop.permute.xlu1 %1105  ;;  %v536_v28 = vrot.slane %v534_v62, 5  ;;  %v546_v23 = vrot.slane %v544_v3, 4  ;;  %v758_v39 = vrot.slane %v756_v21, 4 }
  0xc9   : > { %v1425_v59 = vsel %vm1423_vm11, %v1392_v50, %v1139_v45  ;;  %v507_v45 = vshrl.u32 %v218_v63, 16  ;;  %v533_v27 = vrot.slane %v531_v55, 4  ;;  %v512_v42 = vrot.slane %v510_v24, 5 }
  0xca   : > { %v1458_v0 = vsel %vm1456_vm12, %v1425_v59, %v7297_v60  ;;  %969 = vrot.lane.b32.xlu0 %v7291_v54, %s6890_s9  ;;  %1189 = vrot.lane.b32.xlu1 %v7340_v41, %s6886_s26  ;;  %v547_v44 = vor.u32 %v546_v23, %v7386_v29  ;;  %v7409_v55 = vcombine.low %v218_v63, %v219_v58  ;;  %v552_v63 = vrot.slane %v550_v40, 5 }
  0xcb   : > { %v1491_v8 = vsel %vm1489_vm13, %v1458_v0, %v1209_v52  ;;  %v509_v16 = vrot.slane %v507_v45, 4  ;;  %v757_v62 = vsel %vm7041_vm4, %v5617_v34, %v756_v21  ;;  %v760_v0 = vsel %vm7041_vm4, %v758_v39, %v759_v31 }
  0xcc   : > { %v956_v19 = vpop.permute.xlu0 %955  ;;  %v1524_v60 = vsel %vm1522_vm14, %v1491_v8, %v7310_v9  ;;  %v1176_v54 = vpop.permute.xlu1 %1175  ;;  %v520_v9 = vshrl.u32 %v219_v58, 16  ;;  %v548_v58 = vrot.slane %v547_v44, 4  ;;  %v568_v45 = vshrl.u32 %v7419_v2, 16 }
  0xcd   : > { %v1281_v22 = vsel %vm1275_vm7, %v7016_v5, %v956_v19  ;;  %5685 = vmatmul.mubr.msk.bf16.vlgmr.msra.gmra.mrb[0].mxu0 %vm1585_vm15, %v1524_v60  ;;  %v495_v5 = vsel %vm7080_vm5, %v490_v10, %v7329_v36  ;;  %v537_v36 = vor.u32 %v536_v28, %v533_v27  ;;  %v513_v10 = vor.u32 %v512_v42, %v509_v16 }
  0xce   : > { %1084 = vrot.lane.b32.xlu0 %v7299_v61, %s6885_s24  ;;  %1259 = vrot.lane.b32.xlu1 %v7366_v1, %s6888_s30  ;;  %v1328_v35 = vsel %vm1324_vm8, %v1281_v22, %v7320_v11  ;;  %v7403_v11 = vcombine.low %v495_v5, %v505_v33  ;;  %v522_v48 = vrot.slane %v520_v9, 4  ;;  %v7434_v27 = vcombine.low %v757_v62, %v760_v0  ;;  %v7473_v62 = vld [vmem:[%s7004_s28 + $0xa8] sm:$0xf] }
  0xcf   : > { %1667 = vmatprep.mubr.bf16.mxu0 %v6893_v6  ;;  %v538_v8 = vrot.slane %v537_v36, 4  ;;  %v5618_v28 = vrot.slane %v7345_v51, 9  ;;  %v766_v9 = vrot.slane %v7380_v25, 5  ;;  %v514_v5 = vrot.slane %v513_v10, 4  ;;  %v7477_v10 = vld [vmem:[%s7004_s28 + $0xac] sm:$0xf] }
  0xd0   : > { %v1071_v37 = vpop.permute.xlu0 %1070  ;;  %v1246_v38 = vpop.permute.xlu1 %1245  ;;  %v523_v13 = vor.u32 %v522_v48, %v7406_v47  ;;  %v553_v34 = vsel %vm7080_vm5, %v548_v58, %v552_v63  ;;  %v570_v40 = vrot.slane %v568_v45, 4  ;;  %v592_v45 = vshrl.u32 %v7477_v10, 16 }
  0xd1   : > { %v1361_v12 = vsel %vm1357_vm9, %v1328_v35, %v1071_v37  ;;  %v543_v32 = vsel %vm7080_vm5, %v538_v8, %v7386_v29  ;;  %v765_v35 = vrot.slane %v763_v14, 4  ;;  %v7451_v37 = vld [vmem:[%s7004_s28 + $0xa4] sm:$0x1]  ;;  %v764_v16 = vsel %vm7041_vm4, %v5618_v28, %v763_v14 }
  0xd2   : > { %1154 = vrot.lane.b32.xlu0 %v7308_v4, %s6889_s4  ;;  %1051 = vrot.lane.b32.xlu1 %v7308_v4, %s6887_s29  ;;  %v1394_v50 = vsel %vm1390_vm10, %v1361_v12, %v1106_v56  ;;  %v7416_v4 = vld [vmem:[%s7004_s28 + $0x9c] sm:$0xf]  ;;  %v526_v56 = vshll.u32 %v7374_v20, 16  ;;  %v564_v20 = vshll.u32 %v7419_v2, 16  ;;  %v524_v25 = vrot.slane %v523_v13, 4 }
  0xd3   : > { %v555_v19 = vshrl.u32 %v7416_v4, 16  ;;  %v558_v60 = vshll.u32 %v7416_v4, 16  ;;  %v7456_v36 = vcombine.low %v543_v32, %v553_v34  ;;  %v519_v42 = vsel %vm7080_vm5, %v514_v5, %v7406_v47 }
  0xd4   : > { %v1141_v52 = vpop.permute.xlu0 %1140  ;;  %v1038_v59 = vpop.permute.xlu1 %1037  ;;  %v528_v33 = vrot.slane %v526_v56, 5  ;;  %v566_v31 = vrot.slane %v564_v20, 5  ;;  %v574_v48 = vshll.u32 %v7451_v37, 16  ;;  %v770_v13 = vrot.slane %v7419_v2, 5 }
  0xd5   : > { %v1427_v3 = vsel %vm1423_vm11, %v1394_v50, %v1141_v52  ;;  %v557_v29 = vrot.slane %v555_v19, 4  ;;  %v560_v39 = vrot.slane %v558_v60, 5  ;;  %v582_v14 = vshll.u32 %v7473_v62, 16 }
  0xd6   : > { %1224 = vrot.lane.b32.xlu0 %v7403_v11, %s6892_s25  ;;  %1121 = vrot.lane.b32.xlu1 %v7403_v11, %s6891_s10  ;;  %v1460_v21 = vsel %vm1456_vm12, %v1427_v3, %v1176_v54  ;;  %v529_v44 = vsel %vm7080_vm5, %v524_v25, %v528_v33  ;;  %v571_v52 = vor.u32 %v570_v40, %v566_v31  ;;  %v576_v63 = vrot.slane %v574_v48, 5  ;;  %v229_v40 = vld [vmem:[%s7004_s28 + $0xb0] sm:$0x1] }
  0xd7   : > { %v561_v50 = vor.u32 %v560_v39, %v557_v29  ;;  %v7480_v56 = vcombine.low %v519_v42, %v529_v44  ;;  %v588_v20 = vshll.u32 %v7477_v10, 16  ;;  %v5619_v32 = vrot.slane %v7416_v4, 9 }
  0xd8   : > { %v1211_v22 = vpop.permute.xlu0 %1210  ;;  %v1108_v24 = vpop.permute.xlu1 %1107  ;;  %v572_v60 = vrot.slane %v571_v52, 4  ;;  %v772_v5 = vrot.slane %v770_v13, 4  ;;  %v598_v44 = vshll.u32 %v229_v40, 16 }
  0xd9   : > { %v1493_v23 = vsel %vm1489_vm13, %v1460_v21, %v1211_v22  ;;  %v562_v19 = vrot.slane %v561_v50, 4  ;;  %v590_v25 = vrot.slane %v588_v20, 5 }
  0xda   : > { %971 = vrot.lane.b32.xlu0 %v7327_v30, %s6890_s9  ;;  %v1526_v54 = vsel %vm1522_vm14, %v1493_v23, %v1246_v38  ;;  %1191 = vrot.lane.b32.xlu1 %v7409_v55, %s6886_s26  ;;  %v7497_v23 = vcombine.low %v7416_v4, %v7419_v2  ;;  %v577_v2 = vsel %vm7080_vm5, %v572_v60, %v576_v63 }
  0xdb   : > { %5686 = vmatmul.mubr.msk.bf16.gmra.mrb[4].mxu0 %vm1585_vm15, %v1526_v54  ;;  %v584_v54 = vrot.slane %v582_v14, 5  ;;  %v567_v34 = vsel %vm7080_vm5, %v562_v19, %v566_v31 }
  0xdc   : > { %v958_v30 = vpop.permute.xlu0 %957  ;;  %v1178_v12 = vpop.permute.xlu1 %1177  ;;  %1677 = vmatprep.mubr.bf16.mxu0 %v6893_v6  ;;  %v7517_v31 = vcombine.low %v567_v34, %v577_v2  ;;  %v7570_v34 = vcombine.low %v7345_v51, %v7352_v49 }
  0xdd   : > { %v1284_v38 = vsel %vm1275_vm7, %v7033_v15, %v958_v30  ;;  %v767_v15 = vsel %vm7041_vm4, %v765_v35, %v766_v9  ;;  %v594_v35 = vrot.slane %v592_v45, 4  ;;  %v780_v45 = vrot.slane %v229_v40, 5  ;;  %v231_v40 = vld [vmem:[%s7004_s28 + $0xb8] sm:$0xf] }
  0xde   : > { %1086 = vrot.lane.b32.xlu0 %v7340_v41, %s6885_s24  ;;  %1261 = vrot.lane.b32.xlu1 %v7434_v27, %s6888_s30  ;;  %v1330_v0 = vsel %vm1324_vm8, %v1284_v38, %v1038_v59  ;;  %v7482_v58 = vcombine.low %v764_v16, %v767_v15  ;;  %v579_v59 = vshrl.u32 %v7473_v62, 16  ;;  %v771_v38 = vsel %vm7041_vm4, %v5619_v32, %v770_v13 }
  0xdf   : > { %v595_v42 = vor.u32 %v594_v35, %v590_v25 }
  0xe0   : > { %v1073_v3 = vpop.permute.xlu0 %1072  ;;  %v1248_v8 = vpop.permute.xlu1 %1247  ;;  %v581_v33 = vrot.slane %v579_v59, 4 }
  0xe1   : > { %v1363_v47 = vsel %vm1357_vm9, %v1330_v0, %v1073_v3  ;;  %v596_v0 = vrot.slane %v595_v42, 4  ;;  %v600_v3 = vrot.slane %v598_v44, 5 }
  0xe2   : > { %1156 = vrot.lane.b32.xlu0 %v7366_v1, %s6889_s4  ;;  %977 = vrot.lane.b32.xlu1 %v7456_v36, %s6890_s9  ;;  %v1396_v21 = vsel %vm1390_vm10, %v1363_v47, %v1108_v24  ;;  %v773_v24 = vrot.slane %v7451_v37, 5  ;;  %v585_v16 = vor.u32 %v584_v54, %v581_v33 }
  0xe3   : > { %v601_v19 = vsel %vm7080_vm5, %v596_v0, %v600_v3 }
  0xe4   : > { %v1143_v22 = vpop.permute.xlu0 %1142  ;;  %v1040_v28 = vpop.permute.xlu1 %1039  ;;  %v586_v52 = vrot.slane %v585_v16, 4 }
  0xe5   : > { %v1429_v9 = vsel %vm1423_vm11, %v1396_v21, %v1143_v22 }
  0xe6   : > { %1226 = vrot.lane.b32.xlu0 %v7480_v56, %s6892_s25  ;;  %1057 = vrot.lane.b32.xlu1 %v7482_v58, %s6887_s29  ;;  %v1462_v4 = vsel %vm1456_vm12, %v1429_v9, %v1178_v12  ;;  %v774_v12 = vsel %vm7041_vm4, %v772_v5, %v773_v24  ;;  %v591_v14 = vsel %vm7080_vm5, %v586_v52, %v590_v25 }
  0xe7   : > { %v7531_v50 = vcombine.low %v771_v38, %v774_v12  ;;  %v616_v38 = vshrl.u32 %v231_v40, 16  ;;  %v612_v12 = vshll.u32 %v231_v40, 16 }
  0xe8   : > { %v1213_v29 = vpop.permute.xlu0 %1212  ;;  %v1110_v39 = vpop.permute.xlu1 %1109 }
  0xe9   : > { %v1495_v30 = vsel %vm1489_vm13, %v1462_v4, %v1213_v29  ;;  %v614_v52 = vrot.slane %v612_v12, 5  ;;  %v618_v0 = vrot.slane %v616_v38, 4  ;;  %v233_v12 = vld [vmem:[%s7004_s28 + $0xc0] sm:$0xf] }
  0xea   : > { %973 = vrot.lane.b32.xlu0 %v7403_v11, %s6890_s9  ;;  %v1528_v37 = vsel %vm1522_vm14, %v1495_v30, %v1248_v8  ;;  %1092 = vrot.lane.b32.xlu1 %v7497_v23, %s6885_s24  ;;  %v777_v8 = vrot.slane %v7477_v10, 5 }
  0xeb   : > { %5687 = vmatmul.mubr.msk.bf16.gmra.mrb[8].mxu0 %vm1585_vm15, %v1528_v37 }
  0xec   : > { %v960_v15 = vpop.permute.xlu0 %959  ;;  %v1180_v11 = vpop.permute.xlu1 %1179  ;;  %1687 = vmatprep.mubr.bf16.mxu0 %v6893_v6  ;;  %v779_v60 = vrot.slane %v777_v8, 4 }
  0xed   : > { %v1287_v48 = vsel %vm1275_vm7, %v7122_v46, %v960_v15  ;;  %v7542_v46 = vcombine.low %v7473_v62, %v7477_v10 }
  0xee   : > { %1053 = vrot.lane.b32.xlu0 %v7366_v1, %s6887_s29  ;;  %1127 = vrot.lane.b32.xlu1 %v7517_v31, %s6891_s10  ;;  %v1332_v47 = vsel %vm1324_vm8, %v1287_v48, %v1040_v28  ;;  %v5620_v1 = vrot.slane %v7473_v62, 9  ;;  %v7555_v62 = vcombine.low %v591_v14, %v601_v19  ;;  %v781_v9 = vsel %vm7041_vm4, %v779_v60, %v780_v45 }
  0xef   : > { %v619_v14 = vor.u32 %v618_v0, %v614_v52 }
  0xf0   : > { %v1075_v63 = vpop.permute.xlu0 %1074  ;;  %v1250_v13 = vpop.permute.xlu1 %1249  ;;  %v778_v10 = vsel %vm7041_vm4, %v5620_v1, %v777_v8 }
  0xf1   : > { %v1365_v59 = vsel %vm1357_vm9, %v1332_v47, %v1075_v63  ;;  %v7572_v2 = vcombine.low %v778_v10, %v781_v9  ;;  %v232_v63 = vld [vmem:[%s7004_s28 + $0xbc] sm:$0x1] }
  0xf2   : > { %1088 = vrot.lane.b32.xlu0 %v7409_v55, %s6885_s24  ;;  %1162 = vrot.lane.b32.xlu1 %v7531_v50, %s6889_s4  ;;  %v1398_v20 = vsel %vm1390_vm10, %v1365_v59, %v1110_v39  ;;  %v230_v39 = vld [vmem:[%s7004_s28 + $0xb4] sm:$0xf]  ;;  %v622_v19 = vshll.u32 %v232_v63, 16 }
  0xf3   : > { %v606_v37 = vshll.u32 %v230_v39, 16 }
  0xf4   : > { %v1145_v21 = vpop.permute.xlu0 %1144  ;;  %v1042_v22 = vpop.permute.xlu1 %1041 }
  0xf5   : > { %v1431_v28 = vsel %vm1423_vm11, %v1398_v20, %v1145_v21  ;;  %v608_v48 = vrot.slane %v606_v37, 5  ;;  %v620_v21 = vrot.slane %v619_v14, 4  ;;  %v235_v14 = vld [vmem:[%s7004_s28 + $0xc8] sm:$0x1] }
  0xf6   : > { %1123 = vrot.lane.b32.xlu0 %v7480_v56, %s6891_s10  ;;  %1197 = vrot.lane.b32.xlu1 %v7542_v46, %s6886_s26  ;;  %v1464_v32 = vsel %vm1456_vm12, %v1431_v28, %v1180_v11  ;;  %v784_v28 = vrot.slane %v231_v40, 5 }
  0xf8   : > { %v1215_v5 = vpop.permute.xlu0 %1214  ;;  %v1112_v24 = vpop.permute.xlu1 %1111 }
  0xf9   : > { %v1497_v33 = vsel %vm1489_vm13, %v1464_v32, %v1215_v5 }
  0xfa   : > { %1158 = vrot.lane.b32.xlu0 %v7434_v27, %s6889_s4  ;;  %v1530_v54 = vsel %vm1522_vm14, %v1497_v33, %v1250_v13  ;;  %1232 = vrot.lane.b32.xlu1 %v7555_v62, %s6892_s25 }
  0xfb   : > { %5688 = vmatmul.mubr.msk.bf16.gmra.mrb[12].mxu0 %vm1585_vm15, %v1530_v54  ;;  %v786_v54 = vrot.slane %v784_v28, 4 }
  0xfc   : > { %v962_v25 = vpop.permute.xlu0 %961  ;;  %v1182_v35 = vpop.permute.xlu1 %1181  ;;  %1697 = vmatprep.mubr.bf16.mxu0 %v6893_v6 }
  0xfd   : > { %v1290_v4 = vsel %vm1275_vm7, %v7147_v17, %v962_v25  ;;  %v603_v17 = vshrl.u32 %v230_v39, 16  ;;  %v787_v25 = vrot.slane %v232_v63, 5 }
  0xfe   : > { %1193 = vrot.lane.b32.xlu0 %v7570_v34, %s6886_s26  ;;  %1267 = vrot.lane.b32.xlu1 %v7572_v2, %s6888_s30  ;;  %v1334_v51 = vsel %vm1324_vm8, %v1290_v4, %v1042_v22  ;;  %v624_v22 = vrot.slane %v622_v19, 5 }
  0xff   : > { %v605_v11 = vrot.slane %v603_v17, 4 }
 0x100   : > { %v1077_v49 = vpop.permute.xlu0 %1076  ;;  %v1252_v29 = vpop.permute.xlu1 %1251  ;;  %v625_v33 = vsel %vm7080_vm5, %v620_v21, %v624_v22  ;;  %v821_v21 = vrot.slane %v235_v14, 5 }
 0x101   : > { %v1367_v30 = vsel %vm1357_vm9, %v1334_v51, %v1077_v49  ;;  %v609_v1 = vor.u32 %v608_v48, %v605_v11  ;;  %v790_v11 = vshrl.u32 %v233_v12, 16 }
 0x102   : > { %1228 = vrot.lane.b32.xlu0 %v7456_v36, %s6892_s25  ;;  %979 = vrot.lane.b32.xlu1 %v7517_v31, %s6890_s9  ;;  %v1400_v16 = vsel %vm1390_vm10, %v1367_v30, %v1112_v24 }
 0x104   : > { %v1147_v42 = vpop.permute.xlu0 %1146  ;;  %v1044_v44 = vpop.permute.xlu1 %1043 }
 0x105   : > { %v1433_v15 = vsel %vm1423_vm11, %v1400_v16, %v1147_v42  ;;  %v234_v42 = vld [vmem:[%s7004_s28 + $0xc4] sm:$0xf] }
 0x106   : > { %1263 = vrot.lane.b32.xlu0 %v7482_v58, %s6888_s30  ;;  %1059 = vrot.lane.b32.xlu1 %v7531_v50, %s6887_s29  ;;  %v1466_v3 = vsel %vm1456_vm12, %v1433_v15, %v1182_v35  ;;  %v799_v0 = vshll.u32 %v234_v42, 16 }
 0x108   : > { %v1217_v8 = vpop.permute.xlu0 %1216  ;;  %v1114_v47 = vpop.permute.xlu1 %1113  ;;  %v801_v19 = vrot.slane %v799_v0, 5 }
 0x109   : > { %v1499_v13 = vsel %vm1489_vm13, %v1466_v3, %v1217_v8  ;;  %v818_v3 = vrot.slane %v234_v42, 5 }
 0x10a   : > { %975 = vrot.lane.b32.xlu0 %v7480_v56, %s6890_s9  ;;  %v1532_v59 = vsel %vm1522_vm14, %v1499_v13, %v1252_v29  ;;  %1094 = vrot.lane.b32.xlu1 %v7542_v46, %s6885_s24  ;;  %v610_v56 = vrot.slane %v609_v1, 4  ;;  %v792_v13 = vrot.slane %v790_v11, 4 }
 0x10b   : > { %5689 = vmatmul.mubr.msk.bf16.gmra.mrb[16].mxu0 %vm1585_vm15, %v1532_v59 }
 0x10c   : > { %v964_v60 = vpop.permute.xlu0 %963  ;;  %v1184_v45 = vpop.permute.xlu1 %1183  ;;  %1707 = vmatprep.mubr.bf16.mxu0 %v6893_v6  ;;  %v615_v24 = vsel %vm7080_vm5, %v610_v56, %v614_v52  ;;  %v793_v52 = vshll.u32 %v233_v12, 16  ;;  %v820_v56 = vrot.slane %v818_v3, 4 }
 0x10d   : > { %v1293_v20 = vsel %vm1275_vm7, %v7177_v43, %v964_v60  ;;  %v7618_v43 = vcombine.low %v230_v39, %v231_v40  ;;  %v7630_v29 = vcombine.low %v615_v24, %v625_v33  ;;  %v788_v40 = vsel %vm7041_vm4, %v786_v54, %v787_v25 }
 0x10e   : > { %1055 = vrot.lane.b32.xlu0 %v7434_v27, %s6887_s29  ;;  %1129 = vrot.lane.b32.xlu1 %v7555_v62, %s6891_s10  ;;  %v1336_v10 = vsel %vm1324_vm8, %v1293_v20, %v1044_v44  ;;  %v5621_v27 = vrot.slane %v230_v39, 9  ;;  %v795_v1 = vrot.slane %v793_v52, 5  ;;  %v5622_v20 = vrot.slane %v233_v12, 9 }
 0x10f   : > { %v809_v33 = vshll.u32 %v235_v14, 16 }
 0x110   : > { %v1079_v9 = vpop.permute.xlu0 %1078  ;;  %v1254_v32 = vpop.permute.xlu1 %1253  ;;  %v785_v39 = vsel %vm7041_vm4, %v5621_v27, %v784_v28  ;;  %v7680_v27 = vcombine.low %v233_v12, %v234_v42  ;;  %v819_v25 = vsel %vm7041_vm4, %v5622_v20, %v818_v3  ;;  %v237_v12 = vld [vmem:[%s7004_s28 + $0xd0] sm:$0xf] }
 0x111   : > { %v1369_v5 = vsel %vm1357_vm9, %v1336_v10, %v1079_v9  ;;  %v7644_v16 = vcombine.low %v785_v39, %v788_v40  ;;  %v833_v52 = vshll.u32 %v237_v12, 16  ;;  %v852_v0 = vrot.slane %v237_v12, 5 }
 0x112   : > { %1090 = vrot.lane.b32.xlu0 %v7570_v34, %s6885_s24  ;;  %1164 = vrot.lane.b32.xlu1 %v7572_v2, %s6889_s4  ;;  %v1402_v35 = vsel %vm1390_vm10, %v1369_v5, %v1114_v47  ;;  %v2266_v5 = vld [vmem:[#allocation2 + $0x14] sm:$0x1] }
 0x113   : > { %v2267_v54 = vsel %vm7670_vm6, 0, %v2266_v5  ;;  %v835_v14 = vrot.slane %v833_v52, 5  ;;  %v2272_v52 = vld [vmem:[#allocation2 + $0x2c] sm:$0x1] }
 0x114   : > { %v1149_v4 = vpop.permute.xlu0 %1148  ;;  %v1046_v51 = vpop.permute.xlu1 %1045  ;;  %2268 = vst [vmem:[#allocation2 + $0x14] sm:$0x1] %v2267_v54 }
 0x115   : > { %v1435_v49 = vsel %vm1423_vm11, %v1402_v35, %v1149_v4  ;;  %v822_v35 = vsel %vm7041_vm4, %v820_v56, %v821_v21  ;;  %v854_v56 = vrot.slane %v852_v0, 4 }
 0x116   : > { %1125 = vrot.lane.b32.xlu0 %v7456_v36, %s6891_s10  ;;  %1199 = vrot.lane.b32.xlu1 %v7618_v43, %s6886_s26  ;;  %v1468_v30 = vsel %vm1456_vm12, %v1435_v49, %v1184_v45  ;;  %v10465_v45 = vmov 0 }
 0x117   : > { %v10466_v45 = vsel %vm7663_vm2, 4294967295, %v10465_v45 }
 0x118   : > { %v1219_v17 = vpop.permute.xlu0 %1218  ;;  %v1116_v37 = vpop.permute.xlu1 %1115  ;;  %10467 = vst [vmem:[#allocation11_spill] sm:$0xff] %v10466_v45 }
 0x119   : > { %v1501_v38 = vsel %vm1489_vm13, %v1468_v30, %v1219_v17  ;;  %v811_v17 = vrot.slane %v809_v33, 5 }
 0x11a   : > { %1160 = vrot.lane.b32.xlu0 %v7482_v58, %s6889_s4  ;;  %v1534_v36 = vsel %vm1522_vm14, %v1501_v38, %v1254_v32  ;;  %1234 = vrot.lane.b32.xlu1 %v7630_v29, %s6892_s25  ;;  %v803_v58 = vshrl.u32 %v234_v42, 16  ;;  %v796_v32 = vor.u32 %v795_v1, %v792_v13  ;;  %v236_v38 = vld [vmem:[%s7004_s28 + $0xcc] sm:$0xf]  ;;  %v2219_v13 = vld [vmem:[#allocation2 + $0x18] sm:$0x1] }
 0x11b   : > { %5690 = vmatmul.mubr.msk.bf16.gmra.mrb[20].mxu0 %vm1585_vm15, %v1534_v36  ;;  %v824_v11 = vshrl.u32 %v236_v38, 16  ;;  %v5623_v20 = vrot.slane %v236_v38, 9 }
 0x11c   : > { %v966_v44 = vpop.permute.xlu0 %965  ;;  %v1186_v15 = vpop.permute.xlu1 %1185  ;;  %1717 = vmatprep.mubr.bf16.mxu0 %v6893_v6  ;;  %v805_v60 = vrot.slane %v803_v58, 4  ;;  %v797_v39 = vrot.slane %v796_v32, 4  ;;  %v837_v58 = vshrl.u32 %v237_v12, 16  ;;  %v5675_v32 = vcombine.low %v236_v38, %v237_v12 }
 0x11d   : > { %v1296_v48 = vsel %vm1275_vm7, %v7221_v7, %v966_v44  ;;  %v2216_v7 = vld [vmem:[#allocation2 + $0xc] sm:$0x1]  ;;  %v826_v1 = vrot.slane %v824_v11, 4  ;;  %v853_v54 = vsel %vm7041_vm4, %v5623_v20, %v852_v0 }
 0x11e   : > { %1195 = vrot.lane.b32.xlu0 %v7497_v23, %s6886_s26  ;;  %1269 = vrot.lane.b32.xlu1 %v7644_v16, %s6888_s30  ;;  %v1338_v8 = vsel %vm1324_vm8, %v1296_v48, %v1046_v51  ;;  %v2217_v22 = vsel %vm7663_vm2, 0, %v2216_v7  ;;  %v806_v24 = vor.u32 %v805_v60, %v801_v19  ;;  %v802_v44 = vsel %vm7080_vm5, %v797_v39, %v801_v19 }
 0x11f   : > { %2218 = vst [vmem:[#allocation2 + $0xc] sm:$0x1] %v2217_v22  ;;  %v827_v48 = vshll.u32 %v236_v38, 16  ;;  %v2220_v19 = vsel %vm7663_vm2, 0, %v2219_v13  ;;  %v839_v60 = vrot.slane %v837_v58, 4 }
 0x120   : > { %v1081_v47 = vpop.permute.xlu0 %1080  ;;  %v1256_v63 = vpop.permute.xlu1 %1255  ;;  %v807_v30 = vrot.slane %v806_v24, 4  ;;  %2221 = vst [vmem:[#allocation2 + $0x18] sm:$0x1] %v2220_v19  ;;  %v2269_v22 = vld [vmem:[#allocation2 + $0x20] sm:$0x1] }
 0x121   : > { %v1371_v59 = vsel %vm1357_vm9, %v1338_v8, %v1081_v47  ;;  %v829_v7 = vrot.slane %v827_v48, 5  ;;  %v840_v24 = vor.u32 %v839_v60, %v835_v14  ;;  %v2222_v48 = vld [vmem:[#allocation2 + $0x24] sm:$0x1] }
 0x122   : > { %1230 = vrot.lane.b32.xlu0 %v7517_v31, %s6892_s25  ;;  %1061 = vrot.lane.b32.xlu1 %v7572_v2, %s6887_s29  ;;  %v1404_v2 = vsel %vm1390_vm10, %v1371_v59, %v1116_v37  ;;  %v7695_v37 = vcombine.low %v819_v25, %v822_v35  ;;  %v238_v59 = vld [vmem:[%s7004_s28 + $0xd4] sm:$0x1]  ;;  %s176_s28 = sand.u32 1, %s6872_s13  }
 0x123   : > { %v855_v21 = vrot.slane %v238_v59, 5  ;;  %v830_v5 = vor.u32 %v829_v7, %v826_v1  ;;  %v843_v33 = vshll.u32 %v238_v59, 16  ;;  %s10314_s7 = scalar_lea.sflag [#allocation5], %s176_s28 }
 0x124   : > { %v1151_v28 = vpop.permute.xlu0 %1150  ;;  %v1048_v10 = vpop.permute.xlu1 %1047 }
 0x125   : > { %v1437_v9 = vsel %vm1423_vm11, %v1404_v2, %v1151_v28  ;;  %v856_v25 = vsel %vm7041_vm4, %v854_v56, %v855_v21  ;;  %v2225_v21 = vld [vmem:[#allocation2 + $0x30] sm:$0x1] }
 0x126   : > { %1265 = vrot.lane.b32.xlu0 %v7531_v50, %s6888_s30  ;;  %1131 = vrot.lane.b32.xlu1 %v7630_v29, %s6891_s10  ;;  %v1470_v50 = vsel %vm1456_vm12, %v1437_v9, %v1186_v15  ;;  %v812_v15 = vsel %vm7080_vm5, %v807_v30, %v811_v17  ;;  %v5677_v39 = vcombine.low %v853_v54, %v856_v25  ;;  %v841_v30 = vrot.slane %v840_v24, 4 }
 0x127   : > { %v845_v17 = vrot.slane %v843_v33, 5 }
 0x128   : > { %v1221_v4 = vpop.permute.xlu0 %1220  ;;  %v1118_v51 = vpop.permute.xlu1 %1117 }
 0x129   : > { %v1503_v49 = vsel %vm1489_vm13, %v1470_v50, %v1221_v4 }
 0x12a   : > { %981 = vrot.lane.b32.xlu0 %v7555_v62, %s6890_s9  ;;  %v1536_v40 = vsel %vm1522_vm14, %v1503_v49, %v1256_v63  ;;  %1201 = vrot.lane.b32.xlu1 %v7680_v27, %s6886_s26  ;;  %v5673_v63 = vcombine.low %v802_v44, %v812_v15 }
 0x12b   : > { %5691 = vmatmul.mubr.msk.bf16.gmra.mrb[24].mxu0 %vm1585_vm15, %v1536_v40  ;;  %v831_v40 = vrot.slane %v830_v5, 4 }
 0x12c   : > { %v968_v36 = vpop.permute.xlu0 %967  ;;  %v1188_v42 = vpop.permute.xlu1 %1187  ;;  %1727 = vmatprep.mubr.bf16.mxu0 %v6893_v6 }
 0x12d   : > { %v1299_v62 = vsel %vm1275_vm7, %v7247_v53, %v968_v36 }
 0x12e   : > { %1096 = vrot.lane.b32.xlu0 %v7618_v43, %s6885_s24  ;;  %1271 = vrot.lane.b32.xlu1 %v7695_v37, %s6888_s30  ;;  %v1340_v53 = vsel %vm1324_vm8, %v1299_v62, %v1048_v10 }
 0x130   : > { %v1083_v3 = vpop.permute.xlu0 %1082  ;;  %v1258_v8 = vpop.permute.xlu1 %1257 }
 0x131   : > { %v1373_v47 = vsel %vm1357_vm9, %v1340_v53, %v1083_v3  ;;  %v2273_v3 = vsel %vm7670_vm6, 0, %v2272_v52 }
 0x132   : > { %1166 = vrot.lane.b32.xlu0 %v7644_v16, %s6889_s4  ;;  %1063 = vrot.lane.b32.xlu1 %v7644_v16, %s6887_s29  ;;  %v1406_v2 = vsel %vm1390_vm10, %v1373_v47, %v1118_v51  ;;  %v2270_v16 = vsel %vm7670_vm6, 0, %v2269_v22  ;;  %2274 = vst [vmem:[#allocation2 + $0x2c] sm:$0x1] %v2273_v3  ;;  %v2226_v22 = vsel %vm7663_vm2, 0, %v2225_v21  ;;  %s5978_s29 = sshll.u32 %s6937_s16, 11 }
 0x133   : > { %2271 = vst [vmem:[#allocation2 + $0x20] sm:$0x1] %v2270_v16  ;;  %2227 = vst [vmem:[#allocation2 + $0x30] sm:$0x1] %v2226_v22  ;;  %s10296_s6 = scalar_lea.hbm %s10359_s3, %s5978_s29 }
 0x134   : > { %v1153_v28 = vpop.permute.xlu0 %1152  ;;  %v1050_v10 = vpop.permute.xlu1 %1049 }
 0x135   : > { %v1439_v9 = vsel %vm1423_vm11, %v1406_v2, %v1153_v28  ;;  %v2275_v2 = vld [vmem:[#allocation2 + $0x38] sm:$0x1] }
 0x136   : > { %1236 = vrot.lane.b32.xlu0 %v5673_v63, %s6892_s25  ;;  %1133 = vrot.lane.b32.xlu1 %v5673_v63, %s6891_s10  ;;  %v1472_v35 = vsel %vm1456_vm12, %v1439_v9, %v1188_v42  ;;  %v846_v42 = vsel %vm7080_vm5, %v841_v30, %v845_v17  ;;  %v2276_v9 = vsel %vm7670_vm6, 0, %v2275_v2  ;;  %v2234_v2 = vld [vmem:[#allocation2 + $0x54] sm:$0x1]  ;;  %s6894_s10 = smov [#allocation6]  }
 0x137   : > { %2277 = vst [vmem:[#allocation2 + $0x38] sm:$0x1] %v2276_v9  ;;  %s6818_s11 = sshll.u32 %s6894_s10, 4  ;;  %s6819_s11 = int_to_ptr.vmem [resolvable:$false] %s6818_s11 }
 0x138   : > { %v1223_v50 = vpop.permute.xlu0 %1222  ;;  %v1120_v4 = vpop.permute.xlu1 %1119  ;;  %s6820_s17 = scalar_lea.vmem %s6819_s11, 4096 }
 0x139   : > { %v1505_v51 = vsel %vm1489_vm13, %v1472_v35, %v1223_v50 }
 0x13a   : > { %983 = vrot.lane.b32.xlu0 %v7630_v29, %s6890_s9  ;;  %v1538_v49 = vsel %vm1522_vm14, %v1505_v51, %v1258_v8  ;;  %1203 = vrot.lane.b32.xlu1 %v5675_v32, %s6886_s26  ;;  %v836_v29 = vsel %vm7080_vm5, %v831_v40, %v835_v14  ;;  %v2228_v51 = vld [vmem:[#allocation2 + $0x3c] sm:$0x1] }
 0x13b   : > { %5692 = vmatmul.mubr.msk.bf16.gmra.mrb[28].mxu0 %vm1585_vm15, %v1538_v49  ;;  %v2229_v49 = vsel %vm7663_vm2, 0, %v2228_v51 }
 0x13c   : > { %v970_v38 = vpop.permute.xlu0 %969  ;;  %v1190_v12 = vpop.permute.xlu1 %1189  ;;  %1737 = vmatprep.mubr.bf16.mxu0 %v6893_v6  ;;  %2230 = vst [vmem:[#allocation2 + $0x3c] sm:$0x1] %v2229_v49 }
 0x13d   : > { %v1302_v36 = vsel %vm1275_vm7, %v7270_v26, %v970_v38  ;;  %v5676_v26 = vcombine.low %v836_v29, %v846_v42 }
 0x13e   : > { %1098 = vrot.lane.b32.xlu0 %v7680_v27, %s6885_s24  ;;  %1273 = vrot.lane.b32.xlu1 %v5677_v39, %s6888_s30  ;;  %v1342_v62 = vsel %vm1324_vm8, %v1302_v36, %v1050_v10  ;;  %v2223_v27 = vsel %vm7663_vm2, 0, %v2222_v48  ;;  %v2278_v39 = vld [vmem:[#allocation2 + $0x44] sm:$0x1]  ;;  %s5604_s24 = sshll.u32 %s176_s28, 7 }
 0x13f   : > { %2224 = vst [vmem:[#allocation2 + $0x24] sm:$0x1] %v2223_v27  ;;  %v2279_v17 = vsel %vm7670_vm6, 0, %v2278_v39  ;;  %s10255_s26 = scalar_lea.vmem [#allocation6], %s5604_s24 }
 0x140   : > { %v1085_v44 = vpop.permute.xlu0 %1084  ;;  %v1260_v15 = vpop.permute.xlu1 %1259  ;;  %2280 = vst [vmem:[#allocation2 + $0x44] sm:$0x1] %v2279_v17  ;;  %s5524_s30 = sshll.u32 %s10255_s26, 4  ;;  %s10302_s30 = int_to_ptr.vmem [resolvable:$true] %s5524_s30 }
 0x141   : > { %v1375_v11 = vsel %vm1357_vm9, %v1342_v62, %v1085_v44  ;;  %s6814_s8 = scalar_lea.vmem %s10302_s30, 2048  ;;  %p6821_p2 = scmp.lt.s32.totalorder %s10302_s30, %s6819_s11 }
 0x142   : > { %1168 = vrot.lane.b32.xlu0 %v7695_v37, %s6889_s4  ;;  %v1408_v58 = vsel %vm1390_vm10, %v1375_v11, %v1120_v4  ;;  %p6815_p6 = scmp.ne.s32.totalorder %s10302_s30, %s6814_s8  ;;  %p6822_p3 = scmp.lt.s32.totalorder %s6820_s17, %s6814_s8 }
 0x144   : > { %v1155_v0 = vpop.permute.xlu0 %1154  ;;  %v1052_v53 = vpop.permute.xlu1 %1051  ;;  %p6816_p10 = pnand %p6815_p6, %p10762_p9  ;;  %p6823_p4 = por %p6822_p3, %p6821_p2 }
 0x145   : > { %v1441_v8 = vsel %vm1423_vm11, %v1408_v58, %v1155_v0  ;;  %v2231_v58 = vld [vmem:[#allocation2 + $0x48] sm:$0x1] }
 0x146   : > { %1238 = vrot.lane.b32.xlu0 %v5676_v26, %s6892_s25  ;;  %v1474_v37 = vsel %vm1456_vm12, %v1441_v8, %v1190_v12  ;;  %v2281_v8 = vld [vmem:[#allocation2 + $0x50] sm:$0x1]  ;;  %p6817_p12 = pneg %p6816_p10 }
 0x148   : > { %v1225_v47 = vpop.permute.xlu0 %1224  ;;  %v1122_v63 = vpop.permute.xlu1 %1121  ;;  %p6824_p7 = pnand %p6823_p4, %p6817_p12 }
 0x149   : > { %v1507_v13 = vsel %vm1489_vm13, %v1474_v37, %v1225_v47 }
 0x14a   : > { %v1540_v59 = vsel %vm1522_vm14, %v1507_v13, %v1260_v15  ;;  %v2282_v13 = vsel %vm7670_vm6, 0, %v2281_v8 }
 0x14b   : > { %5693 = vmatmul.mubr.msk.bf16.gmra.mrb[32].mxu0 %vm1585_vm15, %v1540_v59  ;;  %2283 = vst [vmem:[#allocation2 + $0x50] sm:$0x1] %v2282_v13  ;;  %v2240_v13 = vld [vmem:[#allocation2 + $0x6c] sm:$0x1] }
 0x14c   : > { %v972_v1 = vpop.permute.xlu0 %971  ;;  %v1192_v7 = vpop.permute.xlu1 %1191  ;;  %1747 = vmatprep.mubr.bf16.mxu0 %v6893_v6 }
 0x14d   : > { %v1305_v14 = vsel %vm1275_vm7, %v7299_v61, %v972_v1 }
 0x14e   : > { %v1344_v19 = vsel %vm1324_vm8, %v1305_v14, %v1052_v53  ;;  %v2232_v53 = vsel %vm7663_vm2, 0, %v2231_v58 }
 0x14f   : > { %2233 = vst [vmem:[#allocation2 + $0x48] sm:$0x1] %v2232_v53 }
 0x150   : > { %v1087_v60 = vpop.permute.xlu0 %1086  ;;  %v1262_v20 = vpop.permute.xlu1 %1261 }
 0x151   : > { %v1377_v56 = vsel %vm1357_vm9, %v1344_v19, %v1087_v60 }
 0x152   : > { %v1410_v28 = vsel %vm1390_vm10, %v1377_v56, %v1122_v63 }
 0x154   : > { %v1157_v10 = vpop.permute.xlu0 %1156  ;;  %v978_v16 = vpop.permute.xlu1 %977 }
 0x155   : > { %v1443_v61 = vsel %vm1423_vm11, %v1410_v28, %v1157_v10  ;;  %v1314_v38 = vsel %vm1275_vm7, %v7570_v34, %v978_v16  ;;  %v2235_v28 = vsel %vm7663_vm2, 0, %v2234_v2  ;;  %v2284_v10 = vld [vmem:[#allocation2 + $0x5c] sm:$0x1] }
 0x156   : > { %v1476_v32 = vsel %vm1456_vm12, %v1443_v61, %v1192_v7  ;;  %2236 = vst [vmem:[#allocation2 + $0x54] sm:$0x1] %v2235_v28  ;;  %v2285_v61 = vsel %vm7670_vm6, 0, %v2284_v10 }
 0x157   : > { %2286 = vst [vmem:[#allocation2 + $0x5c] sm:$0x1] %v2285_v61 }
 0x158   : > { %v1227_v5 = vpop.permute.xlu0 %1226  ;;  %v1058_v24 = vpop.permute.xlu1 %1057 }
 0x159   : > { %v1509_v33 = vsel %vm1489_vm13, %v1476_v32, %v1227_v5  ;;  %v1350_v29 = vsel %vm1324_vm8, %v1314_v38, %v1058_v24 }
 0x15a   : > { %v1542_v54 = vsel %vm1522_vm14, %v1509_v33, %v1262_v20 }
 0x15b   : > { %5694 = vmatmul.mubr.msk.bf16.gmra.mrb[36].mxu0 %vm1585_vm15, %v1542_v54 }
 0x15c   : > { %v974_v25 = vpop.permute.xlu0 %973  ;;  %v1093_v35 = vpop.permute.xlu1 %1092  ;;  %1757 = vmatprep.mubr.bf16.mxu0 %v6893_v6 }
 0x15d   : > { %v1383_v42 = vsel %vm1357_vm9, %v1350_v29, %v1093_v35  ;;  %v1308_v0 = vsel %vm1275_vm7, %v7340_v41, %v974_v25 }
 0x160   : > { %v1054_v50 = vpop.permute.xlu0 %1053  ;;  %v1128_v4 = vpop.permute.xlu1 %1127 }
 0x161   : > { %v1416_v15 = vsel %vm1390_vm10, %v1383_v42, %v1128_v4  ;;  %v1346_v3 = vsel %vm1324_vm8, %v1308_v0, %v1054_v50 }
 0x164   : > { %v1089_v40 = vpop.permute.xlu0 %1088  ;;  %v1163_v30 = vpop.permute.xlu1 %1162 }
 0x165   : > { %v1449_v11 = vsel %vm1423_vm11, %v1416_v15, %v1163_v30  ;;  %v1379_v37 = vsel %vm1357_vm9, %v1346_v3, %v1089_v40  ;;  %v2237_v30 = vld [vmem:[#allocation2 + $0x60] sm:$0x1] }
 0x166   : > { %v2238_v38 = vsel %vm7663_vm2, 0, %v2237_v30 }
 0x167   : > { %2239 = vst [vmem:[#allocation2 + $0x60] sm:$0x1] %v2238_v38 }
 0x168   : > { %v1124_v12 = vpop.permute.xlu0 %1123  ;;  %v1198_v36 = vpop.permute.xlu1 %1197 }
 0x169   : > { %v1482_v48 = vsel %vm1456_vm12, %v1449_v11, %v1198_v36  ;;  %v1412_v41 = vsel %vm1390_vm10, %v1379_v37, %v1124_v12  ;;  %v2287_v36 = vld [vmem:[#allocation2 + $0x68] sm:$0x1] }
 0x16c   : > { %v1159_v62 = vpop.permute.xlu0 %1158  ;;  %v1233_v44 = vpop.permute.xlu1 %1232 }
 0x16d   : > { %v1515_v26 = vsel %vm1489_vm13, %v1482_v48, %v1233_v44  ;;  %v1445_v59 = vsel %vm1423_vm11, %v1412_v41, %v1159_v62  ;;  %v2288_v44 = vsel %vm7670_vm6, 0, %v2287_v36 }
 0x16e   : > { %2289 = vst [vmem:[#allocation2 + $0x68] sm:$0x1] %v2288_v44 }
 0x170   : > { %v1194_v27 = vpop.permute.xlu0 %1193  ;;  %v1268_v52 = vpop.permute.xlu1 %1267 }
 0x171   : > { %v1548_v34 = vsel %vm1522_vm14, %v1515_v26, %v1268_v52  ;;  %v1478_v1 = vsel %vm1456_vm12, %v1445_v59, %v1194_v27  ;;  %v2241_v59 = vsel %vm7663_vm2, 0, %v2240_v13 }
 0x172   : > { %5697 = vmatmul.mubr.msk.bf16.vlgmr.msra.gmra.mrb[0].mxu1 %vm1585_vm15, %v1548_v34  ;;  %2242 = vst [vmem:[#allocation2 + $0x6c] sm:$0x1] %v2241_v59 }
 0x173   : > { %1787 = vmatprep.mubr.bf16.mxu1 %v6893_v6 }
 0x174   : > { %v1229_v47 = vpop.permute.xlu0 %1228  ;;  %v980_v63 = vpop.permute.xlu1 %979 }
 0x175   : > { %v1511_v7 = vsel %vm1489_vm13, %v1478_v1, %v1229_v47  ;;  %v1317_v32 = vsel %vm1275_vm7, %v7497_v23, %v980_v63 }
 0x178   : > { %v1264_v14 = vpop.permute.xlu0 %1263  ;;  %v1060_v19 = vpop.permute.xlu1 %1059 }
 0x179   : > { %v1544_v60 = vsel %vm1522_vm14, %v1511_v7, %v1264_v14  ;;  %v1352_v33 = vsel %vm1324_vm8, %v1317_v32, %v1060_v19 }
 0x17a   : > { %5695 = vmatmul.mubr.msk.bf16.gmra.mrb[40].mxu0 %vm1585_vm15, %v1544_v60  ;;  %v2290_v60 = vld [vmem:[#allocation2 + $0x74] sm:$0x1] }
 0x17b   : > { %1767 = vmatprep.mubr.bf16.mxu0 %v6893_v6  ;;  %v2291_v2 = vsel %vm7670_vm6, 0, %v2290_v60 }
 0x17c   : > { %v976_v20 = vpop.permute.xlu0 %975  ;;  %v1095_v56 = vpop.permute.xlu1 %1094  ;;  %2292 = vst [vmem:[#allocation2 + $0x74] sm:$0x1] %v2291_v2 }
 0x17d   : > { %v1385_v54 = vsel %vm1357_vm9, %v1352_v33, %v1095_v56  ;;  %v1311_v17 = vsel %vm1275_vm7, %v7409_v55, %v976_v20 }
 0x180   : > { %v1056_v21 = vpop.permute.xlu0 %1055  ;;  %v1130_v22 = vpop.permute.xlu1 %1129 }
 0x181   : > { %v1418_v50 = vsel %vm1390_vm10, %v1385_v54, %v1130_v22  ;;  %v1348_v12 = vsel %vm1324_vm8, %v1311_v17, %v1056_v21 }
 0x184   : > { %v1091_v16 = vpop.permute.xlu0 %1090  ;;  %v1165_v9 = vpop.permute.xlu1 %1164 }
 0x185   : > { %v1451_v4 = vsel %vm1423_vm11, %v1418_v50, %v1165_v9  ;;  %v1381_v29 = vsel %vm1357_vm9, %v1348_v12, %v1091_v16 }
 0x188   : > { %v1126_v5 = vpop.permute.xlu0 %1125  ;;  %v1200_v24 = vpop.permute.xlu1 %1199 }
 0x189   : > { %v1484_v51 = vsel %vm1456_vm12, %v1451_v4, %v1200_v24  ;;  %v1414_v55 = vsel %vm1390_vm10, %v1381_v29, %v1126_v5  ;;  %v2243_v29 = vld [vmem:[#allocation2 + $0x78] sm:$0x1] }
 0x18c   : > { %v1161_v25 = vpop.permute.xlu0 %1160  ;;  %v1235_v35 = vpop.permute.xlu1 %1234 }
 0x18d   : > { %v1517_v49 = vsel %vm1489_vm13, %v1484_v51, %v1235_v35  ;;  %v1447_v15 = vsel %vm1423_vm11, %v1414_v55, %v1161_v25 }
 0x190   : > { %v1196_v39 = vpop.permute.xlu0 %1195  ;;  %v1270_v40 = vpop.permute.xlu1 %1269 }
 0x191   : > { %v1550_v23 = vsel %vm1522_vm14, %v1517_v49, %v1270_v40  ;;  %v1480_v11 = vsel %vm1456_vm12, %v1447_v15, %v1196_v39  ;;  %v2244_v15 = vsel %vm7663_vm2, 0, %v2243_v29 }
 0x192   : > { %5698 = vmatmul.mubr.msk.bf16.gmra.mrb[4].mxu1 %vm1585_vm15, %v1550_v23  ;;  %2245 = vst [vmem:[#allocation2 + $0x78] sm:$0x1] %v2244_v15 }
 0x193   : > { %1797 = vmatprep.mubr.bf16.mxu1 %v6893_v6 }
 0x194   : > { %v1231_v42 = vpop.permute.xlu0 %1230  ;;  %v1062_v62 = vpop.permute.xlu1 %1061 }
 0x195   : > { %v1513_v48 = vsel %vm1489_vm13, %v1480_v11, %v1231_v42  ;;  %v2293_v11 = vld [vmem:[#allocation2 + $0x80] sm:$0x1] }
 0x198   : > { %v1266_v26 = vpop.permute.xlu0 %1265  ;;  %v1132_v27 = vpop.permute.xlu1 %1131 }
 0x199   : > { %v1546_v52 = vsel %vm1522_vm14, %v1513_v48, %v1266_v26 }
 0x19a   : > { %5696 = vmatmul.mubr.msk.bf16.gmra.mrb[44].mxu0 %vm1585_vm15, %v1546_v52  ;;  %v2294_v52 = vsel %vm7670_vm6, 0, %v2293_v11 }
 0x19b   : > { %2295 = vst [vmem:[#allocation2 + $0x80] sm:$0x1] %v2294_v52 }
 0x19c   : > { %v982_v34 = vpop.permute.xlu0 %981  ;;  %v1202_v58 = vpop.permute.xlu1 %1201 }
 0x19d   : > { %v1320_v0 = vsel %vm1275_vm7, %v7542_v46, %v982_v34 }
 0x19e   : > { %v1354_v53 = vsel %vm1324_vm8, %v1320_v0, %v1062_v62 }
 0x1a0   : > { %v7840_v3 = vpop.f32.mrb[0].mxu0  ;;  %v1097_v8 = vpop.permute.xlu0 %1096 }
 0x1a1   : > { %v1387_v37 = vsel %vm1357_vm9, %v1354_v53, %v1097_v8  ;;  %v7843_v47 = vpop.f32.mrb[1].mxu0  ;;  %v1272_v63 = vpop.permute.xlu1 %1271  ;;  %v1857_v1 = vmul.f32 %v7840_v3, %v7840_v3 }
 0x1a2   : > { %v7845_v41 = vpop.f32.mrb[2].mxu0  ;;  %v1420_v46 = vsel %vm1390_vm10, %v1387_v37, %v1132_v27  ;;  %v2066_v20 = vmul.f32 %v7843_v47, %v7843_v47 }
 0x1a3   : > { %v1818_v7 = vadd.f32 %v7845_v41, %v7840_v3  ;;  %v1858_v14 = vmul.f32 %v7845_v41, %v7845_v41  ;;  %v7856_v19 = vpop.f32.mrb[3].mxu0 }
 0x1a4   : > { %v2028_v56 = vadd.f32 %v7856_v19, %v7843_v47  ;;  %v2067_v21 = vmul.f32 %v7856_v19, %v7856_v19  ;;  %v1167_v22 = vpop.permute.xlu0 %1166 }
 0x1a5   : > { %v1889_v28 = vadd.f32 %v1858_v14, %v1857_v1  ;;  %v1453_v10 = vsel %vm1423_vm11, %v1420_v46, %v1167_v22  ;;  %v1064_v16 = vpop.permute.xlu1 %1063 }
 0x1a6   : > { %v2098_v9 = vadd.f32 %v2067_v21, %v2066_v20  ;;  %v1486_v61 = vsel %vm1456_vm12, %v1453_v10, %v1202_v58 }
 0x1a8   : > { %v1237_v32 = vpop.permute.xlu0 %1236 }
 0x1a9   : > { %v1519_v5 = vsel %vm1489_vm13, %v1486_v61, %v1237_v32  ;;  %v1134_v33 = vpop.permute.xlu1 %1133  ;;  %v2302_v32 = vld [vmem:[#allocation2 + $0xa4] sm:$0x1] }
 0x1aa   : > { %v1552_v24 = vsel %vm1522_vm14, %v1519_v5, %v1272_v63  ;;  %v2303_v5 = vsel %vm7670_vm6, 0, %v2302_v32 }
 0x1ab   : > { %5699 = vmatmul.mubr.msk.bf16.gmra.mrb[8].mxu1 %vm1585_vm15, %v1552_v24  ;;  %2304 = vst [vmem:[#allocation2 + $0xa4] sm:$0x1] %v2303_v5  ;;  %v2249_v5 = vld [vmem:[#allocation2 + $0x90] sm:$0x1] }
 0x1ac   : > { %v984_v54 = vpop.permute.xlu0 %983  ;;  %1807 = vmatprep.mubr.bf16.mxu1 %v6893_v6 }
 0x1ad   : > { %v1323_v25 = vsel %vm1275_vm7, %v7618_v43, %v984_v54  ;;  %v1204_v36 = vpop.permute.xlu1 %1203  ;;  %vm2410_vm7 = vsmask.f32 4368 }
 0x1ae   : > { %v7874_v35 = vpop.f32.mrb[4].mxu0  ;;  %v1356_v49 = vsel %vm1324_vm8, %v1323_v25, %v1064_v16  ;;  %vm8514_vm8 = vmor %vm2214_vm1, %vm2410_vm7 }
 0x1af   : > { %v1819_v50 = vadd.f32 %v1818_v7, %v7874_v35  ;;  %v1859_v4 = vmul.f32 %v7874_v35, %v7874_v35  ;;  %v7879_v51 = vpop.f32.mrb[5].mxu0 }
 0x1b0   : > { %v2029_v39 = vadd.f32 %v2028_v56, %v7879_v51  ;;  %v2068_v40 = vmul.f32 %v7879_v51, %v7879_v51  ;;  %v7885_v6 = vpop.f32.mrb[6].mxu0  ;;  %v1099_v23 = vpop.permute.xlu0 %1098 }
 0x1b1   : > { %v1890_v43 = vadd.f32 %v1889_v28, %v1859_v4  ;;  %v1820_v30 = vadd.f32 %v1819_v50, %v7885_v6  ;;  %v1860_v17 = vmul.f32 %v7885_v6, %v7885_v6  ;;  %v1389_v38 = vsel %vm1357_vm9, %v1356_v49, %v1099_v23  ;;  %v7891_v12 = vpop.f32.mrb[7].mxu0  ;;  %v1274_v58 = vpop.permute.xlu1 %1273 }
 0x1b2   : > { %v2099_v42 = vadd.f32 %v2098_v9, %v2068_v40  ;;  %v2030_v62 = vadd.f32 %v2029_v39, %v7891_v12  ;;  %v2069_v44 = vmul.f32 %v7891_v12, %v7891_v12  ;;  %v1422_v48 = vsel %vm1390_vm10, %v1389_v38, %v1134_v33  ;;  %v2252_v9 = vld [vmem:[#allocation2 + $0x9c] sm:$0x1]  ;;  %v2246_v39 = vld [vmem:[#allocation2 + $0x84] sm:$0x1] }
 0x1b3   : > { %v1891_v55 = vadd.f32 %v1890_v43, %v1860_v17  ;;  %v2253_v61 = vsel %vm7663_vm2, 0, %v2252_v9  ;;  %v2247_v17 = vsel %vm7663_vm2, 0, %v2246_v39  ;;  %v2250_v39 = vsel %vm7663_vm2, 0, %v2249_v5 }
 0x1b4   : > { %v2100_v26 = vadd.f32 %v2099_v42, %v2069_v44  ;;  %v1169_v27 = vpop.permute.xlu0 %1168  ;;  %2254 = vst [vmem:[#allocation2 + $0x9c] sm:$0x1] %v2253_v61  ;;  %2248 = vst [vmem:[#allocation2 + $0x84] sm:$0x1] %v2247_v17  ;;  %v2296_v42 = vld [vmem:[#allocation2 + $0x8c] sm:$0x1] }
 0x1b5   : > { %v1455_v34 = vsel %vm1423_vm11, %v1422_v48, %v1169_v27  ;;  %v2297_v44 = vsel %vm7670_vm6, 0, %v2296_v42  ;;  %2251 = vst [vmem:[#allocation2 + $0x90] sm:$0x1] %v2250_v39  ;;  %vm2732_vm9 = vcmask 1043456  }
 0x1b6   : > { %v1488_v0 = vsel %vm1456_vm12, %v1455_v34, %v1204_v36  ;;  %2298 = vst [vmem:[#allocation2 + $0x8c] sm:$0x1] %v2297_v44  ;;  %vm9068_vm10 = vmand %vm2732_vm9, %vm2264_vm3 }
 0x1b8   : > { %v1239_v53 = vpop.permute.xlu0 %1238 }
 0x1b9   : > { %v1521_v8 = vsel %vm1489_vm13, %v1488_v0, %v1239_v53 }
 0x1ba   : > { %v1554_v37 = vsel %vm1522_vm14, %v1521_v8, %v1274_v58 }
 0x1bb   : > { %5700 = vmatmul.mubr.msk.bf16.gmra.mrb[12].mxu1 %vm1585_vm15, %v1554_v37 }
 0x1be   : > { %v7906_v63 = vpop.f32.mrb[8].mxu0 }
 0x1bf   : > { %v1821_v13 = vadd.f32 %v1820_v30, %v7906_v63  ;;  %v1861_v59 = vmul.f32 %v7906_v63, %v7906_v63  ;;  %v7911_v1 = vpop.f32.mrb[9].mxu0 }
 0x1c0   : > { %10470 = vst [vmem:[#allocation12_spill] sm:$0xff] %v7911_v1  ;;  %v2031_v46 = vadd.f32 %v2030_v62, %v7911_v1  ;;  %v2070_v7 = vmul.f32 %v7911_v1, %v7911_v1  ;;  %v7916_v14 = vpop.f32.mrb[10].mxu0  ;;  %v6727_v1 = vld [vmem:[#allocation3 + $0x148] sm:$0xff]  }
 0x1c1   : > { %v1892_v60 = vadd.f32 %v1891_v55, %v1861_v59  ;;  %v1822_v20 = vadd.f32 %v1821_v13, %v7916_v14  ;;  %v1862_v56 = vmul.f32 %v7916_v14, %v7916_v14  ;;  %v7921_v21 = vpop.f32.mrb[11].mxu0 }
 0x1c2   : > { %10471 = vst [vmem:[#allocation13_spill] sm:$0xff] %v7921_v21  ;;  %v2101_v22 = vadd.f32 %v2100_v26, %v2070_v7  ;;  %v2032_v2 = vadd.f32 %v2031_v46, %v7921_v21  ;;  %v2071_v28 = vmul.f32 %v7921_v21, %v7921_v21  ;;  %v6723_v21 = vld [vmem:[#allocation3 + $0x140] sm:$0xff]  }
 0x1c3   : > { %v1893_v10 = vadd.f32 %v1892_v60, %v1862_v56  ;;  %v2255_v60 = vld [vmem:[#allocation2 + $0xa8] sm:$0x1]  ;;  %v2305_v56 = vld [vmem:[#allocation2 + $0xb0] sm:$0x1] }
 0x1c4   : > { %v2102_v16 = vadd.f32 %v2101_v22, %v2071_v28  ;;  %v2306_v22 = vsel %vm7670_vm6, 0, %v2305_v56 }
 0x1c5   : > { %2307 = vst [vmem:[#allocation2 + $0xb0] sm:$0x1] %v2306_v22 }
 0x1ce   : > { %v7930_v24 = vpop.f32.mrb[12].mxu0 }
 0x1cf   : > { %v1823_v33 = vadd.f32 %v1822_v20, %v7930_v24  ;;  %v1863_v54 = vmul.f32 %v7930_v24, %v7930_v24  ;;  %v7935_v25 = vpop.f32.mrb[13].mxu0  ;;  %v2256_v20 = vsel %vm7663_vm2, 0, %v2255_v60 }
 0x1d0   : > { %10472 = vst [vmem:[#allocation14_spill] sm:$0xff] %v7935_v25  ;;  %v2033_v50 = vadd.f32 %v2032_v2, %v7935_v25  ;;  %v2072_v4 = vmul.f32 %v7935_v25, %v7935_v25  ;;  %v7940_v49 = vpop.f32.mrb[14].mxu0  ;;  %2257 = vst [vmem:[#allocation2 + $0xa8] sm:$0x1] %v2256_v20  ;;  %v2308_v20 = vld [vmem:[#allocation2 + $0xbc] sm:$0x1] }
 0x1d1   : > { %v1894_v40 = vadd.f32 %v1893_v10, %v1863_v54  ;;  %v1824_v23 = vadd.f32 %v1823_v33, %v7940_v49  ;;  %v1864_v43 = vmul.f32 %v7940_v49, %v7940_v49  ;;  %v7945_v30 = vpop.f32.mrb[15].mxu0  ;;  %v2309_v22 = vsel %vm7670_vm6, 0, %v2308_v20  ;;  %v6718_v25 = vld [vmem:[#allocation3 + $0x38] sm:$0xff]  }
 0x1d2   : > { %10473 = vst [vmem:[#allocation15_spill] sm:$0xff] %v7945_v30  ;;  %v2103_v38 = vadd.f32 %v2102_v16, %v2072_v4  ;;  %v2034_v36 = vadd.f32 %v2033_v50, %v7945_v30  ;;  %v2073_v29 = vmul.f32 %v7945_v30, %v7945_v30  ;;  %2310 = vst [vmem:[#allocation2 + $0xbc] sm:$0x1] %v2309_v22 }
 0x1d3   : > { %v1895_v62 = vadd.f32 %v1894_v40, %v1864_v43 }
 0x1d4   : > { %v2104_v55 = vadd.f32 %v2103_v38, %v2073_v29 }
 0x1de   : > { %v7954_v15 = vpop.f32.mrb[16].mxu0 }
 0x1df   : > { %v1825_v11 = vadd.f32 %v1824_v23, %v7954_v15  ;;  %v1865_v48 = vmul.f32 %v7954_v15, %v7954_v15  ;;  %v7959_v26 = vpop.f32.mrb[17].mxu0 }
 0x1e0   : > { %10474 = vst [vmem:[#allocation16_spill] sm:$0xff] %v7959_v26  ;;  %v2035_v27 = vadd.f32 %v2034_v36, %v7959_v26  ;;  %v2074_v52 = vmul.f32 %v7959_v26, %v7959_v26  ;;  %v7964_v34 = vpop.f32.mrb[18].mxu0  ;;  %v2299_v36 = vld [vmem:[#allocation2 + $0x98] sm:$0x1] }
 0x1e1   : > { %v1896_v58 = vadd.f32 %v1895_v62, %v1865_v48  ;;  %v1826_v0 = vadd.f32 %v1825_v11, %v7964_v34  ;;  %v1866_v53 = vmul.f32 %v7964_v34, %v7964_v34  ;;  %v7969_v8 = vpop.f32.mrb[19].mxu0  ;;  %v2300_v29 = vsel %vm7670_vm6, 0, %v2299_v36 }
 0x1e2   : > { %10475 = vst [vmem:[#allocation17_spill] sm:$0xff] %v7969_v8  ;;  %v2105_v37 = vadd.f32 %v2104_v55, %v2074_v52  ;;  %v2036_v13 = vadd.f32 %v2035_v27, %v7969_v8  ;;  %v2075_v59 = vmul.f32 %v7969_v8, %v7969_v8  ;;  %2301 = vst [vmem:[#allocation2 + $0x98] sm:$0x1] %v2300_v29  ;;  %v6719_v8 = vld [vmem:[#allocation3 + $0xf8] sm:$0xff]  }
 0x1e3   : > { %v1897_v46 = vadd.f32 %v1896_v58, %v1866_v53 }
 0x1e4   : > { %v2106_v7 = vadd.f32 %v2105_v37, %v2075_v59  ;;  %v2258_v37 = vld [vmem:[#allocation2 + $0xb4] sm:$0x1] }
 0x1ee   : > { %v7978_v2 = vpop.f32.mrb[20].mxu0 }
 0x1ef   : > { %v1827_v28 = vadd.f32 %v1826_v0, %v7978_v2  ;;  %v1867_v10 = vmul.f32 %v7978_v2, %v7978_v2  ;;  %v7983_v16 = vpop.f32.mrb[21].mxu0 }
 0x1f0   : > { %10476 = vst [vmem:[#allocation18_spill] sm:$0xff] %v7983_v16  ;;  %v2037_v9 = vadd.f32 %v2036_v13, %v7983_v16  ;;  %v2076_v61 = vmul.f32 %v7983_v16, %v7983_v16  ;;  %v7988_v32 = vpop.f32.mrb[22].mxu0  ;;  %v6694_v16 = vld [vmem:[#allocation3 + $0x8] sm:$0xff]  }
 0x1f1   : > { %v1898_v33 = vadd.f32 %v1897_v46, %v1867_v10  ;;  %v1828_v54 = vadd.f32 %v1827_v28, %v7988_v32  ;;  %v1868_v50 = vmul.f32 %v7988_v32, %v7988_v32  ;;  %v7993_v4 = vpop.f32.mrb[23].mxu0 }
 0x1f2   : > { %10477 = vst [vmem:[#allocation19_spill] sm:$0xff] %v7993_v4  ;;  %v2107_v40 = vadd.f32 %v2106_v7, %v2076_v61  ;;  %v2038_v23 = vadd.f32 %v2037_v9, %v7993_v4  ;;  %v2077_v43 = vmul.f32 %v7993_v4, %v7993_v4  ;;  %v2259_v7 = vsel %vm7663_vm2, 0, %v2258_v37 }
 0x1f3   : > { %v1899_v17 = vadd.f32 %v1898_v33, %v1868_v50  ;;  %2260 = vst [vmem:[#allocation2 + $0xb4] sm:$0x1] %v2259_v7 }
 0x1f4   : > { %v2108_v38 = vadd.f32 %v2107_v40, %v2077_v43  ;;  %v2261_v43 = vld [vmem:[#allocation2 + $0xc0] sm:$0x1] }
 0x1f5   : > { %v2262_v29 = vsel %vm7663_vm2, 0, %v2261_v43 }
 0x1f6   : > { %2263 = vst [vmem:[#allocation2 + $0xc0] sm:$0x1] %v2262_v29 }
 0x1fe   : > { %v8002_v42 = vpop.f32.mrb[24].mxu0 }
 0x1ff   : > { %v1829_v62 = vadd.f32 %v1828_v54, %v8002_v42  ;;  %v1869_v44 = vmul.f32 %v8002_v42, %v8002_v42  ;;  %v8007_v55 = vpop.f32.mrb[25].mxu0 }
 0x200   : > { %10478 = vst [vmem:[#allocation20_spill] sm:$0xff] %v8007_v55  ;;  %v2039_v11 = vadd.f32 %v2038_v23, %v8007_v55  ;;  %v2078_v48 = vmul.f32 %v8007_v55, %v8007_v55  ;;  %v8012_v27 = vpop.f32.mrb[26].mxu0 }
 0x201   : > { %v1900_v52 = vadd.f32 %v1899_v17, %v1869_v44  ;;  %v1830_v58 = vadd.f32 %v1829_v62, %v8012_v27  ;;  %v1870_v0 = vmul.f32 %v8012_v27, %v8012_v27  ;;  %v8017_v53 = vpop.f32.mrb[27].mxu0 }
 0x202   : > { %10479 = vst [vmem:[#allocation21_spill] sm:$0xff] %v8017_v53  ;;  %v2109_v13 = vadd.f32 %v2108_v38, %v2078_v48  ;;  %v2040_v59 = vadd.f32 %v2039_v11, %v8017_v53  ;;  %v2079_v46 = vmul.f32 %v8017_v53, %v8017_v53 }
 0x203   : > { %v1901_v60 = vadd.f32 %v1900_v52, %v1870_v0 }
 0x204   : > { %v2110_v56 = vadd.f32 %v2109_v13, %v2079_v46 }
 0x20e   : > { %v8026_v28 = vpop.f32.mrb[28].mxu0 }
 0x20f   : > { %v1831_v10 = vadd.f32 %v1830_v58, %v8026_v28  ;;  %v1871_v9 = vmul.f32 %v8026_v28, %v8026_v28  ;;  %v8031_v61 = vpop.f32.mrb[29].mxu0 }
 0x210   : > { %10480 = vst [vmem:[#allocation22_spill] sm:$0xff] %v8031_v61  ;;  %v2041_v5 = vadd.f32 %v2040_v59, %v8031_v61  ;;  %v2080_v33 = vmul.f32 %v8031_v61, %v8031_v61  ;;  %v8036_v54 = vpop.f32.mrb[30].mxu0 }
 0x211   : > { %v1902_v50 = vadd.f32 %v1901_v60, %v1871_v9  ;;  %v1832_v39 = vadd.f32 %v1831_v10, %v8036_v54  ;;  %v1872_v40 = vmul.f32 %v8036_v54, %v8036_v54  ;;  %v8041_v23 = vpop.f32.mrb[31].mxu0 }
 0x212   : > { %10481 = vst [vmem:[#allocation23_spill] sm:$0xff] %v8041_v23  ;;  %v2111_v17 = vadd.f32 %v2110_v56, %v2080_v33  ;;  %v2042_v38 = vadd.f32 %v2041_v5, %v8041_v23  ;;  %v2081_v36 = vmul.f32 %v8041_v23, %v8041_v23 }
 0x213   : > { %v1903_v62 = vadd.f32 %v1902_v50, %v1872_v40 }
 0x214   : > { %v2112_v44 = vadd.f32 %v2111_v17, %v2081_v36 }
 0x21e   : > { %v8048_v11 = vpop.f32.mrb[32].mxu0 }
 0x21f   : > { %v1833_v48 = vadd.f32 %v1832_v39, %v8048_v11  ;;  %v1873_v52 = vmul.f32 %v8048_v11, %v8048_v11  ;;  %v8053_v58 = vpop.f32.mrb[33].mxu0 }
 0x220   : > { %10482 = vst [vmem:[#allocation24_spill] sm:$0xff] %v8053_v58  ;;  %v2043_v0 = vadd.f32 %v2042_v38, %v8053_v58  ;;  %v2082_v37 = vmul.f32 %v8053_v58, %v8053_v58  ;;  %v8058_v13 = vpop.f32.mrb[34].mxu0  ;;  %v6690_v58 = vld [vmem:[#allocation3] sm:$0xff]  }
 0x221   : > { %v1904_v59 = vadd.f32 %v1903_v62, %v1873_v52  ;;  %v1834_v46 = vadd.f32 %v1833_v48, %v8058_v13  ;;  %v1874_v7 = vmul.f32 %v8058_v13, %v8058_v13  ;;  %v8063_v60 = vpop.f32.mrb[35].mxu0 }
 0x222   : > { %10483 = vst [vmem:[#allocation25_spill] sm:$0xff] %v8063_v60  ;;  %v2113_v20 = vadd.f32 %v2112_v44, %v2082_v37  ;;  %v2044_v56 = vadd.f32 %v2043_v0, %v8063_v60  ;;  %v2083_v22 = vmul.f32 %v8063_v60, %v8063_v60 }
 0x223   : > { %v1905_v10 = vadd.f32 %v1904_v59, %v1874_v7  ;;  %v2311_v59 = vld [vmem:[#allocation2 + $0xc8] sm:$0x1] }
 0x224   : > { %v2114_v9 = vadd.f32 %v2113_v20, %v2083_v22 }
 0x22e   : > { %v8068_v5 = vpop.f32.mrb[36].mxu0 }
 0x22f   : > { %v1835_v33 = vadd.f32 %v1834_v46, %v8068_v5  ;;  %v1875_v50 = vmul.f32 %v8068_v5, %v8068_v5  ;;  %v8073_v39 = vpop.f32.mrb[37].mxu0  ;;  %v2312_v46 = vsel %vm7670_vm6, 0, %v2311_v59 }
 0x230   : > { %10484 = vst [vmem:[#allocation26_spill] sm:$0xff] %v8073_v39  ;;  %v2045_v40 = vadd.f32 %v2044_v56, %v8073_v39  ;;  %v2084_v43 = vmul.f32 %v8073_v39, %v8073_v39  ;;  %v8078_v17 = vpop.f32.mrb[38].mxu0  ;;  %2313 = vst [vmem:[#allocation2 + $0xc8] sm:$0x1] %v2312_v46 }
 0x231   : > { %v1906_v38 = vadd.f32 %v1905_v10, %v1875_v50  ;;  %v1836_v36 = vadd.f32 %v1835_v33, %v8078_v17  ;;  %v1876_v29 = vmul.f32 %v8078_v17, %v8078_v17  ;;  %v8083_v62 = vpop.f32.mrb[39].mxu0 }
 0x232   : > { %10485 = vst [vmem:[#allocation27_spill] sm:$0xff] %v8083_v62  ;;  %v2115_v44 = vadd.f32 %v2114_v9, %v2084_v43  ;;  %v2046_v48 = vadd.f32 %v2045_v40, %v8083_v62  ;;  %v2085_v52 = vmul.f32 %v8083_v62, %v8083_v62 }
 0x233   : > { %v1907_v0 = vadd.f32 %v1906_v38, %v1876_v29 }
 0x234   : > { %v2116_v37 = vadd.f32 %v2115_v44, %v2085_v52 }
 0x245   : > { %v8090_v7 = vpop.f32.mrb[0].mxu1 }
 0x246   : > { %v8092_v20 = vpop.f32.mrb[1].mxu1  ;;  %v1881_v53 = vmul.f32 %v8090_v7, %v8090_v7 }
 0x247   : > { %10486 = vst [vmem:[#allocation28_spill] sm:$0xff] %v8092_v20  ;;  %v8094_v56 = vpop.f32.mrb[2].mxu1  ;;  %v2090_v55 = vmul.f32 %v8092_v20, %v8092_v20 }
 0x248   : > { %v8096_v22 = vpop.f32.mrb[3].mxu1 }
 0x249   : > { %10487 = vst [vmem:[#allocation29_spill] sm:$0xff] %v8096_v22 }
 0x24d   : > { %v8098_v10 = vpop.f32.mrb[40].mxu0 }
 0x24e   : > { %v1837_v9 = vadd.f32 %v1836_v36, %v8098_v10  ;;  %v1877_v33 = vmul.f32 %v8098_v10, %v8098_v10  ;;  %v8103_v50 = vpop.f32.mrb[41].mxu0 }
 0x24f   : > { %10488 = vst [vmem:[#allocation30_spill] sm:$0xff] %v8103_v50  ;;  %v2047_v31 = vadd.f32 %v2046_v48, %v8103_v50  ;;  %v2086_v40 = vmul.f32 %v8103_v50, %v8103_v50  ;;  %v8108_v43 = vpop.f32.mrb[42].mxu0 }
 0x250   : > { %v1908_v38 = vadd.f32 %v1907_v0, %v1877_v33  ;;  %v1838_v29 = vadd.f32 %v1837_v9, %v8108_v43  ;;  %v1878_v44 = vmul.f32 %v8108_v43, %v8108_v43  ;;  %v8113_v52 = vpop.f32.mrb[43].mxu0 }
 0x251   : > { %10489 = vst [vmem:[#allocation31_spill] sm:$0xff] %v8113_v52  ;;  %v2117_v36 = vadd.f32 %v2116_v37, %v2086_v40  ;;  %v2048_v59 = vadd.f32 %v2047_v31, %v8113_v52  ;;  %v2087_v46 = vmul.f32 %v8113_v52, %v8113_v52 }
 0x252   : > { %v1909_v48 = vadd.f32 %v1908_v38, %v1878_v44 }
 0x253   : > { %v2118_v45 = vadd.f32 %v2117_v36, %v2087_v46  ;;  %v6689_v36 = vld [vmem:[#allocation3 + $0x40] sm:$0xff]  }
 0x254   : > { %6074 = vmatprep.subr.bf16.mxu1 %v6689_v36  ;;  %v1882_v36 = vmul.f32 %v8094_v56, %v8094_v56 }
 0x255   : > { %6075 = vmatpush3.bf16.msra.mxu1 %v6690_v58  ;;  %v2091_v58 = vmul.f32 %v8096_v22, %v8096_v22 }
 0x265   : > { %v8118_v62 = vpop.f32.mrb[4].mxu1 }
 0x266   : > { %v8120_v50 = vpop.f32.mrb[5].mxu1 }
 0x267   : > { %10490 = vst [vmem:[#allocation32_spill] sm:$0xff] %v8120_v50  ;;  %v8122_v0 = vpop.f32.mrb[6].mxu1 }
 0x268   : > { %v8124_v9 = vpop.f32.mrb[7].mxu1 }
 0x269   : > { %10491 = vst [vmem:[#allocation33_spill] sm:$0xff] %v8124_v9 }
 0x26d   : > { %v8126_v33 = vpop.f32.mrb[44].mxu0 }
 0x26e   : > { %v1839_v39 = vadd.f32 %v1838_v29, %v8126_v33  ;;  %v1879_v37 = vmul.f32 %v8126_v33, %v8126_v33  ;;  %v8131_v31 = vpop.f32.mrb[45].mxu0 }
 0x26f   : > { %10492 = vst [vmem:[#allocation34_spill] sm:$0xff] %v8131_v31  ;;  %v2049_v40 = vadd.f32 %v2048_v59, %v8131_v31  ;;  %v2088_v38 = vmul.f32 %v8131_v31, %v8131_v31  ;;  %v8136_v44 = vpop.f32.mrb[46].mxu0  ;;  %v6691_v31 = vld [vmem:[#allocation3 + $0xc0] sm:$0xff]  }
 0x270   : > { %v1910_v46 = vadd.f32 %v1909_v48, %v1879_v37  ;;  %v1840_v52 = vadd.f32 %v1839_v39, %v8136_v44  ;;  %v1880_v60 = vmul.f32 %v8136_v44, %v8136_v44  ;;  %v8141_v29 = vpop.f32.mrb[47].mxu0  ;;  %v6692_v37 = vld [vmem:[#allocation3 + $0x80] sm:$0xff]   ;;  %6186 = vmatprep.subr.bf16.mxu0 %v6691_v31 }
 0x271   : > { %10493 = vst [vmem:[#allocation35_spill] sm:$0xff] %v8141_v29  ;;  %v2119_v23 = vadd.f32 %v2118_v45, %v2088_v38  ;;  %v2050_v61 = vadd.f32 %v2049_v40, %v8141_v29  ;;  %v2089_v59 = vmul.f32 %v8141_v29, %v8141_v29  ;;  %v6693_v40 = vld [vmem:[#allocation3 + $0x48] sm:$0xff]   ;;  %6187 = vmatpush3.bf16.msra.mxu0 %v6692_v37  ;;  %v6697_v37 = vld [vmem:[#allocation3 + $0x50] sm:$0xff]  }
 0x272   : > { %v1841_v48 = vadd.f32 %v1840_v52, %v8090_v7  ;;  %v1911_v39 = vadd.f32 %v1910_v46, %v1880_v60  ;;  %6076 = vmatprep.subr.bf16.mxu1 %v6693_v40  ;;  %v6695_v46 = vld [vmem:[#allocation3 + $0xc8] sm:$0xff]  }
 0x273   : > { %v2051_v45 = vadd.f32 %v2050_v61, %v8092_v20  ;;  %v2120_v38 = vadd.f32 %v2119_v23, %v2089_v59  ;;  %v1883_v61 = vmul.f32 %v8118_v62, %v8118_v62  ;;  %6077 = vmatpush3.bf16.msra.mxu1 %v6694_v16  ;;  %v6696_v59 = vld [vmem:[#allocation3 + $0x88] sm:$0xff]   ;;  %6188 = vmatprep.subr.bf16.mxu0 %v6695_v46  ;;  %v6701_v46 = vld [vmem:[#allocation3 + $0x58] sm:$0xff]  }
 0x274   : > { %v1842_v29 = vadd.f32 %v1841_v48, %v8094_v56  ;;  %v1912_v4 = vadd.f32 %v1911_v39, %v1881_v53  ;;  %v2092_v53 = vmul.f32 %v8120_v50, %v8120_v50  ;;  %v2093_v16 = vmul.f32 %v8124_v9, %v8124_v9  ;;  %6078 = vmatprep.subr.bf16.mxu1 %v6697_v37  ;;  %v6717_v20 = vld [vmem:[#allocation3 + $0x78] sm:$0xff]  }
 0x275   : > { %v2052_v60 = vadd.f32 %v2051_v45, %v8096_v22  ;;  %v2121_v52 = vadd.f32 %v2120_v38, %v2090_v55  ;;  %v1884_v55 = vmul.f32 %v8122_v0, %v8122_v0  ;;  %6189 = vmatpush3.bf16.msra.mxu0 %v6696_v59  ;;  %v6716_v22 = vld [vmem:[#allocation3 + $0xb0] sm:$0xff]  }
 0x276   : > { %v1913_v23 = vadd.f32 %v1912_v4, %v1882_v36  ;;  %v1843_v31 = vadd.f32 %v1842_v29, %v8118_v62  ;;  %v6698_v4 = vld [vmem:[#allocation3 + $0x10] sm:$0xff]  }
 0x277   : > { %v2122_v48 = vadd.f32 %v2121_v52, %v2091_v58  ;;  %v2053_v39 = vadd.f32 %v2052_v60, %v8120_v50  ;;  %v6699_v36 = vld [vmem:[#allocation3 + $0xd0] sm:$0xff]   ;;  %6079 = vmatpush3.bf16.msra.mxu1 %v6698_v4  ;;  %v6702_v50 = vld [vmem:[#allocation3 + $0x18] sm:$0xff]   ;;  %v6706_v4 = vld [vmem:[#allocation3 + $0x20] sm:$0xff]  }
 0x278   : > { %v1844_v45 = vadd.f32 %v1843_v31, %v8122_v0  ;;  %v1914_v38 = vadd.f32 %v1913_v23, %v1883_v61  ;;  %v6700_v60 = vld [vmem:[#allocation3 + $0x90] sm:$0xff]   ;;  %6190 = vmatprep.subr.bf16.mxu0 %v6699_v36  ;;  %6080 = vmatprep.subr.bf16.mxu1 %v6701_v46  ;;  %v6703_v61 = vld [vmem:[#allocation3 + $0xd8] sm:$0xff]   ;;  %v6707_v36 = vld [vmem:[#allocation3 + $0xe0] sm:$0xff]  }
 0x279   : > { %v2054_v29 = vadd.f32 %v2053_v39, %v8124_v9  ;;  %v2123_v40 = vadd.f32 %v2122_v48, %v2092_v53  ;;  %6191 = vmatpush3.bf16.msra.mxu0 %v6700_v60  ;;  %v6704_v31 = vld [vmem:[#allocation3 + $0x98] sm:$0xff]   ;;  %v6705_v39 = vld [vmem:[#allocation3 + $0x60] sm:$0xff]   ;;  %v6714_v9 = vld [vmem:[#allocation3 + $0x30] sm:$0xff]  }
 0x27a   : > { %v1915_v58 = vadd.f32 %v1914_v38, %v1884_v55  ;;  %6192 = vmatprep.subr.bf16.mxu0 %v6703_v61  ;;  %v6708_v61 = vld [vmem:[#allocation3 + $0xa0] sm:$0xff]  }
 0x27b   : > { %v2124_v52 = vadd.f32 %v2123_v40, %v2093_v16  ;;  %6081 = vmatpush3.bf16.msra.mxu1 %v6702_v50 }
 0x27c   : > { %6082 = vmatprep.subr.bf16.mxu1 %v6705_v39  ;;  %v8200_v39 = vld [vmem:[#allocation2 + $0x4] sm:$0xf] }
 0x27d   : > { %6193 = vmatpush3.bf16.msra.mxu0 %v6704_v31  ;;  %v6709_v31 = vld [vmem:[#allocation3 + $0x68] sm:$0xff]  }
 0x27e   : > { %v8170_v23 = vpop.f32.mrb[8].mxu1  ;;  %6194 = vmatprep.subr.bf16.mxu0 %v6707_v36  ;;  %v6713_v36 = vld [vmem:[#allocation3 + $0x70] sm:$0xff]  }
 0x27f   : > { %v1845_v59 = vadd.f32 %v1844_v45, %v8170_v23  ;;  %v1885_v53 = vmul.f32 %v8170_v23, %v8170_v23  ;;  %v8175_v48 = vpop.f32.mrb[9].mxu1  ;;  %6083 = vmatpush3.bf16.msra.mxu1 %v6706_v4  ;;  %v2910_v4 = vshll.u32 %v8200_v39, 16 }
 0x280   : > { %10494 = vst [vmem:[#allocation36_spill] sm:$0xff] %v8175_v48  ;;  %v2055_v37 = vadd.f32 %v2054_v29, %v8175_v48  ;;  %v2094_v55 = vmul.f32 %v8175_v48, %v8175_v48  ;;  %v8180_v38 = vpop.f32.mrb[10].mxu1  ;;  %v8198_v48 = vld [vmem:[#allocation2] sm:$0xf]  ;;  %6084 = vmatprep.subr.bf16.mxu1 %v6709_v31  ;;  %v6715_v31 = vld [vmem:[#allocation3 + $0xf0] sm:$0xff]  }
 0x281   : > { %v1916_v50 = vadd.f32 %v1915_v58, %v1885_v53  ;;  %v8183_v16 = vadd.f32 %v1845_v59, %v8180_v38  ;;  %v1886_v45 = vmul.f32 %v8180_v38, %v8180_v38  ;;  %v8187_v40 = vpop.f32.mrb[11].mxu1  ;;  %6195 = vmatpush3.bf16.msra.mxu0 %v6708_v61  ;;  %v6710_v53 = vld [vmem:[#allocation3 + $0x28] sm:$0xff]   ;;  %v2912_v61 = vrot.slane %v2910_v4, 5 }
 0x282   : > { %10495 = vst [vmem:[#allocation37_spill] sm:$0xff] %v8187_v40  ;;  %v2125_v60 = vadd.f32 %v2124_v52, %v2094_v55  ;;  %v8190_v29 = vadd.f32 %v2055_v37, %v8187_v40  ;;  %v2095_v46 = vmul.f32 %v8187_v40, %v8187_v40  ;;  %v6711_v52 = vld [vmem:[#allocation3 + $0xe8] sm:$0xff]   ;;  %v2901_v37 = vshrl.u32 %v8198_v48, 16 }
 0x283   : > { %v8194_v58 = vadd.f32 %v1916_v50, %v1886_v45  ;;  %v2904_v55 = vshll.u32 %v8198_v48, 16  ;;  %v2914_v50 = vshrl.u32 %v8200_v39, 16  ;;  %6085 = vmatpush3.bf16.msra.mxu1 %v6710_v53  ;;  %v6712_v45 = vld [vmem:[#allocation3 + $0xa8] sm:$0xff]   ;;  %6196 = vmatprep.subr.bf16.mxu0 %v6711_v52  ;;  %v2848_v53 = vld [vmem:[#allocation2 + $0x8] sm:$0x1]  ;;  %v5733_v52 = vrot.slane %v8198_v48, 9 }
 0x284   : > { %v8196_v59 = vadd.f32 %v2125_v60, %v2095_v46  ;;  %v2903_v60 = vrot.slane %v2901_v37, 4  ;;  %6086 = vmatprep.subr.bf16.mxu1 %v6713_v36  ;;  %v3334_v37 = vrot.slane %v8200_v39, 5  ;;  %v6720_v36 = vld [vmem:[#allocation3 + $0xb8] sm:$0xff]  }
 0x285   : > { %v2906_v46 = vrot.slane %v2904_v55, 5  ;;  %v2916_v40 = vrot.slane %v2914_v50, 4  ;;  %6197 = vmatpush3.bf16.msra.mxu0 %v6712_v45  ;;  %v2920_v50 = vshll.u32 %v2848_v53, 16  ;;  %v3337_v45 = vrot.slane %v2848_v53, 5 }
 0x286   : > { %6198 = vmatprep.subr.bf16.mxu0 %v6715_v31 }
 0x287   : > { %v2907_v26 = vor.u32 %v2906_v46, %v2903_v60  ;;  %v2917_v30 = vor.u32 %v2916_v40, %v2912_v61  ;;  %6087 = vmatpush3.bf16.msra.mxu1 %v6714_v9  ;;  %v8210_v60 = vsel %vm7041_vm4, %v5733_v52, %v3334_v37  ;;  %v3336_v9 = vrot.slane %v3334_v37, 4  ;;  %v6725_v52 = vld [vmem:[#allocation3 + $0x100] sm:$0xff]  }
 0x288   : > { %6088 = vmatprep.subr.bf16.mxu1 %v6717_v20  ;;  %10496 = vst [vmem:[#allocation38_spill] sm:$0xff] %v8210_v60  ;;  %v2922_v46 = vrot.slane %v2920_v50, 5 }
 0x289   : > { %v2908_v55 = vrot.slane %v2907_v26, 4  ;;  %v2918_v4 = vrot.slane %v2917_v30, 4  ;;  %6199 = vmatpush3.bf16.msra.mxu0 %v6716_v22  ;;  %v5751_v30 = vcombine.low %v8198_v48, %v8200_v39  ;;  %v8220_v26 = vsel %vm7041_vm4, %v3336_v9, %v3337_v45 }
 0x28a   : > { %6200 = vmatprep.subr.bf16.mxu0 %v6719_v8  ;;  %10497 = vst [vmem:[#allocation39_spill] sm:$0xff] %v8220_v26 }
 0x28b   : > { %v2913_v40 = vsel %vm7080_vm5, %v2908_v55, %v2912_v61  ;;  %6089 = vmatpush3.bf16.msra.mxu1 %v6718_v25  ;;  %v2923_v61 = vsel %vm7080_vm5, %v2918_v4, %v2922_v46 }
 0x28c   : > { %6298 = vmatprep.subr.bf16.mxu1 %v6723_v21 }
 0x28d   : > { %6201 = vmatpush3.bf16.msra.mxu0 %v6720_v36 }
 0x28e   : > { %v8214_v31 = vpop.f32.mrb[12].mxu1 }
 0x28f   : > { %v1847_v20 = vadd.f32 %v8183_v16, %v8214_v31  ;;  %v1887_v8 = vmul.f32 %v8214_v31, %v8214_v31  ;;  %v8226_v22 = vpop.f32.mrb[13].mxu1  ;;  %v5767_v16 = vcombine.low %v2913_v40, %v2923_v61 }
 0x290   : > { %10498 = vst [vmem:[#allocation40_spill] sm:$0xff] %v8226_v22  ;;  %v2057_v48 = vadd.f32 %v8190_v29, %v8226_v22  ;;  %v2096_v39 = vmul.f32 %v8226_v22, %v8226_v22  ;;  %v8236_v53 = vpop.f32.mrb[14].mxu1 }
 0x291   : > { %v1918_v37 = vadd.f32 %v8194_v58, %v1887_v8  ;;  %v1848_v55 = vadd.f32 %v1847_v20, %v8236_v53  ;;  %v1888_v4 = vmul.f32 %v8236_v53, %v8236_v53  ;;  %v8242_v50 = vpop.f32.mrb[15].mxu1  ;;  %4336 = vmatprep.mubr.bf16.mxu1 %v5767_v16 }
 0x292   : > { %v2127_v21 = vadd.f32 %v8196_v59, %v2096_v39  ;;  %v2058_v29 = vadd.f32 %v2057_v48, %v8242_v50  ;;  %v2097_v45 = vmul.f32 %v8242_v50, %v8242_v50  ;;  %4337 = vmatmul.mubr.bf16.vlgmr.msra.gmra.mrb[16].mxu1 %v5751_v30 }
 0x293   : > { %v1849_v9 = vrot.slane %v1848_v55, 4  ;;  %v1919_v36 = vadd.f32 %v1918_v37, %v1888_v4  ;;  %6299 = vmatpush3.bf16.msra.mxu1 %v6725_v52 }
 0x294   : > { %v2059_v40 = vrot.slane %v2058_v29, 4  ;;  %v2128_v58 = vadd.f32 %v2127_v21, %v2097_v45  ;;  %6300 = vmatprep.subr.bf16.mxu1 %v6727_v1 }
 0x295   : > { %v1850_v46 = vadd.f32 %v1849_v9, %v1848_v55  ;;  %v1920_v20 = vrot.slane %v1919_v36, 4 }
 0x296   : > { %v2060_v8 = vadd.f32 %v2059_v40, %v2058_v29  ;;  %v2129_v61 = vrot.slane %v2128_v58, 4  ;;  %v6729_v29 = vld [vmem:[#allocation3 + $0x108] sm:$0xff]  }
 0x297   : > { %v1851_v25 = vrot.slane %v1850_v46, 2  ;;  %v1921_v57 = vadd.f32 %v1920_v20, %v1919_v36  ;;  %6301 = vmatpush3.bf16.msra.mxu1 %v6729_v29  ;;  %v6733_v20 = vld [vmem:[#allocation3 + $0x110] sm:$0xff]  }
 0x298   : > { %v2061_v18 = vrot.slane %v2060_v8, 2  ;;  %v2130_v59 = vadd.f32 %v2129_v61, %v2128_v58  ;;  %v10506_v61 = vld [vmem:[#allocation19_spill] sm:$0xff] }
 0x299   : > { %v1852_v39 = vadd.f32 %v1851_v25, %v1850_v46  ;;  %v1922_v48 = vrot.slane %v1921_v57, 2 }
 0x29a   : > { %v2062_v26 = vadd.f32 %v2061_v18, %v2060_v8  ;;  %v2131_v60 = vrot.slane %v2130_v59, 2 }
 0x29b   : > { %v1853_v22 = vrot.slane %v1852_v39, 1  ;;  %v1923_v16 = vadd.f32 %v1922_v48, %v1921_v57  ;;  %v10502_v48 = vld [vmem:[#allocation15_spill] sm:$0xff] }
 0x29c   : > { %v2063_v37 = vrot.slane %v2062_v26, 1  ;;  %v2132_v30 = vadd.f32 %v2131_v60, %v2130_v59  ;;  %v10505_v59 = vld [vmem:[#allocation18_spill] sm:$0xff] }
 0x29d   : > { %v1854_v4 = vadd.f32 %v1853_v22, %v1852_v39  ;;  %v1924_v21 = vrot.slane %v1923_v16, 1  ;;  %v10503_v39 = vld [vmem:[#allocation16_spill] sm:$0xff] }
 0x29e   : > { %v2064_v52 = vadd.f32 %v2063_v37, %v2062_v26  ;;  %v2133_v55 = vrot.slane %v2132_v30, 1 }
 0x29f   : > { %v8248_v45 = vmul.f32 0.00390625, %v1854_v4  ;;  %v1925_v9 = vadd.f32 %v1924_v21, %v1923_v16  ;;  %v10501_v16 = vld [vmem:[#allocation14_spill] sm:$0xff] }
 0x2a0   : > { %v8250_v36 = vmul.f32 0.00390625, %v2064_v52  ;;  %v2134_v25 = vadd.f32 %v2133_v55, %v2132_v30  ;;  %v6731_v52 = vld [vmem:[#allocation3 + $0x150] sm:$0xff]   ;;  %v10499_v55 = vld [vmem:[#allocation12_spill] sm:$0xff]  ;;  %v10500_v30 = vld [vmem:[#allocation13_spill] sm:$0xff] }
 0x2a1   : > { %v1926_v18 = vmul.f32 0.00390625, %v1925_v9  ;;  %v1927_v57 = vmul.f32 %v8248_v45, %v8248_v45  ;;  %6302 = vmatprep.subr.bf16.mxu1 %v6731_v52  ;;  %v10527_v40 = vsub.f32 %v8236_v53, %v8248_v45  ;;  %v10528_v21 = vsub.f32 %v7840_v3, %v8248_v45 }
 0x2a2   : > { %v2135_v29 = vmul.f32 0.00390625, %v2134_v25  ;;  %6303 = vmatpush3.bf16.msra.mxu1 %v6733_v20  ;;  %v10530_v1 = vsub.f32 %v7874_v35, %v8248_v45  ;;  %v10532_v3 = vsub.f32 %v7906_v63, %v8248_v45  ;;  %v10534_v35 = vsub.f32 %v7930_v24, %v8248_v45 }
 0x2a3   : > { %v1928_v46 = vsub.f32 %v1926_v18, %v1927_v57  ;;  %v10536_v63 = vsub.f32 %v7954_v15, %v8248_v45  ;;  %v10538_v24 = vsub.f32 %v7978_v2, %v8248_v45  ;;  %v10540_v15 = vsub.f32 %v8002_v42, %v8248_v45 }
 0x2a4   : > { %v10542_v2 = vsub.f32 %v8026_v28, %v8248_v45  ;;  %v10544_v42 = vsub.f32 %v8048_v11, %v8248_v45  ;;  %v10558_v8 = vsub.f32 %v8118_v62, %v8248_v45  ;;  %v10561_v62 = vsub.f32 %v8180_v38, %v8248_v45  ;;  %v10602_v38 = vld [vmem:[#allocation25_spill] sm:$0xff] }
 0x2a5   : > { %v1929_v37 = vmax.f32 %v1928_v46, 0.0  ;;  %v10508_v46 = vld [vmem:[#allocation21_spill] sm:$0xff] }
 0x2a7   : > { %v1962_v18 = vadd.f32 1e-05, %v1929_v37  ;;  %v2136_v37 = vmul.f32 %v8250_v36, %v8250_v36 }
 0x2a9   : > { %6779 = vrsqrt.f32 %v1962_v18  ;;  %v2137_v9 = vsub.f32 %v2135_v29, %v2136_v37  ;;  %v10504_v29 = vld [vmem:[#allocation17_spill] sm:$0xff]  ;;  %v10526_v18 = vsub.f32 %v8214_v31, %v8248_v45  ;;  %v10529_v37 = vsub.f32 %v7845_v41, %v8248_v45 }
 0x2aa   : > { %v10531_v31 = vsub.f32 %v7885_v6, %v8248_v45  ;;  %v10533_v41 = vsub.f32 %v7916_v14, %v8248_v45  ;;  %v10535_v6 = vsub.f32 %v7940_v49, %v8248_v45  ;;  %v10537_v14 = vsub.f32 %v7964_v34, %v8248_v45 }
 0x2ab   : > { %v2138_v25 = vmax.f32 %v2137_v9, 0.0  ;;  %v10539_v49 = vsub.f32 %v7988_v32, %v8248_v45  ;;  %v10541_v34 = vsub.f32 %v8012_v27, %v8248_v45  ;;  %v10543_v32 = vsub.f32 %v8036_v54, %v8248_v45 }
 0x2ac   : > { %v10545_v27 = vsub.f32 %v8058_v13, %v8248_v45  ;;  %v10546_v9 = vsub.f32 %v8068_v5, %v8248_v45 }
 0x2ad   : > { %v2171_v4 = vadd.f32 1e-05, %v2138_v25 }
 0x2af   : > { %6781 = vrsqrt.f32 %v2171_v4 }
 0x2b3   : > { %v6780_v58 = vpop.eup %6779 }
 0x2b4   : > { %v1994_v20 = vmul.f32 %v6780_v58, %v10526_v18  ;;  %v1995_v60 = vmul.f32 %v6780_v58, %v10527_v40  ;;  %v8393_v52 = vmul.f32 %v6780_v58, %v10528_v21  ;;  %v8398_v25 = vmul.f32 %v6780_v58, %v10529_v37 }
 0x2b5   : > { %v8403_v4 = vmul.f32 %v6780_v58, %v10530_v1  ;;  %v8408_v53 = vmul.f32 %v6780_v58, %v10531_v31  ;;  %v8413_v40 = vmul.f32 %v6780_v58, %v10532_v3  ;;  %v8418_v21 = vmul.f32 %v6780_v58, %v10533_v41 }
 0x2b6   : > { %v2026_v18 = vmax.f32 %v1994_v20, 0.0  ;;  %v2027_v37 = vmax.f32 %v1995_v60, 0.0  ;;  %v8423_v1 = vmul.f32 %v6780_v58, %v10534_v35  ;;  %v8428_v31 = vmul.f32 %v6780_v58, %v10535_v6 }
 0x2b7   : > { %v8433_v3 = vmul.f32 %v6780_v58, %v10536_v63  ;;  %v8438_v20 = vmul.f32 %v6780_v58, %v10537_v14  ;;  %v8443_v60 = vmul.f32 %v6780_v58, %v10538_v24  ;;  %v8448_v41 = vmul.f32 %v6780_v58, %v10539_v49 }
 0x2b8   : > { %v5944_v35 = vpack.c.bf16 %v2026_v18, %v2026_v18  ;;  %v5945_v6 = vpack.c.bf16 %v2027_v37, %v2027_v37  ;;  %v8453_v63 = vmul.f32 %v6780_v58, %v10540_v15  ;;  %v8458_v14 = vmul.f32 %v6780_v58, %v10541_v34 }
 0x2b9   : > { %v8463_v24 = vmul.f32 %v6780_v58, %v10542_v2  ;;  %v8468_v18 = vmul.f32 %v6780_v58, %v10543_v32  ;;  %v8473_v37 = vmul.f32 %v6780_v58, %v10544_v42  ;;  %v8478_v49 = vmul.f32 %v6780_v58, %v10545_v27  ;;  %v8500_v22 = vpop.eup %6781 }
 0x2ba   : > { %v2668_v15 = vshrl.u32 %v5944_v35, 16  ;;  %v2676_v34 = vshrl.u32 %v5945_v6, 16  ;;  %v2679_v28 = vshll.u32 %v5945_v6, 16  ;;  %v2671_v2 = vshll.u32 %v5944_v35, 16  ;;  %v6735_v35 = vld [vmem:[#allocation3 + $0x158] sm:$0xff]  }
 0x2bb   : > { %v8483_v54 = vmul.f32 %v6780_v58, %v10546_v9  ;;  %v10547_v32 = vsub.f32 %v8078_v17, %v8248_v45  ;;  %v10548_v42 = vsub.f32 %v8098_v10, %v8248_v45  ;;  %v10549_v27 = vsub.f32 %v8108_v43, %v8248_v45  ;;  %6304 = vmatprep.subr.bf16.mxu1 %v6735_v35  ;;  %v2829_v43 = vld [vmem:[#allocation2 + $0xb0] sm:$0x1] }
 0x2bc   : > { %v2670_v5 = vrot.slane %v2668_v15, 7  ;;  %v2678_v9 = vrot.slane %v2676_v34, 7  ;;  %v10550_v17 = vsub.f32 %v8126_v33, %v8248_v45  ;;  %v10551_v10 = vsub.f32 %v8136_v44, %v8248_v45 }
 0x2bd   : > { %v8488_v11 = vmul.f32 %v6780_v58, %v10547_v32  ;;  %v8493_v13 = vmul.f32 %v6780_v58, %v10548_v42  ;;  %v8498_v6 = vmul.f32 %v6780_v58, %v10549_v27  ;;  %v2843_v27 = vld [vmem:[#allocation2 + $0xc8] sm:$0x1]  ;;  %v10554_v15 = vsub.f32 %v8242_v50, %v8250_v36 }
 0x2be   : > { %v8505_v32 = vmul.f32 %v6780_v58, %v10550_v17  ;;  %v8510_v42 = vmul.f32 %v6780_v58, %v10551_v10  ;;  %v10556_v33 = vsub.f32 %v8090_v7, %v8248_v45  ;;  %v10557_v44 = vsub.f32 %v8094_v56, %v8248_v45 }
 0x2bf   : > { %v8522_v34 = vmul.f32 %v8500_v22, %v10554_v15  ;;  %v8537_v57 = vmul.f32 %v6780_v58, %v10558_v8  ;;  %v2674_v50 = vrot.slane %v2670_v5, 4  ;;  %v2681_v26 = vor.u32 %v2679_v28, %v2678_v9  ;;  %v10611_v28 = vld [vmem:[#allocation30_spill] sm:$0xff] }
 0x2c0   : > { %v8527_v17 = vmul.f32 %v6780_v58, %v10556_v33  ;;  %v8532_v10 = vmul.f32 %v6780_v58, %v10557_v44  ;;  %v2683_v15 = vrot.slane %v2678_v9, 4  ;;  %v6737_v33 = vld [vmem:[#allocation3 + $0x118] sm:$0xff]   ;;  %v10560_v56 = vsub.f32 %v8170_v23, %v8248_v45  ;;  %v10605_v23 = vld [vmem:[#allocation26_spill] sm:$0xff] }
 0x2c1   : > { %10555 = vst [vmem:[#allocation12_spill] sm:$0xff] %v8522_v34  ;;  %v10559_v34 = vsub.f32 %v8122_v0, %v8248_v45  ;;  %v8552_v8 = vmul.f32 %v6780_v58, %v10561_v62  ;;  %v8554_v35 = vor.u32 %v2671_v2, %v2670_v5  ;;  %v2682_v0 = vsel %vm8514_vm8, %v2674_v50, %v2681_v26  ;;  %v6740_v45 = vld [vmem:[#allocation3 + $0x1c0] sm:$0xff]  }
 0x2c2   : > { %v8547_v44 = vmul.f32 %v6780_v58, %v10560_v56  ;;  %6305 = vmatpush3.bf16.msra.mxu1 %v6737_v33  ;;  %2842 = vst [vmem:[#allocation2 + $0xc4] sm:$0xf] %v2682_v0  ;;  %v10563_v50 = vsub.f32 %v7843_v47, %v8250_v36  ;;  %v10565_v56 = vsub.f32 %v7856_v19, %v8250_v36 }
 0x2c3   : > { %v8542_v7 = vmul.f32 %v6780_v58, %v10559_v34  ;;  %v2844_v34 = vsel %vm7663_vm2, %v2683_v15, %v2843_v27  ;;  %v10569_v27 = vsub.f32 %v7891_v12, %v8250_v36  ;;  %6410 = vmatprep.subr.bf16.mxu0 %v6740_v45 }
 0x2c4   : > { %2845 = vst [vmem:[#allocation2 + $0xc8] sm:$0x1] %v2844_v34  ;;  %v8594_v15 = vmul.f32 %v8500_v22, %v10563_v50  ;;  %v8600_v62 = vmul.f32 %v8500_v22, %v10565_v56  ;;  %v10567_v34 = vsub.f32 %v7879_v51, %v8250_v36  ;;  %v10571_v50 = vsub.f32 %v10499_v55, %v8250_v36 }
 0x2c5   : > { %v8612_v47 = vmul.f32 %v8500_v22, %v10569_v27  ;;  %v10573_v56 = vsub.f32 %v10500_v30, %v8250_v36  ;;  %v10577_v27 = vsub.f32 %v10502_v48, %v8250_v36 }
 0x2c6   : > { %10564 = vst [vmem:[#allocation13_spill] sm:$0xff] %v8594_v15  ;;  %10566 = vst [vmem:[#allocation14_spill] sm:$0xff] %v8600_v62  ;;  %v8606_v26 = vmul.f32 %v8500_v22, %v10567_v34  ;;  %v8618_v19 = vmul.f32 %v8500_v22, %v10571_v50  ;;  %v10575_v34 = vsub.f32 %v10501_v16, %v8250_v36  ;;  %v2780_v62 = vld [vmem:[#allocation2 + $0x5c] sm:$0x1] }
 0x2c7   : > { %10570 = vst [vmem:[#allocation16_spill] sm:$0xff] %v8612_v47  ;;  %v8624_v51 = vmul.f32 %v8500_v22, %v10573_v56  ;;  %v8636_v55 = vmul.f32 %v8500_v22, %v10577_v27  ;;  %v10579_v50 = vsub.f32 %v10503_v39, %v8250_v36  ;;  %v10581_v56 = vsub.f32 %v10504_v29, %v8250_v36  ;;  %v2773_v47 = vld [vmem:[#allocation2 + $0x50] sm:$0x1] }
 0x2c8   : > { %10568 = vst [vmem:[#allocation15_spill] sm:$0xff] %v8606_v26  ;;  %10572 = vst [vmem:[#allocation17_spill] sm:$0xff] %v8618_v19  ;;  %v8630_v12 = vmul.f32 %v8500_v22, %v10575_v34  ;;  %v10583_v34 = vsub.f32 %v10505_v59, %v8250_v36  ;;  %v10585_v27 = vsub.f32 %v10506_v61, %v8250_v36  ;;  %v2776_v26 = vld [vmem:[#allocation2 + $0x54] sm:$0xf] }
 0x2c9   : > { %10574 = vst [vmem:[#allocation18_spill] sm:$0xff] %v8624_v51  ;;  %10578 = vst [vmem:[#allocation11_spill] sm:$0xff] %v8636_v55  ;;  %v8642_v30 = vmul.f32 %v8500_v22, %v10579_v50  ;;  %v8648_v16 = vmul.f32 %v8500_v22, %v10581_v56  ;;  %v10587_v50 = vld [vmem:[#allocation20_spill] sm:$0xff]  ;;  %v10590_v56 = vmov %v10508_v46  ;;  %v10608_v46 = vld [vmem:[#allocation27_spill] sm:$0xff] }
 0x2ca   : > { %10576 = vst [vmem:[#allocation19_spill] sm:$0xff] %v8630_v12  ;;  %v8654_v48 = vmul.f32 %v8500_v22, %v10583_v34  ;;  %v8660_v39 = vmul.f32 %v8500_v22, %v10585_v27  ;;  %v10588_v5 = vsub.f32 %v10587_v50, %v8250_v36  ;;  %v10591_v0 = vsub.f32 %v10590_v56, %v8250_v36  ;;  %v10593_v34 = vld [vmem:[#allocation22_spill] sm:$0xff]  ;;  %v10596_v27 = vld [vmem:[#allocation23_spill] sm:$0xff] }
 0x2cb   : > { %10580 = vst [vmem:[#allocation41_spill] sm:$0xff] %v8642_v30  ;;  %10582 = vst [vmem:[#allocation42_spill] sm:$0xff] %v8648_v16  ;;  %v10594_v33 = vsub.f32 %v10593_v34, %v8250_v36  ;;  %v10597_v2 = vsub.f32 %v10596_v27, %v8250_v36  ;;  %v10603_v34 = vsub.f32 %v10602_v38, %v8250_v36  ;;  %v2766_v51 = vld [vmem:[#allocation2 + $0x44] sm:$0x1] }
 0x2cc   : > { %10584 = vst [vmem:[#allocation43_spill] sm:$0xff] %v8654_v48  ;;  %10586 = vst [vmem:[#allocation44_spill] sm:$0xff] %v8660_v39  ;;  %v8666_v29 = vmul.f32 %v8500_v22, %v10588_v5  ;;  %v8672_v59 = vmul.f32 %v8500_v22, %v10591_v0  ;;  %v10599_v5 = vld [vmem:[#allocation24_spill] sm:$0xff]  ;;  %v6739_v0 = vld [vmem:[#allocation3 + $0x160] sm:$0xff]   ;;  %v10606_v27 = vsub.f32 %v10605_v23, %v8250_v36 }
 0x2cd   : > { %v8678_v61 = vmul.f32 %v8500_v22, %v10594_v33  ;;  %v8684_v50 = vmul.f32 %v8500_v22, %v10597_v2  ;;  %v10600_v58 = vsub.f32 %v10599_v5, %v8250_v36  ;;  %v8696_v33 = vmul.f32 %v8500_v22, %v10603_v34  ;;  %v10614_v34 = vld [vmem:[#allocation31_spill] sm:$0xff]  ;;  %6306 = vmatprep.subr.bf16.mxu1 %v6739_v0 }
 0x2ce   : > { %10589 = vst [vmem:[#allocation20_spill] sm:$0xff] %v8666_v29  ;;  %10592 = vst [vmem:[#allocation21_spill] sm:$0xff] %v8672_v59  ;;  %v8702_v2 = vmul.f32 %v8500_v22, %v10606_v27  ;;  %v10609_v5 = vsub.f32 %v10608_v46, %v8250_v36  ;;  %v10617_v27 = vld [vmem:[#allocation34_spill] sm:$0xff] }
 0x2cf   : > { %10595 = vst [vmem:[#allocation22_spill] sm:$0xff] %v8678_v61  ;;  %10598 = vst [vmem:[#allocation23_spill] sm:$0xff] %v8684_v50  ;;  %v8690_v56 = vmul.f32 %v8500_v22, %v10600_v58 }
 0x2d0   : > { %10604 = vst [vmem:[#allocation25_spill] sm:$0xff] %v8696_v33  ;;  %10607 = vst [vmem:[#allocation26_spill] sm:$0xff] %v8702_v2  ;;  %v8708_v58 = vmul.f32 %v8500_v22, %v10609_v5  ;;  %v10615_v33 = vsub.f32 %v10614_v34, %v8250_v36  ;;  %v10618_v2 = vsub.f32 %v10617_v27, %v8250_v36  ;;  %v10620_v5 = vld [vmem:[#allocation35_spill] sm:$0xff] }
 0x2d1   : > { %10601 = vst [vmem:[#allocation24_spill] sm:$0xff] %v8690_v56  ;;  %v10612_v56 = vsub.f32 %v10611_v28, %v8250_v36 }
 0x2d2   : > { %10610 = vst [vmem:[#allocation27_spill] sm:$0xff] %v8708_v58  ;;  %v8720_v23 = vmul.f32 %v8500_v22, %v10615_v33  ;;  %v8726_v46 = vmul.f32 %v8500_v22, %v10618_v2  ;;  %v10621_v58 = vsub.f32 %v10620_v5, %v8250_v36  ;;  %v10626_v33 = vld [vmem:[#allocation29_spill] sm:$0xff]  ;;  %v10629_v2 = vld [vmem:[#allocation32_spill] sm:$0xff] }
 0x2d3   : > { %v8714_v38 = vmul.f32 %v8500_v22, %v10612_v56  ;;  %v10623_v56 = vld [vmem:[#allocation28_spill] sm:$0xff] }
 0x2d4   : > { %10616 = vst [vmem:[#allocation31_spill] sm:$0xff] %v8720_v23  ;;  %10619 = vst [vmem:[#allocation34_spill] sm:$0xff] %v8726_v46  ;;  %v8732_v28 = vmul.f32 %v8500_v22, %v10621_v58  ;;  %v10627_v23 = vsub.f32 %v10626_v33, %v8250_v36  ;;  %v10630_v46 = vsub.f32 %v10629_v2, %v8250_v36  ;;  %v10632_v58 = vld [vmem:[#allocation33_spill] sm:$0xff] }
 0x2d5   : > { %10613 = vst [vmem:[#allocation30_spill] sm:$0xff] %v8714_v38  ;;  %v10624_v38 = vsub.f32 %v10623_v56, %v8250_v36 }
 0x2d6   : > { %10622 = vst [vmem:[#allocation35_spill] sm:$0xff] %v8732_v28  ;;  %v8744_v27 = vmul.f32 %v8500_v22, %v10627_v23  ;;  %v8750_v5 = vmul.f32 %v8500_v22, %v10630_v46  ;;  %v10633_v28 = vsub.f32 %v10632_v58, %v8250_v36  ;;  %v6742_v23 = vld [vmem:[#allocation3 + $0x120] sm:$0xff]  }
 0x2d7   : > { %v8738_v34 = vmul.f32 %v8500_v22, %v10624_v38  ;;  %v10635_v38 = vld [vmem:[#allocation36_spill] sm:$0xff]  ;;  %6307 = vmatpush3.bf16.msra.mxu1 %v6742_v23 }
 0x2d8   : > { %10628 = vst [vmem:[#allocation29_spill] sm:$0xff] %v8744_v27  ;;  %10631 = vst [vmem:[#allocation32_spill] sm:$0xff] %v8750_v5  ;;  %v8756_v56 = vmul.f32 %v8500_v22, %v10633_v28  ;;  %v10636_v0 = vsub.f32 %v10635_v38, %v8250_v36  ;;  %v10638_v27 = vld [vmem:[#allocation37_spill] sm:$0xff]  ;;  %v10641_v5 = vld [vmem:[#allocation40_spill] sm:$0xff] }
 0x2d9   : > { %10625 = vst [vmem:[#allocation28_spill] sm:$0xff] %v8738_v34  ;;  %v10639_v2 = vsub.f32 %v10638_v27, %v8250_v36  ;;  %v10642_v58 = vsub.f32 %v10641_v5, %v8250_v36  ;;  %v10646_v34 = vmax.f32 %v8403_v4, 0.0  ;;  %v10648_v36 = vmax.f32 %v8413_v40, 0.0 }
 0x2da   : > { %10634 = vst [vmem:[#allocation33_spill] sm:$0xff] %v8756_v56  ;;  %v8762_v33 = vmul.f32 %v8500_v22, %v10636_v0  ;;  %v10644_v56 = vmax.f32 %v8393_v52, 0.0  ;;  %v10645_v0 = vmax.f32 %v8398_v25, 0.0  ;;  %v10649_v52 = vmax.f32 %v8418_v21, 0.0 }
 0x2db   : > { %v8768_v46 = vmul.f32 %v8500_v22, %v10639_v2  ;;  %v8774_v28 = vmul.f32 %v8500_v22, %v10642_v58  ;;  %v5916_v27 = vpack.c.bf16 %v10646_v34, %v10646_v34  ;;  %v10647_v2 = vmax.f32 %v8408_v53, 0.0 }
 0x2dc   : > { %10637 = vst [vmem:[#allocation36_spill] sm:$0xff] %v8762_v33  ;;  %v5914_v38 = vpack.c.bf16 %v10644_v56, %v10644_v56  ;;  %v5915_v45 = vpack.c.bf16 %v10645_v0, %v10645_v0  ;;  %v8791_v22 = vpack.c.bf16 %v10648_v36, %v10648_v36  ;;  %v8796_v5 = vpack.c.bf16 %v10649_v52, %v10649_v52 }
 0x2dd   : > { %10640 = vst [vmem:[#allocation37_spill] sm:$0xff] %v8768_v46  ;;  %10643 = vst [vmem:[#allocation40_spill] sm:$0xff] %v8774_v28  ;;  %v5917_v50 = vpack.c.bf16 %v10647_v2, %v10647_v2  ;;  %v10650_v25 = vmax.f32 %v8423_v1, 0.0  ;;  %v10651_v53 = vmax.f32 %v8428_v31, 0.0  ;;  %v10652_v40 = vmax.f32 %v8433_v3, 0.0 }
 0x2de   : > { %v10653_v21 = vmax.f32 %v8438_v20, 0.0  ;;  %v10654_v1 = vmax.f32 %v8443_v60, 0.0  ;;  %v10655_v31 = vmax.f32 %v8448_v41, 0.0  ;;  %v10656_v3 = vmax.f32 %v8453_v63, 0.0 }
 0x2df   : > { %v8801_v4 = vpack.c.bf16 %v10650_v25, %v10650_v25  ;;  %v8806_v34 = vpack.c.bf16 %v10651_v53, %v10651_v53  ;;  %v8811_v56 = vpack.c.bf16 %v10652_v40, %v10652_v40  ;;  %v10657_v20 = vmax.f32 %v8458_v14, 0.0 }
 0x2e0   : > { %v8816_v58 = vpack.c.bf16 %v10653_v21, %v10653_v21  ;;  %v8821_v23 = vpack.c.bf16 %v10654_v1, %v10654_v1  ;;  %v8826_v0 = vpack.c.bf16 %v10655_v31, %v10655_v31  ;;  %v8831_v2 = vpack.c.bf16 %v10656_v3, %v10656_v3 }
 0x2e1   : > { %v8836_v36 = vpack.c.bf16 %v10657_v20, %v10657_v20  ;;  %v10658_v60 = vmax.f32 %v8463_v24, 0.0  ;;  %v10659_v41 = vmax.f32 %v8468_v18, 0.0  ;;  %v10660_v63 = vmax.f32 %v8473_v37, 0.0 }
 0x2e2   : > { %v10661_v14 = vmax.f32 %v8478_v49, 0.0  ;;  %v10662_v24 = vmax.f32 %v8483_v54, 0.0  ;;  %v10663_v18 = vmax.f32 %v8488_v11, 0.0  ;;  %v10664_v37 = vmax.f32 %v8493_v13, 0.0 }
 0x2e3   : > { %v8841_v52 = vpack.c.bf16 %v10658_v60, %v10658_v60  ;;  %v8846_v25 = vpack.c.bf16 %v10659_v41, %v10659_v41  ;;  %v8851_v53 = vpack.c.bf16 %v10660_v63, %v10660_v63  ;;  %v10665_v49 = vmax.f32 %v8498_v6, 0.0 }
 0x2e4   : > { %v8856_v40 = vpack.c.bf16 %v10661_v14, %v10661_v14  ;;  %v8861_v21 = vpack.c.bf16 %v10662_v24, %v10662_v24  ;;  %v8866_v1 = vpack.c.bf16 %v10663_v18, %v10663_v18  ;;  %v8871_v31 = vpack.c.bf16 %v10664_v37, %v10664_v37 }
 0x2e5   : > { %v8876_v3 = vpack.c.bf16 %v10665_v49, %v10665_v49  ;;  %v10666_v54 = vmax.f32 %v8505_v32, 0.0  ;;  %v10667_v11 = vmax.f32 %v8510_v42, 0.0  ;;  %v10668_v13 = vmax.f32 %v8527_v17, 0.0 }
 0x2e6   : > { %v10669_v6 = vmax.f32 %v8532_v10, 0.0  ;;  %v10670_v32 = vmax.f32 %v8537_v57, 0.0  ;;  %v10671_v42 = vmax.f32 %v8542_v7, 0.0  ;;  %v10672_v17 = vmax.f32 %v8547_v44, 0.0 }
 0x2e7   : > { %v8881_v20 = vpack.c.bf16 %v10666_v54, %v10666_v54  ;;  %v8886_v60 = vpack.c.bf16 %v10667_v11, %v10667_v11  ;;  %v8891_v41 = vpack.c.bf16 %v10668_v13, %v10668_v13  ;;  %v10673_v10 = vmax.f32 %v8552_v8, 0.0 }
 0x2e8   : > { %v8896_v63 = vpack.c.bf16 %v10669_v6, %v10669_v6  ;;  %v8901_v14 = vpack.c.bf16 %v10670_v32, %v10670_v32  ;;  %v8906_v24 = vpack.c.bf16 %v10671_v42, %v10671_v42  ;;  %v8911_v18 = vpack.c.bf16 %v10672_v17, %v10672_v17 }
 0x2e9   : > { %v8916_v37 = vpack.c.bf16 %v10673_v10, %v10673_v10  ;;  %v2413_v49 = vshrl.u32 %v5914_v38, 16  ;;  %v2416_v57 = vshll.u32 %v5914_v38, 16  ;;  %v2421_v54 = vshrl.u32 %v5915_v45, 16 }
 0x2ea   : > { %v2424_v11 = vshll.u32 %v5915_v45, 16  ;;  %v2430_v13 = vshrl.u32 %v5916_v27, 16  ;;  %v2433_v6 = vshll.u32 %v5916_v27, 16  ;;  %v2438_v7 = vshrl.u32 %v5917_v50, 16 }
 0x2eb   : > { %v2441_v32 = vshll.u32 %v5917_v50, 16  ;;  %v2415_v42 = vrot.slane %v2413_v49, 7  ;;  %v8918_v28 = vrot.slane %v2421_v54, 7  ;;  %v2447_v44 = vshrl.u32 %v8791_v22, 16  ;;  %v6745_v49 = vld [vmem:[#allocation3 + $0x168] sm:$0xff]  }
 0x2ec   : > { %v2450_v17 = vshll.u32 %v8791_v22, 16  ;;  %v2432_v61 = vrot.slane %v2430_v13, 7  ;;  %v8922_v8 = vrot.slane %v2438_v7, 7  ;;  %v2455_v10 = vshrl.u32 %v8796_v5, 16  ;;  %6308 = vmatprep.subr.bf16.mxu1 %v6745_v49 }
 0x2ed   : > { %v2458_v38 = vshll.u32 %v8796_v5, 16  ;;  %v8926_v59 = vor.u32 %v2416_v57, %v2415_v42  ;;  %v2419_v45 = vrot.slane %v2415_v42, 4  ;;  %v2426_v27 = vor.u32 %v2424_v11, %v8918_v28  ;;  %v6748_v42 = vld [vmem:[#allocation3 + $0x128] sm:$0xff]  }
 0x2ee   : > { %v8930_v54 = vor.u32 %v2433_v6, %v2432_v61  ;;  %v2436_v29 = vrot.slane %v2432_v61, 4  ;;  %v2443_v22 = vor.u32 %v2441_v32, %v8922_v8  ;;  %v2449_v39 = vrot.slane %v2447_v44, 7  ;;  %6309 = vmatpush3.bf16.msra.mxu1 %v6748_v42 }
 0x2ef   : > { %v2427_v7 = vsel %vm8514_vm8, %v2419_v45, %v2426_v27  ;;  %v8936_v5 = vrot.slane %v2455_v10, 7  ;;  %v2464_v57 = vshrl.u32 %v8801_v4, 16  ;;  %v2467_v6 = vshll.u32 %v8801_v4, 16 }
 0x2f0   : > { %v2444_v11 = vsel %vm8514_vm8, %v2436_v29, %v2443_v22  ;;  %v2472_v61 = vshrl.u32 %v8806_v34, 16  ;;  %v2475_v32 = vshll.u32 %v8806_v34, 16  ;;  %2737 = vst [vmem:[#allocation2 + $0x10] sm:$0xf] %v2427_v7  ;;  %v8944_v13 = vor.u32 %v2450_v17, %v2449_v39 }
 0x2f1   : > { %v2453_v45 = vrot.slane %v2449_v39, 4  ;;  %v2460_v44 = vor.u32 %v2458_v38, %v8936_v5  ;;  %2744 = vst [vmem:[#allocation2 + $0x1c] sm:$0xf] %v2444_v11  ;;  %v2466_v27 = vrot.slane %v2464_v57, 7  ;;  %v2481_v29 = vshrl.u32 %v8811_v56, 16 }
 0x2f2   : > { %v8948_v49 = vrot.slane %v2472_v61, 7  ;;  %v2484_v4 = vshll.u32 %v8811_v56, 16  ;;  %v2489_v17 = vshrl.u32 %v8816_v58, 16  ;;  %v2492_v39 = vshll.u32 %v8816_v58, 16 }
 0x2f3   : > { %v2461_v34 = vsel %vm8514_vm8, %v2453_v45, %v2460_v44  ;;  %v2498_v38 = vshrl.u32 %v8821_v23, 16  ;;  %v8957_v22 = vor.u32 %v2467_v6, %v2466_v27  ;;  %v2470_v7 = vrot.slane %v2466_v27, 4 }
 0x2f4   : > { %v2477_v57 = vor.u32 %v2475_v32, %v8948_v49  ;;  %2751 = vst [vmem:[#allocation2 + $0x28] sm:$0xf] %v2461_v34  ;;  %v2483_v61 = vrot.slane %v2481_v29, 7  ;;  %v8961_v56 = vrot.slane %v2489_v17, 7  ;;  %v2501_v45 = vshll.u32 %v8821_v23, 16 }
 0x2f5   : > { %v2500_v42 = vrot.slane %v2498_v38, 7  ;;  %v2506_v58 = vshrl.u32 %v8826_v0, 16  ;;  %v2509_v6 = vshll.u32 %v8826_v0, 16  ;;  %v2515_v27 = vshrl.u32 %v8831_v2, 16 }
 0x2f6   : > { %v2478_v44 = vsel %vm8514_vm8, %v2470_v7, %v2477_v57  ;;  %v8969_v10 = vor.u32 %v2484_v4, %v2483_v61  ;;  %v2487_v32 = vrot.slane %v2483_v61, 4  ;;  %v2494_v34 = vor.u32 %v2492_v39, %v8961_v56 }
 0x2f7   : > { %2758 = vst [vmem:[#allocation2 + $0x34] sm:$0xf] %v2478_v44  ;;  %v8973_v17 = vor.u32 %v2501_v45, %v2500_v42  ;;  %v2504_v23 = vrot.slane %v2500_v42, 4  ;;  %v8975_v38 = vrot.slane %v2506_v58, 7  ;;  %v2517_v7 = vrot.slane %v2515_v27, 7 }
 0x2f8   : > { %v2495_v57 = vsel %vm8514_vm8, %v2487_v32, %v2494_v34  ;;  %v2518_v0 = vshll.u32 %v8831_v2, 16  ;;  %v2523_v4 = vshrl.u32 %v8836_v36, 16  ;;  %v2526_v61 = vshll.u32 %v8836_v36, 16 }
 0x2f9   : > { %v2511_v39 = vor.u32 %v2509_v6, %v8975_v38  ;;  %v2521_v44 = vrot.slane %v2517_v7, 4  ;;  %v2532_v45 = vshrl.u32 %v8841_v52, 16  ;;  %2765 = vst [vmem:[#allocation2 + $0x40] sm:$0xf] %v2495_v57  ;;  %v2535_v27 = vshll.u32 %v8841_v52, 16  ;;  %v6751_v52 = vld [vmem:[#allocation3 + $0x170] sm:$0xff]  }
 0x2fa   : > { %v8985_v42 = vor.u32 %v2518_v0, %v2517_v7  ;;  %v8987_v58 = vrot.slane %v2523_v4, 7  ;;  %v2540_v2 = vshrl.u32 %v8846_v25, 16  ;;  %v2543_v6 = vshll.u32 %v8846_v25, 16  ;;  %6310 = vmatprep.subr.bf16.mxu1 %v6751_v52 }
 0x2fb   : > { %v2512_v32 = vsel %vm8514_vm8, %v2504_v23, %v2511_v39  ;;  %v2534_v36 = vrot.slane %v2532_v45, 7  ;;  %v2549_v34 = vshrl.u32 %v8851_v53, 16  ;;  %v2552_v0 = vshll.u32 %v8851_v53, 16 }
 0x2fc   : > { %v2528_v29 = vor.u32 %v2526_v61, %v8987_v58  ;;  %v8997_v7 = vrot.slane %v2540_v2, 7  ;;  %2772 = vst [vmem:[#allocation2 + $0x4c] sm:$0xf] %v2512_v32  ;;  %v2557_v23 = vshrl.u32 %v8856_v40, 16  ;;  %v2560_v45 = vshll.u32 %v8856_v40, 16 }
 0x2fd   : > { %v9000_v4 = vor.u32 %v2535_v27, %v2534_v36  ;;  %v2538_v11 = vrot.slane %v2534_v36, 4  ;;  %v2551_v50 = vrot.slane %v2549_v34, 7  ;;  %v2566_v27 = vshrl.u32 %v8861_v21, 16  ;;  %v6754_v36 = vld [vmem:[#allocation3 + $0x130] sm:$0xff]  }
 0x2fe   : > { %v2529_v25 = vsel %vm8514_vm8, %v2521_v44, %v2528_v29  ;;  %v2545_v39 = vor.u32 %v2543_v6, %v8997_v7  ;;  %v9010_v32 = vrot.slane %v2557_v23, 7  ;;  %v2569_v29 = vshll.u32 %v8861_v21, 16  ;;  %6311 = vmatpush3.bf16.msra.mxu1 %v6754_v36 }
 0x2ff   : > { %v9008_v2 = vor.u32 %v2552_v0, %v2551_v50  ;;  %v2555_v53 = vrot.slane %v2551_v50, 4  ;;  %2779 = vst [vmem:[#allocation2 + $0x58] sm:$0xf] %v2529_v25  ;;  %v2574_v44 = vshrl.u32 %v8866_v1, 16  ;;  %v2577_v6 = vshll.u32 %v8866_v1, 16 }
 0x300   : > { %v2546_v34 = vsel %vm8514_vm8, %v2538_v11, %v2545_v39  ;;  %v2562_v40 = vor.u32 %v2560_v45, %v9010_v32  ;;  %v2568_v0 = vrot.slane %v2566_v27, 7  ;;  %v2583_v52 = vshrl.u32 %v8871_v31, 16 }
 0x301   : > { %2786 = vst [vmem:[#allocation2 + $0x64] sm:$0xf] %v2546_v34  ;;  %v9021_v23 = vrot.slane %v2574_v44, 7  ;;  %v2586_v11 = vshll.u32 %v8871_v31, 16  ;;  %v2591_v21 = vshrl.u32 %v8876_v3, 16  ;;  %v2594_v25 = vshll.u32 %v8876_v3, 16 }
 0x302   : > { %v2563_v1 = vsel %vm8514_vm8, %v2555_v53, %v2562_v40  ;;  %v9028_v39 = vor.u32 %v2569_v29, %v2568_v0  ;;  %v2572_v45 = vrot.slane %v2568_v0, 4  ;;  %v2585_v50 = vrot.slane %v2583_v52, 7 }
 0x303   : > { %v2579_v27 = vor.u32 %v2577_v6, %v9021_v23  ;;  %v9032_v36 = vrot.slane %v2591_v21, 7  ;;  %v2600_v44 = vshrl.u32 %v8881_v20, 16  ;;  %2793 = vst [vmem:[#allocation2 + $0x70] sm:$0xf] %v2563_v1  ;;  %v2603_v3 = vshll.u32 %v8881_v20, 16 }
 0x304   : > { %v9035_v31 = vor.u32 %v2586_v11, %v2585_v50  ;;  %v2589_v61 = vrot.slane %v2585_v50, 4  ;;  %v2608_v53 = vshrl.u32 %v8886_v60, 16  ;;  %v2611_v21 = vshll.u32 %v8886_v60, 16  ;;  %v2734_v6 = vld [vmem:[#allocation2 + $0xc] sm:$0xf] }
 0x305   : > { %v2580_v29 = vsel %vm8514_vm8, %v2572_v45, %v2579_v27  ;;  %v2596_v40 = vor.u32 %v2594_v25, %v9032_v36  ;;  %v2602_v0 = vrot.slane %v2600_v44, 7  ;;  %v2617_v11 = vshrl.u32 %v8891_v41, 16  ;;  %v2769_v44 = vld [vmem:[#allocation2 + $0x48] sm:$0xf] }
 0x306   : > { %v9043_v52 = vrot.slane %v2608_v53, 7  ;;  %v2620_v50 = vshll.u32 %v8891_v41, 16  ;;  %2800 = vst [vmem:[#allocation2 + $0x7c] sm:$0xf] %v2580_v29  ;;  %v2625_v25 = vshrl.u32 %v8896_v63, 16  ;;  %v2628_v60 = vshll.u32 %v8896_v63, 16 }
 0x307   : > { %v2597_v20 = vsel %vm8514_vm8, %v2589_v61, %v2596_v40  ;;  %v9050_v1 = vor.u32 %v2603_v3, %v2602_v0  ;;  %v2606_v45 = vrot.slane %v2602_v0, 4  ;;  %v2619_v53 = vrot.slane %v2617_v11, 7  ;;  %v2738_v29 = vld [vmem:[#allocation2 + $0x14] sm:$0x1]  ;;  %v2741_v40 = vld [vmem:[#allocation2 + $0x18] sm:$0xf] }
 0x308   : > { %v2613_v27 = vor.u32 %v2611_v21, %v9043_v52  ;;  %2807 = vst [vmem:[#allocation2 + $0x88] sm:$0xf] %v2597_v20  ;;  %v9056_v34 = vrot.slane %v2625_v25, 7  ;;  %v2634_v41 = vshrl.u32 %v8901_v14, 16  ;;  %v2637_v61 = vshll.u32 %v8901_v14, 16 }
 0x309   : > { %v2642_v3 = vshrl.u32 %v8906_v24, 16  ;;  %v9063_v21 = vor.u32 %v2620_v50, %v2619_v53  ;;  %v2623_v11 = vrot.slane %v2619_v53, 4  ;;  %v2645_v63 = vshll.u32 %v8906_v24, 16  ;;  %v2745_v25 = vld [vmem:[#allocation2 + $0x20] sm:$0x1]  ;;  %v6759_v50 = vld [vmem:[#allocation3 + $0x178] sm:$0xff]  }
 0x30a   : > { %v2614_v0 = vsel %vm8514_vm8, %v2606_v45, %v2613_v27  ;;  %v2630_v14 = vor.u32 %v2628_v60, %v9056_v34  ;;  %v2636_v57 = vrot.slane %v2634_v41, 7  ;;  %v2748_v45 = vld [vmem:[#allocation2 + $0x24] sm:$0xf]  ;;  %v2752_v27 = vld [vmem:[#allocation2 + $0x2c] sm:$0x1]  ;;  %v2651_v16 = vshrl.u32 %v8911_v18, 16  ;;  %6312 = vmatprep.subr.bf16.mxu1 %v6759_v50 }
 0x30b   : > { %v9074_v48 = vrot.slane %v2642_v3, 7  ;;  %2814 = vst [vmem:[#allocation2 + $0x94] sm:$0xf] %v2614_v0  ;;  %v2755_v53 = vld [vmem:[#allocation2 + $0x30] sm:$0xf]  ;;  %v2654_v30 = vshll.u32 %v8911_v18, 16 }
 0x30c   : > { %v2759_v24 = vld [vmem:[#allocation2 + $0x38] sm:$0x1]  ;;  %v2659_v55 = vshrl.u32 %v8916_v37, 16  ;;  %v2662_v12 = vshll.u32 %v8916_v37, 16  ;;  %v2762_v60 = vld [vmem:[#allocation2 + $0x3c] sm:$0xf]  ;;  %v2631_v41 = vsel %vm8514_vm8, %v2623_v11, %v2630_v14  ;;  %v9082_v3 = vor.u32 %v2637_v61, %v2636_v57 }
 0x30d   : > { %v2640_v0 = vrot.slane %v2636_v57, 4  ;;  %v2647_v19 = vor.u32 %v2645_v63, %v9074_v48  ;;  %v2653_v15 = vrot.slane %v2651_v16, 7  ;;  %v2735_v37 = vsel %vm9068_vm10, %v8926_v59, %v2734_v6  ;;  %2821 = vst [vmem:[#allocation2 + $0xa0] sm:$0xf] %v2631_v41  ;;  %v6762_v11 = vld [vmem:[#allocation3 + $0x138] sm:$0xff]  }
 0x30e   : > { %v9086_v46 = vrot.slane %v2659_v55, 7  ;;  %v2783_v61 = vld [vmem:[#allocation2 + $0x60] sm:$0xf]  ;;  %v2787_v14 = vld [vmem:[#allocation2 + $0x68] sm:$0x1]  ;;  %v10676_v50 = vrot.slane %v8918_v28, 4  ;;  %v2742_v55 = vsel %vm9068_vm10, %v8930_v54, %v2741_v40  ;;  %6313 = vmatpush3.bf16.msra.mxu1 %v6762_v11  ;;  %v2749_v40 = vsel %vm9068_vm10, %v8944_v13, %v2748_v45 }
 0x30f   : > { %v2790_v57 = vld [vmem:[#allocation2 + $0x6c] sm:$0xf]  ;;  %v2648_v63 = vsel %vm8514_vm8, %v2640_v0, %v2647_v19  ;;  %2736 = vst [vmem:[#allocation2 + $0xc] sm:$0xf] %v2735_v37  ;;  %v10677_v59 = vrot.slane %v8922_v8, 4  ;;  %v9104_v33 = vor.u32 %v2654_v30, %v2653_v15  ;;  %v2657_v19 = vrot.slane %v2653_v15, 4 }
 0x310   : > { %v2739_v16 = vsel %vm7663_vm2, %v10676_v50, %v2738_v29  ;;  %v2794_v41 = vld [vmem:[#allocation2 + $0x74] sm:$0x1]  ;;  %v2797_v18 = vld [vmem:[#allocation2 + $0x78] sm:$0xf]  ;;  %v2664_v0 = vor.u32 %v2662_v12, %v9086_v46  ;;  %v2666_v28 = vrot.slane %v9086_v46, 4  ;;  %v10678_v30 = vrot.slane %v8936_v5, 4 }
 0x311   : > { %v2746_v6 = vsel %vm7663_vm2, %v10677_v59, %v2745_v25  ;;  %2740 = vst [vmem:[#allocation2 + $0x14] sm:$0x1] %v2739_v16  ;;  %2743 = vst [vmem:[#allocation2 + $0x18] sm:$0xf] %v2742_v55  ;;  %v2801_v54 = vld [vmem:[#allocation2 + $0x80] sm:$0x1]  ;;  %v2756_v12 = vsel %vm9068_vm10, %v8957_v22, %v2755_v53  ;;  %v2763_v5 = vsel %vm9068_vm10, %v8969_v10, %v2762_v60 }
 0x312   : > { %2747 = vst [vmem:[#allocation2 + $0x20] sm:$0x1] %v2746_v6  ;;  %2828 = vst [vmem:[#allocation2 + $0xac] sm:$0xf] %v2648_v63  ;;  %v2818_v29 = vld [vmem:[#allocation2 + $0x9c] sm:$0xf]  ;;  %v2753_v15 = vsel %vm7663_vm2, %v10678_v30, %v2752_v27  ;;  %v2665_v13 = vsel %vm8514_vm8, %v2657_v19, %v2664_v0  ;;  %v2770_v45 = vsel %vm9068_vm10, %v8973_v17, %v2769_v44 }
 0x313   : > { %v2822_v8 = vld [vmem:[#allocation2 + $0xa4] sm:$0x1]  ;;  %v10679_v25 = vrot.slane %v8948_v49, 4  ;;  %v2808_v63 = vld [vmem:[#allocation2 + $0x8c] sm:$0x1]  ;;  %v10680_v22 = vrot.slane %v8961_v56, 4  ;;  %v2777_v56 = vsel %vm9068_vm10, %v8985_v42, %v2776_v26  ;;  %v2784_v44 = vsel %vm9068_vm10, %v9000_v4, %v2783_v61 }
 0x314   : > { %v2804_v11 = vld [vmem:[#allocation2 + $0x84] sm:$0xf]  ;;  %v2811_v50 = vld [vmem:[#allocation2 + $0x90] sm:$0xf]  ;;  %2750 = vst [vmem:[#allocation2 + $0x24] sm:$0xf] %v2749_v40  ;;  %v2798_v4 = vsel %vm9068_vm10, %v9028_v39, %v2797_v18 }
 0x315   : > { %v2760_v37 = vsel %vm7663_vm2, %v10679_v25, %v2759_v24  ;;  %2754 = vst [vmem:[#allocation2 + $0x2c] sm:$0x1] %v2753_v15  ;;  %2757 = vst [vmem:[#allocation2 + $0x30] sm:$0xf] %v2756_v12  ;;  %v2767_v49 = vsel %vm7663_vm2, %v10680_v22, %v2766_v51  ;;  %v2825_v27 = vld [vmem:[#allocation2 + $0xa8] sm:$0xf]  ;;  %v2812_v39 = vsel %vm9068_vm10, %v9050_v1, %v2811_v50 }
 0x316   : > { %2761 = vst [vmem:[#allocation2 + $0x38] sm:$0x1] %v2760_v37  ;;  %v2815_v53 = vld [vmem:[#allocation2 + $0x98] sm:$0x1]  ;;  %2764 = vst [vmem:[#allocation2 + $0x3c] sm:$0xf] %v2763_v5  ;;  %v2826_v55 = vsel %vm9068_vm10, %v9082_v3, %v2825_v27 }
 0x317   : > { %2768 = vst [vmem:[#allocation2 + $0x44] sm:$0x1] %v2767_v49  ;;  %2771 = vst [vmem:[#allocation2 + $0x48] sm:$0xf] %v2770_v45  ;;  %v10681_v24 = vrot.slane %v8975_v38, 4  ;;  %v10682_v51 = vrot.slane %v8987_v58, 4 }
 0x318   : > { %2835 = vst [vmem:[#allocation2 + $0xb8] sm:$0xf] %v2665_v13  ;;  %v2832_v60 = vld [vmem:[#allocation2 + $0xb4] sm:$0xf]  ;;  %v2836_v16 = vld [vmem:[#allocation2 + $0xbc] sm:$0x1] }
 0x319   : > { %v2774_v10 = vsel %vm7663_vm2, %v10681_v24, %v2773_v47  ;;  %v2781_v17 = vsel %vm7663_vm2, %v10682_v51, %v2780_v62  ;;  %v2839_v38 = vld [vmem:[#allocation2 + $0xc0] sm:$0xf]  ;;  %2778 = vst [vmem:[#allocation2 + $0x54] sm:$0xf] %v2777_v56  ;;  %2785 = vst [vmem:[#allocation2 + $0x60] sm:$0xf] %v2784_v44  ;;  %v2791_v62 = vsel %vm9068_vm10, %v9008_v2, %v2790_v57 }
 0x31a   : > { %2775 = vst [vmem:[#allocation2 + $0x50] sm:$0x1] %v2774_v10  ;;  %2782 = vst [vmem:[#allocation2 + $0x5c] sm:$0x1] %v2781_v17  ;;  %v10683_v47 = vrot.slane %v8997_v7, 4  ;;  %v10684_v42 = vrot.slane %v9010_v32, 4  ;;  %v2805_v2 = vsel %vm9068_vm10, %v9035_v31, %v2804_v11  ;;  %v2837_v3 = vsel %vm7663_vm2, %v2666_v28, %v2836_v16 }
 0x31b   : > { %2792 = vst [vmem:[#allocation2 + $0x6c] sm:$0xf] %v2791_v62  ;;  %2799 = vst [vmem:[#allocation2 + $0x78] sm:$0xf] %v2798_v4  ;;  %v10685_v7 = vrot.slane %v9021_v23, 4  ;;  %v10686_v32 = vrot.slane %v9032_v36, 4  ;;  %v2819_v36 = vsel %vm9068_vm10, %v9063_v21, %v2818_v29  ;;  %v2833_v21 = vsel %vm9068_vm10, %v9104_v33, %v2832_v60 }
 0x31c   : > { %v2788_v26 = vsel %vm7663_vm2, %v10683_v47, %v2787_v14  ;;  %v2795_v58 = vsel %vm7663_vm2, %v10684_v42, %v2794_v41  ;;  %v9176_v18 = vld [vmem:[#allocation2 + $0x10] sm:$0xf]  ;;  %2806 = vst [vmem:[#allocation2 + $0x84] sm:$0xf] %v2805_v2  ;;  %2813 = vst [vmem:[#allocation2 + $0x90] sm:$0xf] %v2812_v39  ;;  %v2840_v41 = vsel %vm9068_vm10, %v8554_v35, %v2839_v38 }
 0x31d   : > { %2789 = vst [vmem:[#allocation2 + $0x68] sm:$0x1] %v2788_v26  ;;  %2796 = vst [vmem:[#allocation2 + $0x74] sm:$0x1] %v2795_v58  ;;  %v2802_v61 = vsel %vm7663_vm2, %v10685_v7, %v2801_v54  ;;  %v2809_v14 = vsel %vm7663_vm2, %v10686_v32, %v2808_v63  ;;  %v10687_v23 = vrot.slane %v9043_v52, 4  ;;  %v10688_v57 = vrot.slane %v9056_v34, 4 }
 0x31e   : > { %2803 = vst [vmem:[#allocation2 + $0x80] sm:$0x1] %v2802_v61  ;;  %2810 = vst [vmem:[#allocation2 + $0x8c] sm:$0x1] %v2809_v14  ;;  %v9192_v59 = vld [vmem:[#allocation2 + $0xc] sm:$0xf] }
 0x31f   : > { %v2816_v31 = vsel %vm7663_vm2, %v10687_v23, %v2815_v53  ;;  %v2823_v1 = vsel %vm7663_vm2, %v10688_v57, %v2822_v8  ;;  %v9194_v6 = vld [vmem:[#allocation2 + $0x1c] sm:$0xf]  ;;  %2820 = vst [vmem:[#allocation2 + $0x9c] sm:$0xf] %v2819_v36  ;;  %2827 = vst [vmem:[#allocation2 + $0xa8] sm:$0xf] %v2826_v55  ;;  %v9217_v9 = vcombine.low %v9192_v59, %v9176_v18 }
 0x320   : > { %2817 = vst [vmem:[#allocation2 + $0x98] sm:$0x1] %v2816_v31  ;;  %2824 = vst [vmem:[#allocation2 + $0xa4] sm:$0x1] %v2823_v1  ;;  %v10689_v52 = vrot.slane %v9074_v48, 4  ;;  %v2925_v48 = vshrl.u32 %v9192_v59, 16 }
 0x321   : > { %v9210_v19 = vld [vmem:[#allocation2 + $0x18] sm:$0xf]  ;;  %2834 = vst [vmem:[#allocation2 + $0xb4] sm:$0xf] %v2833_v21  ;;  %2838 = vst [vmem:[#allocation2 + $0xbc] sm:$0x1] %v2837_v3  ;;  %4497 = vmatprep.mubr.bf16.mxu0 %v9217_v9 }
 0x322   : > { %v2830_v34 = vsel %vm7663_vm2, %v10689_v52, %v2829_v43  ;;  %2841 = vst [vmem:[#allocation2 + $0xc0] sm:$0xf] %v2840_v41  ;;  %v2928_v0 = vshll.u32 %v9192_v59, 16  ;;  %v2938_v33 = vshrl.u32 %v9176_v18, 16  ;;  %v2851_v46 = vld [vmem:[#allocation2 + $0x14] sm:$0x1]  ;;  %v9222_v20 = vcombine.low %v9210_v19, %v9194_v6 }
 0x323   : > { %2831 = vst [vmem:[#allocation2 + $0xb0] sm:$0x1] %v2830_v34  ;;  %v6743_v28 = vld [vmem:[#allocation3 + $0x180] sm:$0xff]   ;;  %v2949_v35 = vshrl.u32 %v9210_v19, 16  ;;  %v6746_v54 = vld [vmem:[#allocation3 + $0x1c8] sm:$0xff]   ;;  %v2927_v29 = vrot.slane %v2925_v48, 4 }
 0x324   : > { %v2930_v8 = vrot.slane %v2928_v0, 5  ;;  %v2934_v40 = vshll.u32 %v9176_v18, 16  ;;  %v2940_v30 = vrot.slane %v2938_v33, 4  ;;  %v9226_v15 = vld [vmem:[#allocation2 + $0x24] sm:$0xf]  ;;  %v10691_v25 = vld [vmem:[#allocation39_spill] sm:$0xff] }
 0x325   : > { %v10690_v12 = vld [vmem:[#allocation38_spill] sm:$0xff]  ;;  %v2952_v11 = vshll.u32 %v9210_v19, 16  ;;  %v2962_v63 = vshrl.u32 %v9194_v6, 16  ;;  %v2944_v50 = vshll.u32 %v2851_v46, 16  ;;  %v3341_v13 = vrot.slane %v9176_v18, 5  ;;  %v6752_v27 = vld [vmem:[#allocation3 + $0x1d0] sm:$0xff]  }
 0x326   : > { %v10692_v37 = vcombine.low %v10690_v12, %v10691_v25  ;;  %v2931_v5 = vor.u32 %v2930_v8, %v2927_v29  ;;  %v2936_v22 = vrot.slane %v2934_v40, 5  ;;  %v5734_v49 = vrot.slane %v9192_v59, 9  ;;  %v6749_v45 = vld [vmem:[#allocation3 + $0x188] sm:$0xff]   ;;  %v6770_v43 = vld [vmem:[#allocation3 + $0x200] sm:$0xff]   ;;  %v9240_v26 = vld [vmem:[#allocation2 + $0x28] sm:$0xf] }
 0x327   : > { %v3343_v53 = vrot.slane %v3341_v13, 4  ;;  %v3344_v24 = vrot.slane %v2851_v46, 5  ;;  %v2973_v10 = vshrl.u32 %v9226_v15, 16  ;;  %v2976_v56 = vshll.u32 %v9226_v15, 16  ;;  %v2854_v51 = vld [vmem:[#allocation2 + $0x20] sm:$0x1]  ;;  %6546 = vmatprep.subr.bf16.mxu1 %v6770_v43 }
 0x328   : > { %4498 = vmatmul.mubr.bf16.vlgmr.msra.gmra.mrb[48].mxu0 %v10692_v37  ;;  %v2932_v17 = vrot.slane %v2931_v5, 4  ;;  %v2941_v44 = vor.u32 %v2940_v30, %v2936_v22  ;;  %v2946_v60 = vrot.slane %v2944_v50, 5  ;;  %v2951_v16 = vrot.slane %v2949_v35, 4  ;;  %v6755_v14 = vld [vmem:[#allocation3 + $0x190] sm:$0xff]   ;;  %v9250_v36 = vld [vmem:[#allocation2 + $0x30] sm:$0xf] }
 0x329   : > { %4505 = vmatprep.mubr.bf16.mxu0 %v9222_v20  ;;  %6411 = vmatpush3.bf16.msra.mxu0 %v6743_v28  ;;  %v3345_v47 = vsel %vm7041_vm4, %v3343_v53, %v3344_v24  ;;  %v2954_v62 = vrot.slane %v2952_v11, 5  ;;  %v2958_v42 = vshll.u32 %v9194_v6, 16  ;;  %v2964_v58 = vrot.slane %v2962_v63, 4  ;;  %v6757_v57 = vld [vmem:[#allocation3 + $0x1d8] sm:$0xff]   ;;  %v2857_v46 = vld [vmem:[#allocation2 + $0x2c] sm:$0x1] }
 0x32a   : > { %6412 = vmatprep.subr.bf16.mxu0 %v6746_v54  ;;  %v2937_v7 = vsel %vm7080_vm5, %v2932_v17, %v2936_v22  ;;  %v2942_v61 = vrot.slane %v2941_v44, 4  ;;  %v3342_v2 = vsel %vm7041_vm4, %v5734_v49, %v3341_v13  ;;  %v2968_v32 = vshll.u32 %v2854_v51, 16  ;;  %v6758_v3 = vld [vmem:[#allocation3 + $0x198] sm:$0xff]   ;;  %v6760_v8 = vld [vmem:[#allocation3 + $0x1e0] sm:$0xff]   ;;  %v6764_v43 = vld [vmem:[#allocation3 + $0x1e8] sm:$0xff]  }
 0x32b   : > { %v9247_v39 = vcombine.low %v3342_v2, %v3345_v47  ;;  %v2955_v18 = vor.u32 %v2954_v62, %v2951_v16  ;;  %v2960_v23 = vrot.slane %v2958_v42, 5  ;;  %v3348_v31 = vrot.slane %v9194_v6, 5  ;;  %v9268_v35 = vld [vmem:[#allocation2 + $0x34] sm:$0xf]  ;;  %v6763_v49 = vld [vmem:[#allocation3 + $0x1a0] sm:$0xff]  }
 0x32c   : > { %v2947_v1 = vsel %vm7080_vm5, %v2942_v61, %v2946_v60  ;;  %v2986_v55 = vshrl.u32 %v9240_v26, 16  ;;  %v9257_v59 = vcombine.low %v9226_v15, %v9240_v26  ;;  %v5735_v52 = vrot.slane %v9210_v19, 9  ;;  %v9293_v17 = vld [vmem:[#allocation2 + $0x38] sm:$0x1]  ;;  %v9299_v42 = vld [vmem:[#allocation2 + $0x40] sm:$0xf] }
 0x32d   : > { %6413 = vmatpush3.bf16.msra.mxu0 %v6749_v45  ;;  %v9260_v34 = vcombine.low %v2937_v7, %v2947_v1  ;;  %v2956_v6 = vrot.slane %v2955_v18, 4  ;;  %v2965_v21 = vor.u32 %v2964_v58, %v2960_v23  ;;  %v2970_v41 = vrot.slane %v2968_v32, 5  ;;  %v6765_v7 = vld [vmem:[#allocation3 + $0x1a8] sm:$0xff]   ;;  %v6766_v18 = vld [vmem:[#allocation3 + $0x1f0] sm:$0xff]  }
 0x32e   : > { %6414 = vmatprep.subr.bf16.mxu0 %v6752_v27  ;;  %v3350_v48 = vrot.slane %v3348_v31, 4  ;;  %v3351_v0 = vrot.slane %v2854_v51, 5  ;;  %v2997_v33 = vshrl.u32 %v9250_v36, 16  ;;  %v2975_v54 = vrot.slane %v2973_v10, 4  ;;  %v9291_v51 = vld [vmem:[#allocation2 + $0x3c] sm:$0xf] }
 0x32f   : > { %4344 = vmatprep.mubr.bf16.mxu1 %v9260_v34  ;;  %v2961_v19 = vsel %vm7080_vm5, %v2956_v6, %v2960_v23  ;;  %v2966_v28 = vrot.slane %v2965_v21, 4  ;;  %v2978_v29 = vrot.slane %v2976_v56, 5  ;;  %v3349_v40 = vsel %vm7041_vm4, %v5735_v52, %v3348_v31 }
 0x330   : > { %4506 = vmatmul.mubr.bf16.gmra.mrb[52].mxu0 %v9247_v39  ;;  %4345 = vmatmul.mubr.bf16.gmra.mrb[20].mxu1 %v9217_v9  ;;  %v3352_v30 = vsel %vm7041_vm4, %v3350_v48, %v3351_v0  ;;  %v2982_v12 = vshll.u32 %v9240_v26, 16  ;;  %v2988_v25 = vrot.slane %v2986_v55, 4  ;;  %v3000_v11 = vshll.u32 %v9250_v36, 16  ;;  %v9322_v0 = vld [vmem:[#allocation2 + $0x48] sm:$0xf] }
 0x331   : > { %4513 = vmatprep.mubr.bf16.mxu0 %v9257_v59  ;;  %6415 = vmatpush3.bf16.msra.mxu0 %v6755_v14  ;;  %v2971_v37 = vsel %vm7080_vm5, %v2966_v28, %v2970_v41  ;;  %v2979_v63 = vor.u32 %v2978_v29, %v2975_v54  ;;  %v2992_v50 = vshll.u32 %v2857_v46, 16  ;;  %v3010_v9 = vshrl.u32 %v9268_v35, 16  ;;  %v2863_v54 = vld [vmem:[#allocation2 + $0x44] sm:$0x1] }
 0x332   : > { %6416 = vmatprep.subr.bf16.mxu0 %v6757_v57  ;;  %v9279_v13 = vcombine.low %v2961_v19, %v2971_v37  ;;  %v2984_v5 = vrot.slane %v2982_v12, 5  ;;  %v3355_v22 = vrot.slane %v9240_v26, 5  ;;  %v9283_v45 = vcombine.low %v3349_v40, %v3352_v30  ;;  %v9328_v30 = vld [vmem:[#allocation2 + $0x4c] sm:$0xf] }
 0x333   : > { %v2980_v27 = vrot.slane %v2979_v63, 4  ;;  %v9288_v53 = vcombine.low %v9250_v36, %v9268_v35  ;;  %v5736_v10 = vrot.slane %v9226_v15, 9  ;;  %v2994_v44 = vrot.slane %v2992_v50, 5 }
 0x334   : > { %4352 = vmatprep.mubr.bf16.mxu1 %v9279_v13  ;;  %v2989_v24 = vor.u32 %v2988_v25, %v2984_v5  ;;  %v3357_v56 = vrot.slane %v3355_v22, 4  ;;  %v3358_v60 = vrot.slane %v2857_v46, 5  ;;  %v2999_v16 = vrot.slane %v2997_v33, 4  ;;  %v6767_v33 = vld [vmem:[#allocation3 + $0x1b0] sm:$0xff]   ;;  %v6768_v46 = vld [vmem:[#allocation3 + $0x1f8] sm:$0xff]  }
 0x335   : > { %6417 = vmatpush3.bf16.msra.mxu0 %v6758_v3  ;;  %v3002_v47 = vrot.slane %v3000_v11, 5  ;;  %v2985_v26 = vsel %vm7080_vm5, %v2980_v27, %v2984_v5  ;;  %v3006_v15 = vshll.u32 %v9268_v35, 16  ;;  %v3012_v58 = vrot.slane %v3010_v9, 4 }
 0x336   : > { %6418 = vmatprep.subr.bf16.mxu0 %v6760_v8  ;;  %v2990_v62 = vrot.slane %v2989_v24, 4  ;;  %v3359_v61 = vsel %vm7041_vm4, %v3357_v56, %v3358_v60  ;;  %v3021_v2 = vshrl.u32 %v9291_v51, 16  ;;  %v3016_v14 = vshll.u32 %v9293_v17, 16 }
 0x337   : > { %v3003_v32 = vor.u32 %v3002_v47, %v2999_v16  ;;  %v3024_v31 = vshll.u32 %v9291_v51, 16  ;;  %v3008_v57 = vrot.slane %v3006_v15, 5  ;;  %v3362_v1 = vrot.slane %v9268_v35, 5  ;;  %v9356_v15 = vld [vmem:[#allocation2 + $0x58] sm:$0xf] }
 0x338   : > { %4514 = vmatmul.mubr.bf16.gmra.mrb[56].mxu0 %v9283_v45  ;;  %4353 = vmatmul.mubr.bf16.gmra.mrb[24].mxu1 %v9222_v20  ;;  %v2995_v23 = vsel %vm7080_vm5, %v2990_v62, %v2994_v44  ;;  %v3356_v52 = vsel %vm7041_vm4, %v5736_v10, %v3355_v22  ;;  %v3034_v6 = vshrl.u32 %v9299_v42, 16  ;;  %v9320_v41 = vcombine.low %v9291_v51, %v9299_v42  ;;  %v9345_v44 = vld [vmem:[#allocation2 + $0x54] sm:$0xf] }
 0x339   : > { %4521 = vmatprep.mubr.bf16.mxu0 %v9288_v53  ;;  %6419 = vmatpush3.bf16.msra.mxu0 %v6763_v49  ;;  %v9311_v55 = vcombine.low %v2985_v26, %v2995_v23  ;;  %v3004_v21 = vrot.slane %v3003_v32, 4  ;;  %v9316_v3 = vcombine.low %v3356_v52, %v3359_v61  ;;  %v3013_v48 = vor.u32 %v3012_v58, %v3008_v57  ;;  %v6769_v49 = vld [vmem:[#allocation3 + $0x1b8] sm:$0xff]  }
 0x33a   : > { %6420 = vmatprep.subr.bf16.mxu0 %v6764_v43  ;;  %v3018_v19 = vrot.slane %v3016_v14, 5  ;;  %v5737_v28 = vrot.slane %v9250_v36, 9  ;;  %v3364_v35 = vrot.slane %v3362_v1, 4  ;;  %v3023_v29 = vrot.slane %v3021_v2, 4  ;;  %v2866_v2 = vld [vmem:[#allocation2 + $0x50] sm:$0x1] }
 0x33b   : > { %4360 = vmatprep.mubr.bf16.mxu1 %v9311_v55  ;;  %v3009_v8 = vsel %vm7080_vm5, %v3004_v21, %v3008_v57  ;;  %v3014_v40 = vrot.slane %v3013_v48, 4  ;;  %v3026_v12 = vrot.slane %v3024_v31, 5  ;;  %v3030_v25 = vshll.u32 %v9299_v42, 16 }
 0x33c   : > { %v3365_v37 = vrot.slane %v9293_v17, 5  ;;  %v3045_v11 = vshrl.u32 %v9322_v0, 16  ;;  %v3048_v36 = vshll.u32 %v9322_v0, 16  ;;  %v3036_v63 = vrot.slane %v3034_v6, 4 }
 0x33d   : > { %6421 = vmatpush3.bf16.msra.mxu0 %v6765_v7  ;;  %v3019_v50 = vsel %vm7080_vm5, %v3014_v40, %v3018_v19  ;;  %v3027_v9 = vor.u32 %v3026_v12, %v3023_v29  ;;  %v3032_v5 = vrot.slane %v3030_v25, 5  ;;  %v3040_v22 = vshll.u32 %v2863_v54, 16  ;;  %v9375_v29 = vld [vmem:[#allocation2 + $0x60] sm:$0xf] }
 0x33e   : > { %6422 = vmatprep.subr.bf16.mxu0 %v6766_v18  ;;  %v9338_v27 = vcombine.low %v3009_v8, %v3019_v50  ;;  %v3366_v43 = vsel %vm7041_vm4, %v3364_v35, %v3365_v37  ;;  %v3058_v24 = vshrl.u32 %v9328_v30, 16  ;;  %v3369_v10 = vrot.slane %v9299_v42, 5 }
 0x33f   : > { %v3028_v56 = vrot.slane %v3027_v9, 4  ;;  %v3037_v17 = vor.u32 %v3036_v63, %v3032_v5  ;;  %v3363_v60 = vsel %vm7041_vm4, %v5737_v28, %v3362_v1  ;;  %v9352_v16 = vcombine.low %v9322_v0, %v9328_v30 }
 0x340   : > { %4522 = vmatmul.mubr.bf16.gmra.mrb[60].mxu0 %v9316_v3  ;;  %4361 = vmatmul.mubr.bf16.gmra.mrb[28].mxu1 %v9257_v59  ;;  %v3047_v47 = vrot.slane %v3045_v11, 4  ;;  %v9354_v26 = vcombine.low %v3363_v60, %v3366_v43  ;;  %v3042_v42 = vrot.slane %v3040_v22, 5  ;;  %v3050_v58 = vrot.slane %v3048_v36, 5  ;;  %v2869_v22 = vld [vmem:[#allocation2 + $0x5c] sm:$0x1] }
 0x341   : > { %4529 = vmatprep.mubr.bf16.mxu0 %v9320_v41  ;;  %6423 = vmatpush3.bf16.msra.mxu0 %v6767_v33  ;;  %v3038_v62 = vrot.slane %v3037_v17, 4  ;;  %v3371_v7 = vrot.slane %v3369_v10, 4  ;;  %v3069_v61 = vshrl.u32 %v9345_v44, 16  ;;  %v3054_v32 = vshll.u32 %v9328_v30, 16 }
 0x342   : > { %6424 = vmatprep.subr.bf16.mxu0 %v6768_v46  ;;  %4368 = vmatprep.mubr.bf16.mxu1 %v9338_v27  ;;  %v3060_v14 = vrot.slane %v3058_v24, 4  ;;  %v3033_v18 = vsel %vm7080_vm5, %v3028_v56, %v3032_v5  ;;  %v3072_v31 = vshll.u32 %v9345_v44, 16  ;;  %v3051_v57 = vor.u32 %v3050_v58, %v3047_v47 }
 0x343   : > { %v3043_v23 = vsel %vm7080_vm5, %v3038_v62, %v3042_v42  ;;  %v5738_v1 = vrot.slane %v9291_v51, 9  ;;  %v3372_v52 = vrot.slane %v2863_v54, 5  ;;  %v3082_v6 = vshrl.u32 %v9356_v15, 16 }
 0x344   : > { %v3056_v21 = vrot.slane %v3054_v32, 5  ;;  %v3064_v48 = vshll.u32 %v2866_v2, 16  ;;  %v3376_v33 = vrot.slane %v9328_v30, 5  ;;  %v9370_v46 = vcombine.low %v3033_v18, %v3043_v23  ;;  %v9380_v30 = vld [vmem:[#allocation2 + $0x64] sm:$0xf] }
 0x345   : > { %6425 = vmatpush3.bf16.msra.mxu0 %v6769_v49  ;;  %v3373_v19 = vsel %vm7041_vm4, %v3371_v7, %v3372_v52  ;;  %v3052_v35 = vrot.slane %v3051_v57, 4  ;;  %v3071_v51 = vrot.slane %v3069_v61, 4  ;;  %v3074_v54 = vrot.slane %v3072_v31, 5  ;;  %v9411_v31 = vld [vmem:[#allocation2 + $0x70] sm:$0xf] }
 0x346   : > { %v3061_v28 = vor.u32 %v3060_v14, %v3056_v21  ;;  %v3370_v8 = vsel %vm7041_vm4, %v5738_v1, %v3369_v10  ;;  %v3078_v12 = vshll.u32 %v9356_v15, 16  ;;  %v3084_v25 = vrot.slane %v3082_v6, 4 }
 0x347   : > { %v9383_v37 = vcombine.low %v3370_v8, %v3373_v19  ;;  %v9387_v11 = vcombine.low %v9345_v44, %v9356_v15  ;;  %v3066_v36 = vrot.slane %v3064_v48, 5  ;;  %v3378_v63 = vrot.slane %v3376_v33, 4 }
 0x348   : > { %4530 = vmatmul.mubr.bf16.gmra.mrb[64].mxu0 %v9354_v26  ;;  %4369 = vmatmul.mubr.bf16.gmra.mrb[32].mxu1 %v9288_v53  ;;  %v3062_v40 = vrot.slane %v3061_v28, 4  ;;  %v3379_v50 = vrot.slane %v2866_v2, 5  ;;  %v3093_v9 = vshrl.u32 %v9375_v29, 16  ;;  %v3096_v5 = vshll.u32 %v9375_v29, 16  ;;  %v2872_v28 = vld [vmem:[#allocation2 + $0x68] sm:$0x1] }
 0x349   : > { %4537 = vmatprep.mubr.bf16.mxu0 %v9352_v16  ;;  %4376 = vmatprep.mubr.bf16.mxu1 %v9370_v46  ;;  %10695 = vst [vmem:[#allocation38_spill] sm:$0xff] %v9387_v11  ;;  %v3080_v49 = vrot.slane %v3078_v12, 5  ;;  %v3057_v43 = vsel %vm7080_vm5, %v3052_v35, %v3056_v21  ;;  %v3106_v10 = vshrl.u32 %v9380_v30, 16  ;;  %v3075_v56 = vor.u32 %v3074_v54, %v3071_v51 }
 0x34a   : > { %v3067_v24 = vsel %vm7080_vm5, %v3062_v40, %v3066_v36  ;;  %v5739_v17 = vrot.slane %v9322_v0, 9  ;;  %v3380_v47 = vsel %vm7041_vm4, %v3378_v63, %v3379_v50  ;;  %v3088_v62 = vshll.u32 %v2869_v22, 16  ;;  %v9406_v0 = vld [vmem:[#allocation2 + $0x6c] sm:$0xf] }
 0x34b   : > { %v3085_v60 = vor.u32 %v3084_v25, %v3080_v49  ;;  %v3383_v42 = vrot.slane %v9356_v15, 5  ;;  %v9402_v58 = vcombine.low %v3057_v43, %v3067_v24  ;;  %v3095_v7 = vrot.slane %v3093_v9, 4 }
 0x34c   : > { %v3098_v61 = vrot.slane %v3096_v5, 5  ;;  %v3102_v2 = vshll.u32 %v9380_v30, 16  ;;  %v3076_v32 = vrot.slane %v3075_v56, 4  ;;  %v3108_v18 = vrot.slane %v3106_v10, 4  ;;  %v9435_v5 = vld [vmem:[#allocation2 + $0x78] sm:$0xf] }
 0x34d   : > { %v3086_v14 = vrot.slane %v3085_v60, 4  ;;  %v3377_v23 = vsel %vm7041_vm4, %v5739_v17, %v3376_v33  ;;  %v9417_v1 = vcombine.low %v9375_v29, %v9380_v30  ;;  %v3090_v52 = vrot.slane %v3088_v62, 5  ;;  %v9441_v56 = vld [vmem:[#allocation2 + $0x7c] sm:$0xf] }
 0x34e   : > { %v3104_v15 = vrot.slane %v3102_v2, 5  ;;  %v9413_v57 = vcombine.low %v3377_v23, %v3380_v47  ;;  %v3385_v6 = vrot.slane %v3383_v42, 4  ;;  %v3386_v21 = vrot.slane %v2869_v22, 5  ;;  %v2875_v2 = vld [vmem:[#allocation2 + $0x74] sm:$0x1] }
 0x34f   : > { %10697 = vst [vmem:[#allocation9_spill] sm:$0xff] %v9417_v1  ;;  %v3117_v48 = vshrl.u32 %v9406_v0, 16  ;;  %v3120_v19 = vshll.u32 %v9406_v0, 16  ;;  %v3099_v35 = vor.u32 %v3098_v61, %v3095_v7  ;;  %v3081_v33 = vsel %vm7080_vm5, %v3076_v32, %v3080_v49 }
 0x350   : > { %4538 = vmatmul.mubr.bf16.gmra.mrb[68].mxu0 %v9383_v37  ;;  %4377 = vmatmul.mubr.bf16.gmra.mrb[36].mxu1 %v9320_v41  ;;  %10696 = vst [vmem:[#allocation39_spill] sm:$0xff] %v9413_v57  ;;  %v3091_v51 = vsel %vm7080_vm5, %v3086_v14, %v3090_v52  ;;  %v3130_v54 = vshrl.u32 %v9411_v31, 16  ;;  %v3109_v8 = vor.u32 %v3108_v18, %v3104_v15  ;;  %v5740_v40 = vrot.slane %v9345_v44, 9 }
 0x351   : > { %4545 = vmatprep.mubr.bf16.mxu0 %v9387_v11  ;;  %4384 = vmatprep.mubr.bf16.mxu1 %v9402_v58  ;;  %v3126_v12 = vshll.u32 %v9411_v31, 16  ;;  %v3387_v25 = vsel %vm7041_vm4, %v3385_v6, %v3386_v21  ;;  %v3112_v36 = vshll.u32 %v2872_v28, 16  ;;  %v3390_v63 = vrot.slane %v9380_v30, 5 }
 0x352   : > { %v9433_v50 = vcombine.low %v3081_v33, %v3091_v51  ;;  %v3100_v9 = vrot.slane %v3099_v35, 4  ;;  %v3119_v22 = vrot.slane %v3117_v48, 4  ;;  %v3122_v49 = vrot.slane %v3120_v19, 5  ;;  %v9465_v33 = vld [vmem:[#allocation2 + $0x88] sm:$0xf] }
 0x353   : > { %v3110_v44 = vrot.slane %v3109_v8, 4  ;;  %v3128_v43 = vrot.slane %v3126_v12, 5  ;;  %v3132_v24 = vrot.slane %v3130_v54, 4  ;;  %v3384_v10 = vsel %vm7041_vm4, %v5740_v40, %v3383_v42  ;;  %v9468_v8 = vld [vmem:[#allocation2 + $0x84] sm:$0xf] }
 0x354   : > { %v9443_v30 = vcombine.low %v3384_v10, %v3387_v25  ;;  %v9447_v17 = vcombine.low %v9406_v0, %v9411_v31  ;;  %v3114_v60 = vrot.slane %v3112_v36, 5  ;;  %v3141_v47 = vshrl.u32 %v9435_v5, 16 }
 0x355   : > { %v3105_v62 = vsel %vm7080_vm5, %v3100_v9, %v3104_v15  ;;  %v3392_v7 = vrot.slane %v3390_v63, 4  ;;  %v3144_v61 = vshll.u32 %v9435_v5, 16  ;;  %v3123_v32 = vor.u32 %v3122_v49, %v3119_v22 }
 0x356   : > { %10698 = vst [vmem:[#allocation10_spill] sm:$0xff] %v9443_v30  ;;  %10699 = vst [vmem:[#allocation45_spill] sm:$0xff] %v9447_v17  ;;  %v3115_v42 = vsel %vm7080_vm5, %v3110_v44, %v3114_v60  ;;  %v3154_v14 = vshrl.u32 %v9441_v56, 16  ;;  %v3133_v18 = vor.u32 %v3132_v24, %v3128_v43  ;;  %v3150_v23 = vshll.u32 %v9441_v56, 16  ;;  %v2878_v60 = vld [vmem:[#allocation2 + $0x80] sm:$0x1] }
 0x357   : > { %v5741_v52 = vrot.slane %v9375_v29, 9  ;;  %v3393_v6 = vrot.slane %v2872_v28, 5  ;;  %v3136_v15 = vshll.u32 %v2875_v2, 16  ;;  %v3397_v21 = vrot.slane %v9411_v31, 5 }
 0x358   : > { %4546 = vmatmul.mubr.bf16.gmra.mrb[72].mxu0 %v9413_v57  ;;  %4385 = vmatmul.mubr.bf16.gmra.mrb[40].mxu1 %v9352_v16  ;;  %v9461_v48 = vcombine.low %v3105_v62, %v3115_v42  ;;  %v3124_v35 = vrot.slane %v3123_v32, 4  ;;  %v3143_v51 = vrot.slane %v3141_v47, 4  ;;  %v3134_v54 = vrot.slane %v3133_v18, 4  ;;  %v9495_v32 = vld [vmem:[#allocation2 + $0x90] sm:$0xf] }
 0x359   : > { %4553 = vmatprep.mubr.bf16.mxu0 %v9417_v1  ;;  %4392 = vmatprep.mubr.bf16.mxu1 %v9433_v50  ;;  %v3394_v19 = vsel %vm7041_vm4, %v3392_v7, %v3393_v6  ;;  %v3146_v29 = vrot.slane %v3144_v61, 5  ;;  %v9470_v28 = vrot.slane %v3150_v23, 5  ;;  %v3156_v40 = vrot.slane %v3154_v14, 4  ;;  %v9497_v42 = vld [vmem:[#allocation2 + $0x94] sm:$0xf] }
 0x35a   : > { %10700 = vst [vmem:[#allocation46_spill] sm:$0xff] %v9461_v48  ;;  %v3391_v31 = vsel %vm7041_vm4, %v5741_v52, %v3390_v63  ;;  %v9477_v12 = vcombine.low %v9435_v5, %v9441_v56  ;;  %v3138_v36 = vrot.slane %v3136_v15, 5  ;;  %v3399_v9 = vrot.slane %v3397_v21, 4 }
 0x35b   : > { %v9479_v25 = vcombine.low %v3391_v31, %v3394_v19  ;;  %v3400_v22 = vrot.slane %v2875_v2, 5  ;;  %v3129_v49 = vsel %vm7080_vm5, %v3124_v35, %v3128_v43  ;;  %v3165_v44 = vshrl.u32 %v9468_v8, 16 }
 0x35c   : > { %10701 = vst [vmem:[#allocation47_spill] sm:$0xff] %v9477_v12  ;;  %v3168_v24 = vshll.u32 %v9468_v8, 16  ;;  %v3178_v10 = vshrl.u32 %v9465_v33, 16  ;;  %v3139_v63 = vsel %vm7080_vm5, %v3134_v54, %v3138_v36  ;;  %v3147_v47 = vor.u32 %v3146_v29, %v3143_v51 }
 0x35d   : > { %10702 = vst [vmem:[#allocation48_spill] sm:$0xff] %v9479_v25  ;;  %v3157_v62 = vor.u32 %v3156_v40, %v9470_v28  ;;  %v3174_v7 = vshll.u32 %v9465_v33, 16  ;;  %v5742_v43 = vrot.slane %v9406_v0, 9  ;;  %v3401_v61 = vsel %vm7041_vm4, %v3399_v9, %v3400_v22 }
 0x35e   : > { %v3160_v2 = vshll.u32 %v2878_v60, 16  ;;  %v9499_v14 = vcombine.low %v3129_v49, %v3139_v63  ;;  %v3404_v18 = vrot.slane %v9441_v56, 5  ;;  %v3167_v23 = vrot.slane %v3165_v44, 4  ;;  %v2881_v49 = vld [vmem:[#allocation2 + $0x8c] sm:$0x1] }
 0x35f   : > { %v3170_v52 = vrot.slane %v3168_v24, 5  ;;  %v3148_v6 = vrot.slane %v3147_v47, 4  ;;  %v3158_v15 = vrot.slane %v3157_v62, 4  ;;  %v9503_v19 = vrot.slane %v3174_v7, 5 }
 0x360   : > { %4554 = vmatmul.mubr.bf16.gmra.mrb[76].mxu0 %v9443_v30  ;;  %4393 = vmatmul.mubr.bf16.gmra.mrb[44].mxu1 %v9387_v11  ;;  %10703 = vst [vmem:[#allocation49_spill] sm:$0xff] %v9499_v14  ;;  %v3180_v0 = vrot.slane %v3178_v10, 4  ;;  %v3189_v35 = vshrl.u32 %v9495_v32, 16  ;;  %v3192_v51 = vshll.u32 %v9495_v32, 16  ;;  %v3202_v54 = vshrl.u32 %v9497_v42, 16 }
 0x361   : > { %4561 = vmatprep.mubr.bf16.mxu0 %v9447_v17  ;;  %4400 = vmatprep.mubr.bf16.mxu1 %v9461_v48  ;;  %v3198_v29 = vshll.u32 %v9497_v42, 16  ;;  %v3398_v56 = vsel %vm7041_vm4, %v5742_v43, %v3397_v21  ;;  %v9514_v40 = vcombine.low %v9468_v8, %v9465_v33  ;;  %v3162_v31 = vrot.slane %v3160_v2, 5  ;;  %v2890_v30 = vld [vmem:[#allocation2 + $0xb0] sm:$0x1] }
 0x362   : > { %v5743_v36 = vrot.slane %v9435_v5, 9  ;;  %v9517_v9 = vcombine.low %v3398_v56, %v3401_v61  ;;  %v3406_v22 = vrot.slane %v3404_v18, 4  ;;  %v3171_v44 = vor.u32 %v3170_v52, %v3167_v23  ;;  %v9527_v5 = vld [vmem:[#allocation2 + $0x9c] sm:$0xf] }
 0x363   : > { %10704 = vst [vmem:[#allocation50_spill] sm:$0xff] %v9514_v40  ;;  %v3411_v24 = vrot.slane %v9465_v33, 5  ;;  %v3153_v10 = vsel %vm7080_vm5, %v3148_v6, %v9470_v28  ;;  %v3163_v21 = vsel %vm7080_vm5, %v3158_v15, %v3162_v31  ;;  %v3407_v63 = vrot.slane %v2878_v60, 5  ;;  %v9542_v15 = vld [vmem:[#allocation2 + $0xa0] sm:$0xf] }
 0x364   : > { %10705 = vst [vmem:[#allocation51_spill] sm:$0xff] %v9517_v9  ;;  %v3181_v47 = vor.u32 %v3180_v0, %v9503_v19  ;;  %v3191_v62 = vrot.slane %v3189_v35, 4  ;;  %v3194_v7 = vrot.slane %v3192_v51, 5  ;;  %v9529_v43 = vrot.slane %v3198_v29, 5  ;;  %v2884_v51 = vld [vmem:[#allocation2 + $0x98] sm:$0x1] }
 0x365   : > { %v3204_v61 = vrot.slane %v3202_v54, 4  ;;  %v3405_v33 = vsel %vm7041_vm4, %v5743_v36, %v3404_v18  ;;  %v9536_v28 = vcombine.low %v9495_v32, %v9497_v42  ;;  %v3184_v60 = vshll.u32 %v2881_v49, 16 }
 0x366   : > { %v9538_v2 = vcombine.low %v3153_v10, %v3163_v21  ;;  %v3408_v23 = vsel %vm7041_vm4, %v3406_v22, %v3407_v63  ;;  %v3172_v52 = vrot.slane %v3171_v44, 4  ;;  %v3413_v6 = vrot.slane %v3411_v24, 4 }
 0x367   : > { %v3182_v0 = vrot.slane %v3181_v47, 4  ;;  %v3213_v35 = vshrl.u32 %v9527_v5, 16  ;;  %v3216_v18 = vshll.u32 %v9527_v5, 16  ;;  %v3418_v54 = vrot.slane %v9497_v42, 5 }
 0x368   : > { %4562 = vmatmul.mubr.bf16.gmra.mrb[80].mxu0 %v9479_v25  ;;  %4401 = vmatmul.mubr.bf16.gmra.mrb[48].mxu1 %v9417_v1  ;;  %10706 = vst [vmem:[#allocation52_spill] sm:$0xff] %v9538_v2  ;;  %v5744_v29 = vrot.slane %v9468_v8, 9  ;;  %v3414_v56 = vrot.slane %v2881_v49, 5  ;;  %v3195_v31 = vor.u32 %v3194_v7, %v3191_v62  ;;  %v3205_v36 = vor.u32 %v3204_v61, %v9529_v43  ;;  %v9563_v7 = vld [vmem:[#allocation2 + $0xa8] sm:$0xf] }
 0x369   : > { %4569 = vmatprep.mubr.bf16.mxu0 %v9477_v12  ;;  %4408 = vmatprep.mubr.bf16.mxu1 %v9499_v14  ;;  %v9551_v22 = vcombine.low %v3405_v33, %v3408_v23  ;;  %v3186_v44 = vrot.slane %v3184_v60, 5  ;;  %v3226_v10 = vshrl.u32 %v9542_v15, 16  ;;  %v3222_v21 = vshll.u32 %v9542_v15, 16 }
 0x36a   : > { %v3177_v63 = vsel %vm7080_vm5, %v3172_v52, %v9503_v19  ;;  %v3415_v42 = vsel %vm7041_vm4, %v3413_v6, %v3414_v56  ;;  %v3208_v47 = vshll.u32 %v2884_v51, 16  ;;  %v5745_v8 = vrot.slane %v9495_v32, 9  ;;  %v2887_v52 = vld [vmem:[#allocation2 + $0xa4] sm:$0x1] }
 0x36b   : > { %10707 = vst [vmem:[#allocation53_spill] sm:$0xff] %v9551_v22  ;;  %v3187_v49 = vsel %vm7080_vm5, %v3182_v0, %v3186_v44  ;;  %v3420_v62 = vrot.slane %v3418_v54, 4  ;;  %v3215_v61 = vrot.slane %v3213_v35, 4  ;;  %v3218_v33 = vrot.slane %v3216_v18, 5  ;;  %v9575_v35 = vld [vmem:[#allocation2 + $0xc0] sm:$0xf] }
 0x36c   : > { %v3412_v60 = vsel %vm7041_vm4, %v5744_v29, %v3411_v24  ;;  %v3196_v19 = vrot.slane %v3195_v31, 4  ;;  %v3206_v23 = vrot.slane %v3205_v36, 4  ;;  %v9571_v32 = vcombine.low %v9527_v5, %v9542_v15  ;;  %v9581_v29 = vld [vmem:[#allocation2 + $0xac] sm:$0xf] }
 0x36d   : > { %v3421_v6 = vrot.slane %v2884_v51, 5  ;;  %v9573_v0 = vrot.slane %v3222_v21, 5  ;;  %v3228_v56 = vrot.slane %v3226_v10, 4  ;;  %v9577_v18 = vcombine.low %v3177_v63, %v3187_v49  ;;  %v9596_v49 = vld [vmem:[#allocation2 + $0xc4] sm:$0xf] }
 0x36e   : > { %v9579_v44 = vcombine.low %v3412_v60, %v3415_v42  ;;  %v3210_v24 = vrot.slane %v3208_v47, 5  ;;  %v3237_v31 = vshrl.u32 %v9563_v7, 16  ;;  %v3419_v36 = vsel %vm7041_vm4, %v5745_v8, %v3418_v54 }
 0x36f   : > { %10708 = vst [vmem:[#allocation54_spill] sm:$0xff] %v9577_v18  ;;  %v3422_v51 = vsel %vm7041_vm4, %v3420_v62, %v3421_v6  ;;  %v3219_v10 = vor.u32 %v3218_v33, %v3215_v61  ;;  %v3232_v21 = vshll.u32 %v2887_v52, 16  ;;  %v3201_v63 = vsel %vm7080_vm5, %v3196_v19, %v9529_v43  ;;  %v9606_v43 = vld [vmem:[#allocation2 + $0xb4] sm:$0xf] }
 0x370   : > { %4570 = vmatmul.mubr.bf16.gmra.mrb[84].mxu0 %v9517_v9  ;;  %4409 = vmatmul.mubr.bf16.gmra.mrb[52].mxu1 %v9447_v17  ;;  %10709 = vst [vmem:[#allocation55_spill] sm:$0xff] %v9579_v44  ;;  %v3211_v42 = vsel %vm7080_vm5, %v3206_v23, %v3210_v24  ;;  %v3445_v54 = vshrl.u32 %v9575_v35, 16  ;;  %v3240_v8 = vshll.u32 %v9563_v7, 16  ;;  %v3250_v62 = vshrl.u32 %v9581_v29, 16 }
 0x371   : > { %4577 = vmatprep.mubr.bf16.mxu0 %v9514_v40  ;;  %4416 = vmatprep.mubr.bf16.mxu1 %v9538_v2  ;;  %v9603_v61 = vcombine.low %v9563_v7, %v9581_v29  ;;  %v3229_v33 = vor.u32 %v3228_v56, %v9573_v0  ;;  %v9608_v60 = vcombine.low %v3419_v36, %v3422_v51  ;;  %v3246_v23 = vshll.u32 %v9581_v29, 16  ;;  %v9619_v36 = vld [vmem:[#allocation2 + $0xb8] sm:$0xf] }
 0x372   : > { %v3448_v6 = vshll.u32 %v9575_v35, 16  ;;  %v9613_v24 = vcombine.low %v3201_v63, %v3211_v42  ;;  %v3220_v47 = vrot.slane %v3219_v10, 4  ;;  %v10711_v56 = vrot.slane %v9542_v15, 5  ;;  %v2896_v42 = vld [vmem:[#allocation2 + $0xc8] sm:$0x1] }
 0x373   : > { %v3428_v9 = vrot.slane %v2887_v52, 5  ;;  %v3261_v51 = vshrl.u32 %v9606_v43, 16  ;;  %v3447_v19 = vrot.slane %v3445_v54, 4  ;;  %v3230_v2 = vrot.slane %v3229_v33, 4  ;;  %v6090_v33 = vpop.f32.mrb[16].mxu1 }
 0x374   : > { %10710 = vst [vmem:[#allocation56_spill] sm:$0xff] %v9613_v24  ;;  %v3264_v63 = vshll.u32 %v9606_v43, 16  ;;  %v3239_v10 = vrot.slane %v3237_v31, 4  ;;  %v9624_v17 = vrot.slane %v3246_v23, 5  ;;  %v3450_v25 = vrot.slane %v3448_v6, 5 }
 0x375   : > { %v3225_v52 = vsel %vm7080_vm5, %v3220_v47, %v9573_v0  ;;  %v3274_v54 = vshrl.u32 %v9619_v36, 16  ;;  %v5749_v31 = vrot.slane %v9575_v35, 9  ;;  %v3464_v1 = vshll.u32 %v2896_v42, 16 }
 0x376   : > { %v3451_v23 = vor.u32 %v3450_v25, %v3447_v19 }
 0x378   : > { %4578 = vmatmul.mubr.bf16.gmra.mrb[88].mxu0 %v9551_v22  ;;  %4417 = vmatmul.mubr.bf16.gmra.mrb[56].mxu1 %v9477_v12  ;;  %v3234_v22 = vrot.slane %v3232_v21, 5  ;;  %v3427_v12 = vrot.slane %v10711_v56, 4  ;;  %v3242_v21 = vrot.slane %v3240_v8, 5  ;;  %v3454_v56 = vshll.u32 %v9596_v49, 16 }
 0x379   : > { %4585 = vmatprep.mubr.bf16.mxu0 %v9536_v28  ;;  %4424 = vmatprep.mubr.bf16.mxu1 %v9577_v18  ;;  %v3458_v18 = vshrl.u32 %v9596_v49, 16 }
 0x37a   : > { %v3429_v8 = vsel %vm7041_vm4, %v3427_v12, %v3428_v9  ;;  %v3456_v6 = vrot.slane %v3454_v56, 5  ;;  %v3243_v0 = vor.u32 %v3242_v21, %v3239_v10  ;;  %v3452_v12 = vrot.slane %v3451_v23, 4 }
 0x37b   : > { %v3460_v14 = vrot.slane %v3458_v18, 4  ;;  %v3473_v18 = vrot.slane %v9596_v49, 5  ;;  %v3256_v10 = vshll.u32 %v2890_v30, 16 }
 0x37c   : > { %v3457_v21 = vsel %vm7080_vm5, %v3452_v12, %v3456_v6  ;;  %v9674_v12 = vcombine.low %v9606_v43, %v9619_v36 }
 0x37d   : > { %v3461_v9 = vor.u32 %v3460_v14, %v3456_v6  ;;  %v3474_v19 = vsel %vm7041_vm4, %v5749_v31, %v3473_v18  ;;  %v3244_v14 = vrot.slane %v3243_v0, 4  ;;  %v3263_v31 = vrot.slane %v3261_v51, 4 }
 0x37f   : > { %v3462_v56 = vrot.slane %v3461_v9, 4 }
 0x380   : > { %4586 = vmatmul.mubr.bf16.gmra.mrb[92].mxu0 %v9579_v44  ;;  %v3252_v44 = vrot.slane %v3250_v62, 4  ;;  %4425 = vmatmul.mubr.bf16.gmra.mrb[60].mxu1 %v9514_v40  ;;  %v6091_v62 = vpop.f32.mrb[17].mxu1  ;;  %v3235_v40 = vsel %vm7080_vm5, %v3230_v2, %v3234_v22  ;;  %v3475_v2 = vrot.slane %v3473_v18, 4  ;;  %v3476_v22 = vrot.slane %v2896_v42, 5 }
 0x381   : > { %4593 = vmatprep.mubr.bf16.mxu0 %v9571_v32  ;;  %4432 = vmatprep.mubr.bf16.mxu1 %v9613_v24  ;;  %v9638_v47 = vadd.f32 %v6091_v62, %v6090_v33  ;;  %v6093_v48 = vpop.f32.mrb[18].mxu1  ;;  %v3270_v24 = vshll.u32 %v9619_v36, 16  ;;  %v9651_v33 = vcombine.low %v3225_v52, %v3235_v40  ;;  %v3266_v42 = vrot.slane %v3264_v63, 5 }
 0x382   : > { %v3253_v11 = vor.u32 %v3252_v44, %v9624_v17  ;;  %v6094_v57 = vpop.f32.mrb[19].mxu1  ;;  %v3466_v44 = vrot.slane %v3464_v1, 5  ;;  %v3276_v18 = vrot.slane %v3274_v54, 4  ;;  %v10713_v52 = vrot.slane %v9527_v5, 9 }
 0x383   : > { %v9643_v25 = vadd.f32 %v6094_v57, %v6093_v48  ;;  %v3432_v57 = vrot.slane %v9581_v29, 5  ;;  %v3477_v48 = vsel %vm7041_vm4, %v3475_v2, %v3476_v22  ;;  %v3272_v6 = vrot.slane %v3270_v24, 5  ;;  %v2893_v24 = vld [vmem:[#allocation2 + $0xbc] sm:$0x1] }
 0x384   : > { %v3467_v62 = vsel %vm7080_vm5, %v3462_v56, %v3466_v44  ;;  %v9658_v23 = vcombine.low %v3474_v19, %v3477_v48  ;;  %v3254_v1 = vrot.slane %v3253_v11, 4  ;;  %v10712_v29 = vrot.slane %v9542_v15, 5 }
 0x385   : > { %v9661_v40 = vcombine.low %v3457_v21, %v3467_v62  ;;  %v3258_v63 = vrot.slane %v3256_v10, 5  ;;  %v3434_v11 = vrot.slane %v3432_v57, 4  ;;  %v3249_v54 = vsel %vm7080_vm5, %v3244_v14, %v9624_v17 }
 0x386   : > { %v3426_v51 = vsel %vm7041_vm4, %v10713_v52, %v10712_v29  ;;  %v3267_v5 = vor.u32 %v3266_v42, %v3263_v31  ;;  %v3277_v9 = vor.u32 %v3276_v18, %v3272_v6  ;;  %v3435_v19 = vrot.slane %v2890_v30, 5  ;;  %v6772_v18 = vld [vmem:[#allocation3 + $0x210] sm:$0xff]   ;;  %v10718_v29 = vld [vmem:[#allocation9_spill] sm:$0xff] }
 0x387   : > { %v9670_v0 = vcombine.low %v3426_v51, %v3429_v8  ;;  %v3259_v15 = vsel %vm7080_vm5, %v3254_v1, %v3258_v63  ;;  %v5747_v8 = vrot.slane %v9563_v7, 9  ;;  %v3280_v2 = vshll.u32 %v2893_v24, 16  ;;  %v10719_v52 = vld [vmem:[#allocation49_spill] sm:$0xff]  ;;  %v9751_v63 = vld [vmem:[#allocation2 + $0xcc] sm:$0xf] }
 0x388   : > { %4594 = vmatmul.mubr.bf16.gmra.mrb[96].mxu0 %v9608_v60  ;;  %4433 = vmatmul.mubr.bf16.gmra.mrb[64].mxu1 %v9536_v28  ;;  %v9684_v22 = vcombine.low %v3249_v54, %v3259_v15  ;;  %v3436_v17 = vsel %vm7041_vm4, %v3434_v11, %v3435_v19  ;;  %v3268_v10 = vrot.slane %v3267_v5, 4  ;;  %v3278_v21 = vrot.slane %v3277_v9, 4  ;;  %v10721_v51 = vld [vmem:[#allocation45_spill] sm:$0xff]  ;;  %v9753_v11 = vld [vmem:[#allocation2 + $0xd0] sm:$0xf] }
 0x389   : > { %4601 = vmatprep.mubr.bf16.mxu0 %v9603_v61  ;;  %4440 = vmatprep.mubr.bf16.mxu1 %v9651_v33  ;;  %v3439_v56 = vrot.slane %v9619_v36, 5  ;;  %v3433_v44 = vsel %vm7041_vm4, %v5747_v8, %v3432_v57  ;;  %v3282_v14 = vrot.slane %v3280_v2, 5  ;;  %v9697_v30 = vcombine.low %v9575_v35, %v9596_v49  ;;  %v10724_v8 = vld [vmem:[#allocation47_spill] sm:$0xff]  ;;  %v10725_v2 = vld [vmem:[#allocation54_spill] sm:$0xff] }
 0x38a   : > { %v9693_v7 = vcombine.low %v3433_v44, %v3436_v17  ;;  %v3273_v48 = vsel %vm7080_vm5, %v3268_v10, %v3272_v6  ;;  %v5748_v36 = vrot.slane %v9606_v43, 9  ;;  %v3442_v57 = vrot.slane %v2893_v24, 5  ;;  %v6771_v43 = vld [vmem:[#allocation3 + $0x208] sm:$0xff]   ;;  %v6785_v6 = vld [vmem:[#allocation3 + $0x200] sm:$0xff]   ;;  %v10723_v24 = vld [vmem:[#allocation51_spill] sm:$0xff] }
 0x38b   : > { %v3283_v31 = vsel %vm7080_vm5, %v3278_v21, %v3282_v14  ;;  %v3441_v42 = vrot.slane %v3439_v56, 4  ;;  %v5750_v54 = vrot.slane %v9751_v63, 9  ;;  %v10726_v10 = vld [vmem:[#allocation53_spill] sm:$0xff]  ;;  %v10727_v21 = vld [vmem:[#allocation50_spill] sm:$0xff]  ;;  %v10729_v44 = vld [vmem:[#allocation55_spill] sm:$0xff] }
 0x38c   : > { %v9706_v62 = vcombine.low %v3273_v48, %v3283_v31  ;;  %v3440_v49 = vsel %vm7041_vm4, %v5748_v36, %v3439_v56  ;;  %v10728_v56 = vld [vmem:[#allocation56_spill] sm:$0xff] }
 0x38d   : > { %v3443_v35 = vsel %vm7041_vm4, %v3441_v42, %v3442_v57 }
 0x38e   : > { %v9714_v1 = vcombine.low %v3440_v49, %v3443_v35  ;;  %v3482_v49 = vshll.u32 %v9751_v63, 16 }
 0x390   : > { %4602 = vmatmul.mubr.bf16.gmra.mrb[100].mxu0 %v9670_v0  ;;  %4441 = vmatmul.mubr.bf16.gmra.mrb[68].mxu1 %v9571_v32 }
 0x391   : > { %4609 = vmatprep.mubr.bf16.mxu0 %v9674_v12  ;;  %4448 = vmatprep.mubr.bf16.mxu1 %v9684_v22 }
 0x398   : > { %4610 = vmatmul.mubr.bf16.gmra.mrb[104].mxu0 %v9693_v7  ;;  %4449 = vmatmul.mubr.bf16.gmra.mrb[72].mxu1 %v9603_v61 }
 0x399   : > { %4617 = vmatprep.mubr.bf16.mxu0 %v9697_v30  ;;  %4456 = vmatprep.mubr.bf16.mxu1 %v9706_v62 }
 0x3a0   : > { %4618 = vmatmul.mubr.bf16.gmra.mrb[108].mxu0 %v9714_v1  ;;  %4457 = vmatmul.mubr.bf16.gmra.mrb[76].mxu1 %v9674_v12 }
 0x3a1   : > { %4819 = vmatprep.mubr.bf16.mxu0 %v9279_v13  ;;  %4658 = vmatprep.mubr.bf16.mxu1 %v9247_v39  ;;  %v6773_v39 = vld [vmem:[#allocation3 + $0x218] sm:$0xff]  }
 0x3a8   : > { %4820 = vmatmul.mubr.bf16.vlgmr.msra.gmra.mrb[112].mxu0 %v9222_v20  ;;  %4659 = vmatmul.mubr.bf16.vlgmr.msra.gmra.mrb[80].mxu1 %v9260_v34  ;;  %v6774_v20 = vld [vmem:[#allocation3 + $0x220] sm:$0xff]   ;;  %v6775_v34 = vld [vmem:[#allocation3 + $0x228] sm:$0xff]  }
 0x3a9   : > { %4827 = vmatprep.mubr.bf16.mxu0 %v9311_v55  ;;  %6547 = vmatpush3.bf16.msra.mxu1 %v6785_v6  ;;  %v3492_v6 = vshrl.u32 %v9753_v11, 16 }
 0x3aa   : > { %4666 = vmatprep.mubr.bf16.mxu1 %v9283_v45  ;;  %6548 = vmatprep.subr.bf16.mxu1 %v6771_v43 }
 0x3ad   : > { %6549 = vmatpush3.bf16.msra.mxu1 %v6771_v43  ;;  %v3488_v43 = vshll.u32 %v9753_v11, 16 }
 0x3ae   : > { %6550 = vmatprep.subr.bf16.mxu1 %v6772_v18 }
 0x3b0   : > { %4828 = vmatmul.mubr.bf16.gmra.mrb[116].mxu0 %v9257_v59  ;;  %4667 = vmatmul.mubr.bf16.gmra.mrb[84].mxu1 %v9279_v13  ;;  %v6776_v59 = vld [vmem:[#allocation3 + $0x230] sm:$0xff]   ;;  %v6777_v13 = vld [vmem:[#allocation3 + $0x238] sm:$0xff]  }
 0x3b1   : > { %4835 = vmatprep.mubr.bf16.mxu0 %v9338_v27  ;;  %4674 = vmatprep.mubr.bf16.mxu1 %v9316_v3 }
 0x3b2   : > { %6551 = vmatpush3.bf16.msra.mxu1 %v6772_v18 }
 0x3b3   : > { %6552 = vmatprep.subr.bf16.mxu1 %v6773_v39 }
 0x3b6   : > { %6553 = vmatpush3.bf16.msra.mxu1 %v6773_v39 }
 0x3b7   : > { %6554 = vmatprep.subr.bf16.mxu1 %v6774_v20 }
 0x3b8   : > { %4836 = vmatmul.mubr.bf16.gmra.mrb[120].mxu0 %v9288_v53  ;;  %4675 = vmatmul.mubr.bf16.gmra.mrb[88].mxu1 %v9311_v55  ;;  %v10714_v53 = vld [vmem:[#allocation39_spill] sm:$0xff]  ;;  %v10715_v55 = vld [vmem:[#allocation38_spill] sm:$0xff] }
 0x3b9   : > { %4843 = vmatprep.mubr.bf16.mxu0 %v9370_v46  ;;  %4682 = vmatprep.mubr.bf16.mxu1 %v9354_v26 }
 0x3ba   : > { %6555 = vmatpush3.bf16.msra.mxu1 %v6774_v20 }
 0x3bb   : > { %6556 = vmatprep.subr.bf16.mxu1 %v6775_v34 }
 0x3be   : > { %6557 = vmatpush3.bf16.msra.mxu1 %v6775_v34 }
 0x3bf   : > { %6558 = vmatprep.subr.bf16.mxu1 %v6776_v59 }
 0x3c0   : > { %4844 = vmatmul.mubr.bf16.gmra.mrb[124].mxu0 %v9320_v41  ;;  %4683 = vmatmul.mubr.bf16.gmra.mrb[92].mxu1 %v9338_v27  ;;  %v10716_v41 = vld [vmem:[#allocation46_spill] sm:$0xff] }
 0x3c1   : > { %4851 = vmatprep.mubr.bf16.mxu0 %v9402_v58  ;;  %4690 = vmatprep.mubr.bf16.mxu1 %v9383_v37  ;;  %v10717_v27 = vld [vmem:[#allocation10_spill] sm:$0xff] }
 0x3c2   : > { %6559 = vmatpush3.bf16.msra.mxu1 %v6776_v59  ;;  %v3484_v59 = vrot.slane %v3482_v49, 5 }
 0x3c3   : > { %6560 = vmatprep.subr.bf16.mxu1 %v6777_v13 }
 0x3c6   : > { %6561 = vmatpush3.bf16.msra.mxu1 %v6777_v13  ;;  %v3490_v13 = vrot.slane %v3488_v43, 5 }
 0x3c8   : > { %4852 = vmatmul.mubr.bf16.gmra.mrb[128].mxu0 %v9352_v16  ;;  %4691 = vmatmul.mubr.bf16.gmra.mrb[96].mxu1 %v9370_v46  ;;  %v10720_v16 = vld [vmem:[#allocation48_spill] sm:$0xff] }
 0x3c9   : > { %4859 = vmatprep.mubr.bf16.mxu0 %v9433_v50  ;;  %4698 = vmatprep.mubr.bf16.mxu1 %v10714_v53  ;;  %v10722_v46 = vld [vmem:[#allocation52_spill] sm:$0xff] }
 0x3d0   : > { %4860 = vmatmul.mubr.bf16.gmra.mrb[132].mxu0 %v10715_v55  ;;  %4699 = vmatmul.mubr.bf16.gmra.mrb[100].mxu1 %v9402_v58  ;;  %v9755_v58 = vld [vmem:[#allocation2 + $0xd4] sm:$0x1]  ;;  %v3494_v55 = vrot.slane %v3492_v6, 4 }
 0x3d1   : > { %4867 = vmatprep.mubr.bf16.mxu0 %v10716_v41  ;;  %4706 = vmatprep.mubr.bf16.mxu1 %v10717_v27  ;;  %v3510_v15 = vrot.slane %v9755_v58, 5 }
 0x3d8   : > { %4868 = vmatmul.mubr.bf16.gmra.mrb[136].mxu0 %v10718_v29  ;;  %4707 = vmatmul.mubr.bf16.gmra.mrb[104].mxu1 %v9433_v50  ;;  %v3507_v50 = vrot.slane %v9753_v11, 5 }
 0x3d9   : > { %4875 = vmatprep.mubr.bf16.mxu0 %v10719_v52  ;;  %4714 = vmatprep.mubr.bf16.mxu1 %v10720_v16 }
 0x3da   : > { %v9763_v5 = vsel %vm7041_vm4, %v5750_v54, %v3507_v50  ;;  %v3509_v9 = vrot.slane %v3507_v50, 4  ;;  %v3498_v54 = vshll.u32 %v9755_v58, 16 }
 0x3dc   : > { %v9768_v19 = vsel %vm7041_vm4, %v3509_v9, %v3510_v15  ;;  %v3500_v58 = vrot.slane %v3498_v54, 5 }
 0x3dd   : > { %v5804_v17 = vcombine.low %v9763_v5, %v9768_v19 }
 0x3e0   : > { %4876 = vmatmul.mubr.bf16.gmra.mrb[140].mxu0 %v10721_v51  ;;  %4715 = vmatmul.mubr.bf16.gmra.mrb[108].mxu1 %v10716_v41 }
 0x3e1   : > { %4883 = vmatprep.mubr.bf16.mxu0 %v10722_v46  ;;  %4722 = vmatprep.mubr.bf16.mxu1 %v10723_v24 }
 0x3e8   : > { %4884 = vmatmul.mubr.bf16.gmra.mrb[144].mxu0 %v10724_v8  ;;  %4723 = vmatmul.mubr.bf16.gmra.mrb[112].mxu1 %v10719_v52  ;;  %v3495_v8 = vor.u32 %v3494_v55, %v3490_v13 }
 0x3e9   : > { %4891 = vmatprep.mubr.bf16.mxu0 %v10725_v2  ;;  %4730 = vmatprep.mubr.bf16.mxu1 %v10726_v10 }
 0x3f0   : > { %4892 = vmatmul.mubr.bf16.gmra.mrb[148].mxu0 %v10727_v21  ;;  %4731 = vmatmul.mubr.bf16.gmra.mrb[116].mxu1 %v10722_v46 }
 0x3f1   : > { %4899 = vmatprep.mubr.bf16.mxu0 %v10728_v56  ;;  %4738 = vmatprep.mubr.bf16.mxu1 %v10729_v44 }
 0x3f8   : > { %4900 = vmatmul.mubr.bf16.gmra.mrb[152].mxu0 %v9536_v28  ;;  %4739 = vmatmul.mubr.bf16.gmra.mrb[120].mxu1 %v10725_v2  ;;  %v3479_v28 = vshrl.u32 %v9751_v63, 16 }
 0x3f9   : > { %4907 = vmatprep.mubr.bf16.mxu0 %v9651_v33  ;;  %4746 = vmatprep.mubr.bf16.mxu1 %v9608_v60 }
 0x3fa   : > { %v3481_v34 = vrot.slane %v3479_v28, 4 }
 0x3fb   : > { %v6202_v38 = vpop.f32.mrb[48].mxu0 }
 0x3fc   : > { %v6203_v14 = vpop.f32.mrb[49].mxu0  ;;  %v3485_v9 = vor.u32 %v3484_v59, %v3481_v34 }
 0x3fd   : > { %v6204_v48 = vadd.f32 %v6203_v14, %v6202_v38  ;;  %v6205_v31 = vpop.f32.mrb[50].mxu0 }
 0x3fe   : > { %v6206_v42 = vpop.f32.mrb[51].mxu0 }
 0x3ff   : > { %v9784_v36 = vadd.f32 %v6204_v48, %v9638_v47  ;;  %v6207_v57 = vadd.f32 %v6206_v42, %v6205_v31  ;;  %v3486_v31 = vrot.slane %v3485_v9, 4  ;;  %v3496_v42 = vrot.slane %v3495_v8, 4 }
 0x400   : > { %4908 = vmatmul.mubr.bf16.gmra.mrb[156].mxu0 %v9571_v32  ;;  %4747 = vmatmul.mubr.bf16.gmra.mrb[124].mxu1 %v10728_v56  ;;  %v5802_v8 = vcombine.low %v9751_v63, %v9753_v11 }
 0x401   : > { %v9788_v35 = vadd.f32 %v6207_v57, %v9643_v25  ;;  %4915 = vmatprep.mubr.bf16.mxu0 %v9684_v22  ;;  %4754 = vmatprep.mubr.bf16.mxu1 %v9670_v0 }
 0x403   : > { %v6208_v47 = vpop.f32.mrb[52].mxu0  ;;  %v6096_v25 = vpop.f32.mrb[20].mxu1 }
 0x404   : > { %v6209_v18 = vpop.f32.mrb[53].mxu0  ;;  %v6097_v41 = vpop.f32.mrb[21].mxu1 }
 0x405   : > { %v6210_v32 = vadd.f32 %v6209_v18, %v6208_v47  ;;  %v6211_v39 = vpop.f32.mrb[54].mxu0  ;;  %v6098_v52 = vadd.f32 %v6097_v41, %v6096_v25  ;;  %v6099_v51 = vpop.f32.mrb[22].mxu1  ;;  %v3491_v18 = vsel %vm7080_vm5, %v3486_v31, %v3490_v13 }
 0x406   : > { %v6212_v20 = vpop.f32.mrb[55].mxu0  ;;  %v6100_v46 = vpop.f32.mrb[23].mxu1 }
 0x407   : > { %v6213_v29 = vadd.f32 %v6212_v20, %v6211_v39  ;;  %v9800_v50 = vadd.f32 %v6210_v32, %v6098_v52  ;;  %v6101_v15 = vadd.f32 %v6100_v46, %v6099_v51  ;;  %v3501_v32 = vsel %vm7080_vm5, %v3496_v42, %v3500_v58 }
 0x408   : > { %4916 = vmatmul.mubr.bf16.gmra.mrb[160].mxu0 %v9603_v61  ;;  %4755 = vmatmul.mubr.bf16.gmra.mrb[128].mxu1 %v9651_v33  ;;  %v5803_v59 = vcombine.low %v3491_v18, %v3501_v32 }
 0x409   : > { %4923 = vmatprep.mubr.bf16.mxu0 %v9706_v62  ;;  %v9803_v21 = vadd.f32 %v6213_v29, %v6101_v15  ;;  %4762 = vmatprep.mubr.bf16.mxu1 %v9693_v7 }
 0x40b   : > { %v6214_v2 = vpop.f32.mrb[56].mxu0  ;;  %v6102_v14 = vpop.f32.mrb[24].mxu1 }
 0x40c   : > { %v6215_v56 = vpop.f32.mrb[57].mxu0  ;;  %v6103_v57 = vpop.f32.mrb[25].mxu1 }
 0x40d   : > { %v6216_v38 = vadd.f32 %v6215_v56, %v6214_v2  ;;  %v6217_v61 = vpop.f32.mrb[58].mxu0  ;;  %v6104_v49 = vadd.f32 %v6103_v57, %v6102_v14  ;;  %v6105_v43 = vpop.f32.mrb[26].mxu1 }
 0x40e   : > { %v6218_v48 = vpop.f32.mrb[59].mxu0  ;;  %v6106_v33 = vpop.f32.mrb[27].mxu1 }
 0x40f   : > { %v6219_v28 = vadd.f32 %v6218_v48, %v6217_v61  ;;  %v9808_v6 = vadd.f32 %v6216_v38, %v6104_v49  ;;  %v6107_v47 = vadd.f32 %v6106_v33, %v6105_v43 }
 0x410   : > { %4924 = vmatmul.mubr.bf16.gmra.mrb[164].mxu0 %v9674_v12  ;;  %4763 = vmatmul.mubr.bf16.gmra.mrb[132].mxu1 %v9684_v22 }
 0x411   : > { %4931 = vmatprep.mubr.bf16.mxu0 %v9661_v40  ;;  %v9815_v25 = vadd.f32 %v6219_v28, %v6107_v47  ;;  %4770 = vmatprep.mubr.bf16.mxu1 %v9714_v1 }
 0x413   : > { %v6220_v39 = vpop.f32.mrb[60].mxu0  ;;  %v6108_v55 = vpop.f32.mrb[28].mxu1 }
 0x414   : > { %v6221_v12 = vpop.f32.mrb[61].mxu0  ;;  %v6109_v29 = vpop.f32.mrb[29].mxu1 }
 0x415   : > { %v6222_v20 = vadd.f32 %v6221_v12, %v6220_v39  ;;  %v6223_v34 = vpop.f32.mrb[62].mxu0  ;;  %v6110_v51 = vadd.f32 %v6109_v29, %v6108_v55  ;;  %v6111_v13 = vpop.f32.mrb[30].mxu1 }
 0x416   : > { %v6224_v41 = vpop.f32.mrb[63].mxu0  ;;  %v6112_v4 = vpop.f32.mrb[31].mxu1 }
 0x417   : > { %v6225_v52 = vadd.f32 %v6224_v41, %v6223_v34  ;;  %v9819_v22 = vadd.f32 %v6222_v20, %v6110_v51  ;;  %v6113_v46 = vadd.f32 %v6112_v4, %v6111_v13 }
 0x418   : > { %4932 = vmatmul.mubr.bf16.gmra.mrb[168].mxu0 %v9697_v30  ;;  %4771 = vmatmul.mubr.bf16.gmra.mrb[136].mxu1 %v9706_v62 }
 0x419   : > { %4939 = vmatprep.mubr.bf16.mxu0 %v5803_v59  ;;  %v9822_v15 = vadd.f32 %v6225_v52, %v6113_v46  ;;  %4778 = vmatprep.mubr.bf16.mxu1 %v9658_v23 }
 0x41b   : > { %v6226_v54 = vpop.f32.mrb[64].mxu0  ;;  %v6114_v38 = vpop.f32.mrb[32].mxu1 }
 0x41c   : > { %v6227_v9 = vpop.f32.mrb[65].mxu0  ;;  %v6115_v61 = vpop.f32.mrb[33].mxu1 }
 0x41d   : > { %v6228_v2 = vadd.f32 %v6227_v9, %v6226_v54  ;;  %v6229_v56 = vpop.f32.mrb[66].mxu0  ;;  %v6116_v48 = vadd.f32 %v6115_v61, %v6114_v38  ;;  %v6117_v31 = vpop.f32.mrb[34].mxu1 }
 0x41e   : > { %v6230_v30 = vpop.f32.mrb[67].mxu0  ;;  %v6118_v42 = vpop.f32.mrb[35].mxu1 }
 0x41f   : > { %v6231_v14 = vadd.f32 %v6230_v30, %v6229_v56  ;;  %v9827_v62 = vadd.f32 %v6228_v2, %v6116_v48  ;;  %v6119_v58 = vadd.f32 %v6118_v42, %v6117_v31 }
 0x420   : > { %4940 = vmatmul.mubr.bf16.gmra.mrb[172].mxu0 %v5802_v8  ;;  %4779 = vmatmul.mubr.bf16.gmra.mrb[140].mxu1 %v9661_v40 }
 0x421   : > { %v9830_v28 = vadd.f32 %v6231_v14, %v6119_v58  ;;  %6562 = vmatprep.mubr.bf16.mxu1 %v9283_v45 }
 0x423   : > { %v6232_v57 = vpop.f32.mrb[68].mxu0  ;;  %v6120_v43 = vpop.f32.mrb[36].mxu1 }
 0x424   : > { %v6233_v63 = vpop.f32.mrb[69].mxu0  ;;  %v6121_v47 = vpop.f32.mrb[37].mxu1 }
 0x425   : > { %v6234_v11 = vadd.f32 %v6233_v63, %v6232_v57  ;;  %v6235_v49 = vpop.f32.mrb[70].mxu0  ;;  %v6122_v32 = vadd.f32 %v6121_v47, %v6120_v43  ;;  %v6123_v39 = vpop.f32.mrb[38].mxu1 }
 0x426   : > { %v6236_v33 = vpop.f32.mrb[71].mxu0  ;;  %v6124_v12 = vpop.f32.mrb[39].mxu1 }
 0x427   : > { %v6237_v18 = vadd.f32 %v6236_v33, %v6235_v49  ;;  %v9833_v20 = vadd.f32 %v6234_v11, %v6122_v32  ;;  %v6125_v34 = vadd.f32 %v6124_v12, %v6123_v39 }
 0x428   : > { %6563 = vmatmul.mubr.bf16.vlgmr.msra.gmra.mrb[144].mxu1 %v9316_v3 }
 0x429   : > { %v9836_v59 = vadd.f32 %v6237_v18, %v6125_v34  ;;  %6566 = vmatprep.mubr.bf16.mxu1 %v9354_v26 }
 0x42b   : > { %v6238_v40 = vpop.f32.mrb[72].mxu0  ;;  %v6126_v29 = vpop.f32.mrb[40].mxu1 }
 0x42c   : > { %v6239_v45 = vpop.f32.mrb[73].mxu0  ;;  %v6127_v51 = vpop.f32.mrb[41].mxu1 }
 0x42d   : > { %v6240_v55 = vadd.f32 %v6239_v45, %v6238_v40  ;;  %v6241_v41 = vpop.f32.mrb[74].mxu0  ;;  %v6128_v4 = vadd.f32 %v6127_v51, %v6126_v29  ;;  %v6129_v46 = vpop.f32.mrb[42].mxu1 }
 0x42e   : > { %v6242_v52 = vpop.f32.mrb[75].mxu0  ;;  %v6130_v54 = vpop.f32.mrb[43].mxu1 }
 0x42f   : > { %v6243_v13 = vadd.f32 %v6242_v52, %v6241_v41  ;;  %v9839_v9 = vadd.f32 %v6240_v55, %v6128_v4  ;;  %v6131_v8 = vadd.f32 %v6130_v54, %v6129_v46 }
 0x430   : > { %6567 = vmatmul.mubr.bf16.gmra.mrb[148].mxu1 %v9383_v37 }
 0x431   : > { %v9842_v2 = vadd.f32 %v6243_v13, %v6131_v8  ;;  %6570 = vmatprep.mubr.bf16.mxu1 %v10714_v53 }
 0x433   : > { %v6244_v3 = vpop.f32.mrb[76].mxu0  ;;  %v6132_v30 = vpop.f32.mrb[44].mxu1 }
 0x434   : > { %v6245_v26 = vpop.f32.mrb[77].mxu0  ;;  %v6133_v14 = vpop.f32.mrb[45].mxu1 }
 0x435   : > { %v6246_v56 = vadd.f32 %v6245_v26, %v6244_v3  ;;  %v6247_v38 = vpop.f32.mrb[78].mxu0  ;;  %v6134_v31 = vadd.f32 %v6133_v14, %v6132_v30  ;;  %v6135_v42 = vpop.f32.mrb[46].mxu1 }
 0x436   : > { %v6248_v61 = vpop.f32.mrb[79].mxu0  ;;  %v6136_v58 = vpop.f32.mrb[47].mxu1 }
 0x437   : > { %v6249_v48 = vadd.f32 %v6248_v61, %v6247_v38  ;;  %v9845_v57 = vadd.f32 %v6246_v56, %v6134_v31  ;;  %v6137_v63 = vadd.f32 %v6136_v58, %v6135_v42 }
 0x438   : > { %6571 = vmatmul.mubr.bf16.gmra.mrb[152].mxu1 %v10717_v27 }
 0x439   : > { %v9848_v11 = vadd.f32 %v6249_v48, %v6137_v63  ;;  %6574 = vmatprep.mubr.bf16.mxu1 %v10720_v16 }
 0x43b   : > { %v6250_v37 = vpop.f32.mrb[80].mxu0  ;;  %v6138_v33 = vpop.f32.mrb[48].mxu1 }
 0x43c   : > { %v6251_v53 = vpop.f32.mrb[81].mxu0  ;;  %v6139_v18 = vpop.f32.mrb[49].mxu1 }
 0x43d   : > { %v6252_v49 = vadd.f32 %v6251_v53, %v6250_v37  ;;  %v6253_v43 = vpop.f32.mrb[82].mxu0  ;;  %v6140_v39 = vadd.f32 %v6139_v18, %v6138_v33  ;;  %v6141_v12 = vpop.f32.mrb[50].mxu1 }
 0x43e   : > { %v6254_v47 = vpop.f32.mrb[83].mxu0  ;;  %v6142_v34 = vpop.f32.mrb[51].mxu1 }
 0x43f   : > { %v6255_v32 = vadd.f32 %v6254_v47, %v6253_v43  ;;  %v9851_v40 = vadd.f32 %v6252_v49, %v6140_v39  ;;  %v6143_v45 = vadd.f32 %v6142_v34, %v6141_v12 }
 0x440   : > { %6575 = vmatmul.mubr.bf16.gmra.mrb[156].mxu1 %v10723_v24 }
 0x441   : > { %v9854_v55 = vadd.f32 %v6255_v32, %v6143_v45  ;;  %6578 = vmatprep.mubr.bf16.mxu1 %v10726_v10 }
 0x443   : > { %v6256_v27 = vpop.f32.mrb[84].mxu0  ;;  %v6144_v52 = vpop.f32.mrb[52].mxu1 }
 0x444   : > { %v6257_v16 = vpop.f32.mrb[85].mxu0  ;;  %v6145_v13 = vpop.f32.mrb[53].mxu1 }
 0x445   : > { %v6258_v41 = vadd.f32 %v6257_v16, %v6256_v27  ;;  %v6259_v29 = vpop.f32.mrb[86].mxu0  ;;  %v6146_v46 = vadd.f32 %v6145_v13, %v6144_v52  ;;  %v6147_v54 = vpop.f32.mrb[54].mxu1 }
 0x446   : > { %v6260_v51 = vpop.f32.mrb[87].mxu0  ;;  %v6148_v8 = vpop.f32.mrb[55].mxu1 }
 0x447   : > { %v6261_v4 = vadd.f32 %v6260_v51, %v6259_v29  ;;  %v9857_v3 = vadd.f32 %v6258_v41, %v6146_v46  ;;  %v6149_v26 = vadd.f32 %v6148_v8, %v6147_v54 }
 0x448   : > { %6579 = vmatmul.mubr.bf16.gmra.mrb[160].mxu1 %v10729_v44 }
 0x449   : > { %v9860_v56 = vadd.f32 %v6261_v4, %v6149_v26  ;;  %6582 = vmatprep.mubr.bf16.mxu1 %v9608_v60 }
 0x44b   : > { %v6262_v24 = vpop.f32.mrb[88].mxu0  ;;  %v6150_v61 = vpop.f32.mrb[56].mxu1 }
 0x44c   : > { %v6263_v10 = vpop.f32.mrb[89].mxu0  ;;  %v6151_v48 = vpop.f32.mrb[57].mxu1 }
 0x44d   : > { %v6264_v38 = vadd.f32 %v6263_v10, %v6262_v24  ;;  %v6265_v30 = vpop.f32.mrb[90].mxu0  ;;  %v6152_v42 = vadd.f32 %v6151_v48, %v6150_v61  ;;  %v6153_v58 = vpop.f32.mrb[58].mxu1 }
 0x44e   : > { %v6266_v14 = vpop.f32.mrb[91].mxu0  ;;  %v6154_v63 = vpop.f32.mrb[59].mxu1 }
 0x44f   : > { %v6267_v31 = vadd.f32 %v6266_v14, %v6265_v30  ;;  %v9863_v37 = vadd.f32 %v6264_v38, %v6152_v42  ;;  %v6155_v53 = vadd.f32 %v6154_v63, %v6153_v58 }
 0x450   : > { %6583 = vmatmul.mubr.bf16.gmra.mrb[164].mxu1 %v9670_v0 }
 0x451   : > { %v9866_v49 = vadd.f32 %v6267_v31, %v6155_v53  ;;  %6586 = vmatprep.mubr.bf16.mxu1 %v9693_v7 }
 0x453   : > { %v6268_v44 = vpop.f32.mrb[92].mxu0  ;;  %v6156_v47 = vpop.f32.mrb[60].mxu1 }
 0x454   : > { %v6269_v60 = vpop.f32.mrb[93].mxu0  ;;  %v6157_v32 = vpop.f32.mrb[61].mxu1 }
 0x455   : > { %v6270_v43 = vadd.f32 %v6269_v60, %v6268_v44  ;;  %v6271_v33 = vpop.f32.mrb[94].mxu0  ;;  %v6158_v12 = vadd.f32 %v6157_v32, %v6156_v47  ;;  %v6159_v34 = vpop.f32.mrb[62].mxu1 }
 0x456   : > { %v6272_v18 = vpop.f32.mrb[95].mxu0  ;;  %v6160_v45 = vpop.f32.mrb[63].mxu1 }
 0x457   : > { %v6273_v39 = vadd.f32 %v6272_v18, %v6271_v33  ;;  %v9869_v27 = vadd.f32 %v6270_v43, %v6158_v12  ;;  %v6161_v16 = vadd.f32 %v6160_v45, %v6159_v34 }
 0x458   : > { %6587 = vmatmul.mubr.bf16.gmra.mrb[168].mxu1 %v9714_v1 }
 0x459   : > { %v9872_v41 = vadd.f32 %v6273_v39, %v6161_v16  ;;  %6590 = vmatprep.mubr.bf16.mxu1 %v9658_v23 }
 0x45b   : > { %v6274_v0 = vpop.f32.mrb[96].mxu0  ;;  %v6162_v51 = vpop.f32.mrb[64].mxu1 }
 0x45c   : > { %v6275_v7 = vpop.f32.mrb[97].mxu0  ;;  %v6163_v4 = vpop.f32.mrb[65].mxu1 }
 0x45d   : > { %v6276_v29 = vadd.f32 %v6275_v7, %v6274_v0  ;;  %v6277_v52 = vpop.f32.mrb[98].mxu0  ;;  %v6164_v54 = vadd.f32 %v6163_v4, %v6162_v51  ;;  %v6165_v8 = vpop.f32.mrb[66].mxu1 }
 0x45e   : > { %v6278_v13 = vpop.f32.mrb[99].mxu0  ;;  %v6166_v26 = vpop.f32.mrb[67].mxu1 }
 0x45f   : > { %v6279_v46 = vadd.f32 %v6278_v13, %v6277_v52  ;;  %v9875_v24 = vadd.f32 %v6276_v29, %v6164_v54  ;;  %v6167_v10 = vadd.f32 %v6166_v26, %v6165_v8 }
 0x460   : > { %6591 = vmatmul.mubr.bf16.gmra.mrb[172].mxu1 %v5804_v17 }
 0x461   : > { %v9880_v38 = vadd.f32 %v6279_v46, %v6167_v10 }
 0x463   : > { %v6280_v1 = vpop.f32.mrb[100].mxu0  ;;  %v6168_v14 = vpop.f32.mrb[68].mxu1 }
 0x464   : > { %v6281_v23 = vpop.f32.mrb[101].mxu0  ;;  %v6169_v31 = vpop.f32.mrb[69].mxu1 }
 0x465   : > { %v6282_v30 = vadd.f32 %v6281_v23, %v6280_v1  ;;  %v6283_v61 = vpop.f32.mrb[102].mxu0  ;;  %v6170_v58 = vadd.f32 %v6169_v31, %v6168_v14  ;;  %v6171_v63 = vpop.f32.mrb[70].mxu1 }
 0x466   : > { %v6284_v48 = vpop.f32.mrb[103].mxu0  ;;  %v6172_v53 = vpop.f32.mrb[71].mxu1 }
 0x467   : > { %v6285_v42 = vadd.f32 %v6284_v48, %v6283_v61  ;;  %v9882_v44 = vadd.f32 %v6282_v30, %v6170_v58  ;;  %v6173_v60 = vadd.f32 %v6172_v53, %v6171_v63 }
 0x469   : > { %v9884_v33 = vadd.f32 %v6285_v42, %v6173_v60 }
 0x46b   : > { %v6286_v43 = vpop.f32.mrb[104].mxu0  ;;  %v6174_v47 = vpop.f32.mrb[72].mxu1 }
 0x46c   : > { %v6287_v5 = vpop.f32.mrb[105].mxu0  ;;  %v6175_v32 = vpop.f32.mrb[73].mxu1 }
 0x46d   : > { %v6288_v19 = vadd.f32 %v6287_v5, %v6286_v43  ;;  %v6289_v17 = vpop.f32.mrb[106].mxu0  ;;  %v6176_v12 = vadd.f32 %v6175_v32, %v6174_v47  ;;  %v6177_v34 = vpop.f32.mrb[74].mxu1 }
 0x46e   : > { %v6290_v18 = vpop.f32.mrb[107].mxu0  ;;  %v6178_v45 = vpop.f32.mrb[75].mxu1 }
 0x46f   : > { %v6291_v39 = vadd.f32 %v6290_v18, %v6289_v17  ;;  %v9886_v16 = vadd.f32 %v6288_v19, %v6176_v12  ;;  %v6179_v0 = vadd.f32 %v6178_v45, %v6177_v34 }
 0x471   : > { %v9888_v29 = vadd.f32 %v6291_v39, %v6179_v0 }
 0x473   : > { %v6292_v7 = vpop.f32.mrb[108].mxu0  ;;  %v6180_v4 = vpop.f32.mrb[76].mxu1 }
 0x474   : > { %v6293_v52 = vpop.f32.mrb[109].mxu0  ;;  %v6181_v54 = vpop.f32.mrb[77].mxu1 }
 0x475   : > { %v6294_v51 = vadd.f32 %v6293_v52, %v6292_v7  ;;  %v6295_v13 = vpop.f32.mrb[110].mxu0  ;;  %v6182_v26 = vadd.f32 %v6181_v54, %v6180_v4  ;;  %v6183_v10 = vpop.f32.mrb[78].mxu1 }
 0x476   : > { %v6296_v46 = vpop.f32.mrb[111].mxu0  ;;  %v6184_v1 = vpop.f32.mrb[79].mxu1 }
 0x477   : > { %v6297_v8 = vadd.f32 %v6296_v46, %v6295_v13  ;;  %v9890_v23 = vadd.f32 %v6294_v51, %v6182_v26  ;;  %v6185_v30 = vadd.f32 %v6184_v1, %v6183_v10 }
 0x479   : > { %v9892_v14 = vadd.f32 %v6297_v8, %v6185_v30 }
 0x47b   : > { %v6426_v61 = vpop.f32.mrb[112].mxu0  ;;  %v6314_v58 = vpop.f32.mrb[80].mxu1 }
 0x47c   : > { %v6427_v48 = vpop.f32.mrb[113].mxu0  ;;  %v6315_v53 = vpop.f32.mrb[81].mxu1 }
 0x47d   : > { %v6428_v31 = vadd.f32 %v6427_v48, %v6426_v61  ;;  %v6429_v42 = vpop.f32.mrb[114].mxu0  ;;  %v6316_v43 = vadd.f32 %v6315_v53, %v6314_v58  ;;  %v6317_v5 = vpop.f32.mrb[82].mxu1 }
 0x47e   : > { %v6430_v63 = vpop.f32.mrb[115].mxu0  ;;  %v6318_v19 = vpop.f32.mrb[83].mxu1 }
 0x47f   : > { %v6431_v60 = vadd.f32 %v6430_v63, %v6429_v42  ;;  %v4661_v17 = vadd.f32 %v6316_v43, %v9784_v36  ;;  %v6319_v47 = vadd.f32 %v6318_v19, %v6317_v5 }
 0x481   : > { %v4664_v32 = vadd.f32 %v6319_v47, %v9788_v35  ;;  %v9896_v12 = vadd.f32 %v6428_v31, %v4661_v17 }
 0x483   : > { %v6432_v18 = vpop.f32.mrb[116].mxu0  ;;  %v6320_v0 = vpop.f32.mrb[84].mxu1  ;;  %v9898_v52 = vadd.f32 %v6431_v60, %v4664_v32 }
 0x484   : > { %v6433_v39 = vpop.f32.mrb[117].mxu0  ;;  %v6321_v51 = vpop.f32.mrb[85].mxu1 }
 0x485   : > { %v6434_v34 = vadd.f32 %v6433_v39, %v6432_v18  ;;  %v6435_v45 = vpop.f32.mrb[118].mxu0  ;;  %v6322_v4 = vadd.f32 %v6321_v51, %v6320_v0  ;;  %v6323_v46 = vpop.f32.mrb[86].mxu1 }
 0x486   : > { %v6436_v7 = vpop.f32.mrb[119].mxu0  ;;  %v6324_v54 = vpop.f32.mrb[87].mxu1 }
 0x487   : > { %v6437_v13 = vadd.f32 %v6436_v7, %v6435_v45  ;;  %v4669_v36 = vadd.f32 %v6322_v4, %v9800_v50  ;;  %v6325_v8 = vadd.f32 %v6324_v54, %v6323_v46 }
 0x489   : > { %v4672_v35 = vadd.f32 %v6325_v8, %v9803_v21  ;;  %v9902_v1 = vadd.f32 %v6434_v34, %v4669_v36 }
 0x48b   : > { %v6438_v26 = vpop.f32.mrb[120].mxu0  ;;  %v6326_v48 = vpop.f32.mrb[88].mxu1  ;;  %v9904_v42 = vadd.f32 %v6437_v13, %v4672_v35 }
 0x48c   : > { %v6439_v10 = vpop.f32.mrb[121].mxu0  ;;  %v6327_v58 = vpop.f32.mrb[89].mxu1 }
 0x48d   : > { %v6440_v30 = vadd.f32 %v6439_v10, %v6438_v26  ;;  %v6441_v61 = vpop.f32.mrb[122].mxu0  ;;  %v6328_v53 = vadd.f32 %v6327_v58, %v6326_v48  ;;  %v6329_v60 = vpop.f32.mrb[90].mxu1 }
 0x48e   : > { %v6442_v31 = vpop.f32.mrb[123].mxu0  ;;  %v6330_v43 = vpop.f32.mrb[91].mxu1 }
 0x48f   : > { %v6443_v63 = vadd.f32 %v6442_v31, %v6441_v61  ;;  %v4677_v50 = vadd.f32 %v6328_v53, %v9808_v6  ;;  %v6331_v5 = vadd.f32 %v6330_v43, %v6329_v60 }
 0x491   : > { %v4680_v21 = vadd.f32 %v6331_v5, %v9815_v25  ;;  %v9908_v47 = vadd.f32 %v6440_v30, %v4677_v50 }
 0x493   : > { %v6444_v19 = vpop.f32.mrb[124].mxu0  ;;  %v6332_v39 = vpop.f32.mrb[92].mxu1  ;;  %v9910_v45 = vadd.f32 %v6443_v63, %v4680_v21 }
 0x494   : > { %v6445_v17 = vpop.f32.mrb[125].mxu0  ;;  %v6333_v0 = vpop.f32.mrb[93].mxu1 }
 0x495   : > { %v6446_v18 = vadd.f32 %v6445_v17, %v6444_v19  ;;  %v6447_v32 = vpop.f32.mrb[126].mxu0  ;;  %v6334_v51 = vadd.f32 %v6333_v0, %v6332_v39  ;;  %v6335_v13 = vpop.f32.mrb[94].mxu1 }
 0x496   : > { %v6448_v34 = vpop.f32.mrb[127].mxu0  ;;  %v6336_v4 = vpop.f32.mrb[95].mxu1 }
 0x497   : > { %v6449_v7 = vadd.f32 %v6448_v34, %v6447_v32  ;;  %v4685_v6 = vadd.f32 %v6334_v51, %v9819_v22  ;;  %v6337_v46 = vadd.f32 %v6336_v4, %v6335_v13 }
 0x499   : > { %v4688_v25 = vadd.f32 %v6337_v46, %v9822_v15  ;;  %v9914_v8 = vadd.f32 %v6446_v18, %v4685_v6 }
 0x49b   : > { %v6450_v54 = vpop.f32.mrb[128].mxu0  ;;  %v6338_v10 = vpop.f32.mrb[96].mxu1  ;;  %v9916_v61 = vadd.f32 %v6449_v7, %v4688_v25 }
 0x49c   : > { %v6451_v36 = vpop.f32.mrb[129].mxu0  ;;  %v6339_v48 = vpop.f32.mrb[97].mxu1 }
 0x49d   : > { %v6452_v26 = vadd.f32 %v6451_v36, %v6450_v54  ;;  %v6453_v35 = vpop.f32.mrb[130].mxu0  ;;  %v6340_v58 = vadd.f32 %v6339_v48, %v6338_v10  ;;  %v6341_v63 = vpop.f32.mrb[98].mxu1 }
 0x49e   : > { %v6454_v30 = vpop.f32.mrb[131].mxu0  ;;  %v6342_v53 = vpop.f32.mrb[99].mxu1 }
 0x49f   : > { %v6455_v31 = vadd.f32 %v6454_v30, %v6453_v35  ;;  %v4693_v22 = vadd.f32 %v6340_v58, %v9827_v62  ;;  %v6343_v60 = vadd.f32 %v6342_v53, %v6341_v63 }
 0x4a1   : > { %v4696_v15 = vadd.f32 %v6343_v60, %v9830_v28  ;;  %v9920_v5 = vadd.f32 %v6452_v26, %v4693_v22 }
 0x4a3   : > { %v6456_v43 = vpop.f32.mrb[132].mxu0  ;;  %v6344_v17 = vpop.f32.mrb[100].mxu1  ;;  %v9922_v32 = vadd.f32 %v6455_v31, %v4696_v15 }
 0x4a4   : > { %v6457_v50 = vpop.f32.mrb[133].mxu0  ;;  %v6345_v39 = vpop.f32.mrb[101].mxu1 }
 0x4a5   : > { %v6458_v19 = vadd.f32 %v6457_v50, %v6456_v43  ;;  %v6459_v21 = vpop.f32.mrb[134].mxu0  ;;  %v6346_v0 = vadd.f32 %v6345_v39, %v6344_v17  ;;  %v6347_v7 = vpop.f32.mrb[102].mxu1 }
 0x4a6   : > { %v6460_v18 = vpop.f32.mrb[135].mxu0  ;;  %v6348_v51 = vpop.f32.mrb[103].mxu1 }
 0x4a7   : > { %v6461_v34 = vadd.f32 %v6460_v18, %v6459_v21  ;;  %v4701_v62 = vadd.f32 %v6346_v0, %v9833_v20  ;;  %v6349_v13 = vadd.f32 %v6348_v51, %v6347_v7 }
 0x4a9   : > { %v4704_v28 = vadd.f32 %v6349_v13, %v9836_v59  ;;  %v9926_v46 = vadd.f32 %v6458_v19, %v4701_v62 }
 0x4ab   : > { %v6462_v4 = vpop.f32.mrb[136].mxu0  ;;  %v6350_v36 = vpop.f32.mrb[104].mxu1  ;;  %v9928_v35 = vadd.f32 %v6461_v34, %v4704_v28 }
 0x4ac   : > { %v6463_v6 = vpop.f32.mrb[137].mxu0  ;;  %v6351_v10 = vpop.f32.mrb[105].mxu1 }
 0x4ad   : > { %v6464_v54 = vadd.f32 %v6463_v6, %v6462_v4  ;;  %v6465_v25 = vpop.f32.mrb[138].mxu0  ;;  %v6352_v48 = vadd.f32 %v6351_v10, %v6350_v36  ;;  %v6353_v31 = vpop.f32.mrb[106].mxu1 }
 0x4ae   : > { %v6466_v26 = vpop.f32.mrb[139].mxu0  ;;  %v6354_v58 = vpop.f32.mrb[107].mxu1 }
 0x4af   : > { %v6467_v30 = vadd.f32 %v6466_v26, %v6465_v25  ;;  %v4709_v20 = vadd.f32 %v6352_v48, %v9839_v9  ;;  %v6355_v63 = vadd.f32 %v6354_v58, %v6353_v31 }
 0x4b1   : > { %v4712_v59 = vadd.f32 %v6355_v63, %v9842_v2  ;;  %v9932_v60 = vadd.f32 %v6464_v54, %v4709_v20 }
 0x4b3   : > { %v6468_v53 = vpop.f32.mrb[140].mxu0  ;;  %v6356_v50 = vpop.f32.mrb[108].mxu1  ;;  %v9934_v21 = vadd.f32 %v6467_v30, %v4712_v59 }
 0x4b4   : > { %v6469_v22 = vpop.f32.mrb[141].mxu0  ;;  %v6357_v17 = vpop.f32.mrb[109].mxu1 }
 0x4b5   : > { %v6470_v43 = vadd.f32 %v6469_v22, %v6468_v53  ;;  %v6471_v15 = vpop.f32.mrb[142].mxu0  ;;  %v6358_v39 = vadd.f32 %v6357_v17, %v6356_v50  ;;  %v6359_v34 = vpop.f32.mrb[110].mxu1 }
 0x4b6   : > { %v6472_v19 = vpop.f32.mrb[143].mxu0  ;;  %v6360_v0 = vpop.f32.mrb[111].mxu1 }
 0x4b7   : > { %v6473_v18 = vadd.f32 %v6472_v19, %v6471_v15  ;;  %v4717_v9 = vadd.f32 %v6358_v39, %v9845_v57  ;;  %v6361_v7 = vadd.f32 %v6360_v0, %v6359_v34 }
 0x4b9   : > { %v4720_v2 = vadd.f32 %v6361_v7, %v9848_v11  ;;  %v9938_v13 = vadd.f32 %v6470_v43, %v4717_v9 }
 0x4bb   : > { %v6474_v51 = vpop.f32.mrb[144].mxu0  ;;  %v6362_v6 = vpop.f32.mrb[112].mxu1  ;;  %v9940_v25 = vadd.f32 %v6473_v18, %v4720_v2 }
 0x4bc   : > { %v6475_v62 = vpop.f32.mrb[145].mxu0  ;;  %v6363_v36 = vpop.f32.mrb[113].mxu1 }
 0x4bd   : > { %v6476_v4 = vadd.f32 %v6475_v62, %v6474_v51  ;;  %v6477_v28 = vpop.f32.mrb[146].mxu0  ;;  %v6364_v10 = vadd.f32 %v6363_v36, %v6362_v6  ;;  %v6365_v30 = vpop.f32.mrb[114].mxu1 }
 0x4be   : > { %v6478_v54 = vpop.f32.mrb[147].mxu0  ;;  %v6366_v48 = vpop.f32.mrb[115].mxu1 }
 0x4bf   : > { %v6479_v26 = vadd.f32 %v6478_v54, %v6477_v28  ;;  %v4725_v57 = vadd.f32 %v6364_v10, %v9851_v40  ;;  %v6367_v31 = vadd.f32 %v6366_v48, %v6365_v30 }
 0x4c1   : > { %v4728_v11 = vadd.f32 %v6367_v31, %v9854_v55  ;;  %v9944_v63 = vadd.f32 %v6476_v4, %v4725_v57 }
 0x4c3   : > { %v6480_v58 = vpop.f32.mrb[148].mxu0  ;;  %v6368_v22 = vpop.f32.mrb[116].mxu1  ;;  %v9946_v15 = vadd.f32 %v6479_v26, %v4728_v11 }
 0x4c4   : > { %v6481_v20 = vpop.f32.mrb[149].mxu0  ;;  %v6369_v50 = vpop.f32.mrb[117].mxu1 }
 0x4c5   : > { %v6482_v53 = vadd.f32 %v6481_v20, %v6480_v58  ;;  %v6483_v59 = vpop.f32.mrb[150].mxu0  ;;  %v6370_v17 = vadd.f32 %v6369_v50, %v6368_v22  ;;  %v6371_v18 = vpop.f32.mrb[118].mxu1 }
 0x4c6   : > { %v6484_v43 = vpop.f32.mrb[151].mxu0  ;;  %v6372_v39 = vpop.f32.mrb[119].mxu1 }
 0x4c7   : > { %v6485_v19 = vadd.f32 %v6484_v43, %v6483_v59  ;;  %v4733_v40 = vadd.f32 %v6370_v17, %v9857_v3  ;;  %v6373_v34 = vadd.f32 %v6372_v39, %v6371_v18 }
 0x4c9   : > { %v4736_v55 = vadd.f32 %v6373_v34, %v9860_v56  ;;  %v9950_v7 = vadd.f32 %v6482_v53, %v4733_v40 }
 0x4cb   : > { %v6486_v0 = vpop.f32.mrb[152].mxu0  ;;  %v6374_v62 = vpop.f32.mrb[120].mxu1  ;;  %v9952_v28 = vadd.f32 %v6485_v19, %v4736_v55 }
 0x4cc   : > { %v6487_v9 = vpop.f32.mrb[153].mxu0  ;;  %v6375_v6 = vpop.f32.mrb[121].mxu1 }
 0x4cd   : > { %v6488_v51 = vadd.f32 %v6487_v9, %v6486_v0  ;;  %v6489_v2 = vpop.f32.mrb[154].mxu0  ;;  %v6376_v36 = vadd.f32 %v6375_v6, %v6374_v62  ;;  %v6377_v26 = vpop.f32.mrb[122].mxu1 }
 0x4ce   : > { %v6490_v4 = vpop.f32.mrb[155].mxu0  ;;  %v6378_v10 = vpop.f32.mrb[123].mxu1 }
 0x4cf   : > { %v6491_v54 = vadd.f32 %v6490_v4, %v6489_v2  ;;  %v4741_v3 = vadd.f32 %v6376_v36, %v9863_v37  ;;  %v6379_v30 = vadd.f32 %v6378_v10, %v6377_v26 }
 0x4d1   : > { %v4744_v56 = vadd.f32 %v6379_v30, %v9866_v49  ;;  %v9956_v31 = vadd.f32 %v6488_v51, %v4741_v3 }
 0x4d3   : > { %v6492_v48 = vpop.f32.mrb[156].mxu0  ;;  %v6380_v20 = vpop.f32.mrb[124].mxu1  ;;  %v9958_v59 = vadd.f32 %v6491_v54, %v4744_v56 }
 0x4d4   : > { %v6493_v57 = vpop.f32.mrb[157].mxu0  ;;  %v6381_v22 = vpop.f32.mrb[125].mxu1 }
 0x4d5   : > { %v6494_v58 = vadd.f32 %v6493_v57, %v6492_v48  ;;  %v6495_v11 = vpop.f32.mrb[158].mxu0  ;;  %v6382_v50 = vadd.f32 %v6381_v22, %v6380_v20  ;;  %v6383_v19 = vpop.f32.mrb[126].mxu1 }
 0x4d6   : > { %v6496_v53 = vpop.f32.mrb[159].mxu0  ;;  %v6384_v17 = vpop.f32.mrb[127].mxu1 }
 0x4d7   : > { %v6497_v43 = vadd.f32 %v6496_v53, %v6495_v11  ;;  %v4749_v37 = vadd.f32 %v6382_v50, %v9869_v27  ;;  %v6385_v18 = vadd.f32 %v6384_v17, %v6383_v19 }
 0x4d9   : > { %v4752_v49 = vadd.f32 %v6385_v18, %v9872_v41  ;;  %v9962_v34 = vadd.f32 %v6494_v58, %v4749_v37 }
 0x4db   : > { %v6498_v39 = vpop.f32.mrb[160].mxu0  ;;  %v6386_v9 = vpop.f32.mrb[128].mxu1  ;;  %v9964_v2 = vadd.f32 %v6497_v43, %v4752_v49 }
 0x4dc   : > { %v6499_v40 = vpop.f32.mrb[161].mxu0  ;;  %v6387_v62 = vpop.f32.mrb[129].mxu1 }
 0x4dd   : > { %v6500_v0 = vadd.f32 %v6499_v40, %v6498_v39  ;;  %v6501_v55 = vpop.f32.mrb[162].mxu0  ;;  %v6388_v6 = vadd.f32 %v6387_v62, %v6386_v9  ;;  %v6389_v54 = vpop.f32.mrb[130].mxu1 }
 0x4de   : > { %v6502_v51 = vpop.f32.mrb[163].mxu0  ;;  %v6390_v36 = vpop.f32.mrb[131].mxu1 }
 0x4df   : > { %v6503_v4 = vadd.f32 %v6502_v51, %v6501_v55  ;;  %v4757_v27 = vadd.f32 %v6388_v6, %v9875_v24  ;;  %v6391_v26 = vadd.f32 %v6390_v36, %v6389_v54 }
 0x4e1   : > { %v4760_v41 = vadd.f32 %v6391_v26, %v9880_v38  ;;  %v9968_v30 = vadd.f32 %v6500_v0, %v4757_v27 }
 0x4e3   : > { %v6504_v10 = vpop.f32.mrb[164].mxu0  ;;  %v6392_v57 = vpop.f32.mrb[132].mxu1  ;;  %v9970_v11 = vadd.f32 %v6503_v4, %v4760_v41 }
 0x4e4   : > { %v6505_v3 = vpop.f32.mrb[165].mxu0  ;;  %v6393_v20 = vpop.f32.mrb[133].mxu1 }
 0x4e5   : > { %v6506_v48 = vadd.f32 %v6505_v3, %v6504_v10  ;;  %v6507_v56 = vpop.f32.mrb[166].mxu0  ;;  %v6394_v22 = vadd.f32 %v6393_v20, %v6392_v57  ;;  %v6395_v43 = vpop.f32.mrb[134].mxu1 }
 0x4e6   : > { %v6508_v58 = vpop.f32.mrb[167].mxu0  ;;  %v6396_v50 = vpop.f32.mrb[135].mxu1 }
 0x4e7   : > { %v6509_v53 = vadd.f32 %v6508_v58, %v6507_v56  ;;  %v4765_v24 = vadd.f32 %v6394_v22, %v9882_v44  ;;  %v6397_v19 = vadd.f32 %v6396_v50, %v6395_v43 }
 0x4e9   : > { %v4768_v38 = vadd.f32 %v6397_v19, %v9884_v33  ;;  %v9974_v18 = vadd.f32 %v6506_v48, %v4765_v24 }
 0x4eb   : > { %v6510_v17 = vpop.f32.mrb[168].mxu0  ;;  %v6398_v40 = vpop.f32.mrb[136].mxu1  ;;  %v9976_v55 = vadd.f32 %v6509_v53, %v4768_v38 }
 0x4ec   : > { %v6511_v37 = vpop.f32.mrb[169].mxu0  ;;  %v6399_v9 = vpop.f32.mrb[137].mxu1 }
 0x4ed   : > { %v6512_v39 = vadd.f32 %v6511_v37, %v6510_v17  ;;  %v6513_v49 = vpop.f32.mrb[170].mxu0  ;;  %v6400_v62 = vadd.f32 %v6399_v9, %v6398_v40  ;;  %v6401_v4 = vpop.f32.mrb[138].mxu1 }
 0x4ee   : > { %v6514_v0 = vpop.f32.mrb[171].mxu0  ;;  %v6402_v6 = vpop.f32.mrb[139].mxu1 }
 0x4ef   : > { %v6515_v51 = vadd.f32 %v6514_v0, %v6513_v49  ;;  %v4773_v44 = vadd.f32 %v6400_v62, %v9886_v16  ;;  %v6403_v54 = vadd.f32 %v6402_v6, %v6401_v4 }
 0x4f1   : > { %v4776_v33 = vadd.f32 %v6403_v54, %v9888_v29  ;;  %v9980_v26 = vadd.f32 %v6512_v39, %v4773_v44 }
 0x4f3   : > { %v6516_v36 = vpop.f32.mrb[172].mxu0  ;;  %v6404_v3 = vpop.f32.mrb[140].mxu1  ;;  %v9982_v56 = vadd.f32 %v6515_v51, %v4776_v33 }
 0x4f4   : > { %v6517_v27 = vpop.f32.mrb[173].mxu0  ;;  %v6405_v57 = vpop.f32.mrb[141].mxu1 }
 0x4f5   : > { %v6518_v10 = vadd.f32 %v6517_v27, %v6516_v36  ;;  %v6519_v41 = vpop.f32.mrb[174].mxu0  ;;  %v6406_v20 = vadd.f32 %v6405_v57, %v6404_v3  ;;  %v6407_v53 = vpop.f32.mrb[142].mxu1 }
 0x4f6   : > { %v6520_v48 = vpop.f32.mrb[175].mxu0  ;;  %v6408_v22 = vpop.f32.mrb[143].mxu1 }
 0x4f7   : > { %v6521_v58 = vadd.f32 %v6520_v48, %v6519_v41  ;;  %v4781_v16 = vadd.f32 %v6406_v20, %v9890_v23  ;;  %v6409_v43 = vadd.f32 %v6408_v22, %v6407_v53 }
 0x4f9   : > { %v4784_v50 = vadd.f32 %v6409_v43, %v9892_v14  ;;  %v9986_v29 = vadd.f32 %v6518_v10, %v4781_v16 }
 0x4fb   : > { %v6564_v24 = vpop.f32.mrb[144].mxu1  ;;  %v9988_v19 = vadd.f32 %v6521_v58, %v4784_v50 }
 0x4fc   : > { %v9991_v17 = vadd.f32 %v6564_v24, %v9902_v1  ;;  %v4982_v38 = vpop.f32.mrb[145].mxu1 }
 0x4fd   : > { %v9994_v37 = vadd.f32 %v4982_v38, %v9896_v12  ;;  %v6565_v39 = vpop.f32.mrb[146].mxu1 }
 0x4fe   : > { %v9997_v49 = vadd.f32 %v6565_v39, %v9904_v42  ;;  %v4985_v23 = vpop.f32.mrb[147].mxu1  ;;  %v5149_v12 = vmul.f32 %v9991_v17, %v9991_v17 }
 0x4ff   : > { %v10000_v40 = vadd.f32 %v4985_v23, %v9898_v52  ;;  %v5147_v14 = vmul.f32 %v9994_v37, %v9994_v37 }
 0x500   : > { %v5150_v4 = vmul.f32 %v9997_v49, %v9997_v49 }
 0x501   : > { %v5109_v0 = vadd.f32 %v10000_v40, %v9994_v37  ;;  %v5148_v1 = vmul.f32 %v10000_v40, %v10000_v40 }
 0x503   : > { %v5110_v9 = vadd.f32 %v5109_v0, %v9991_v17  ;;  %v5179_v42 = vadd.f32 %v5148_v1, %v5147_v14  ;;  %v6568_v51 = vpop.f32.mrb[148].mxu1 }
 0x504   : > { %v10012_v62 = vadd.f32 %v6568_v51, %v9914_v8  ;;  %v4998_v52 = vpop.f32.mrb[149].mxu1 }
 0x505   : > { %v5180_v6 = vadd.f32 %v5179_v42, %v5149_v12  ;;  %v10017_v44 = vadd.f32 %v4998_v52, %v9908_v47  ;;  %v5111_v54 = vadd.f32 %v5110_v9, %v9997_v49  ;;  %v6569_v36 = vpop.f32.mrb[150].mxu1 }
 0x506   : > { %v10021_v33 = vadd.f32 %v6569_v36, %v9916_v61  ;;  %v5001_v27 = vpop.f32.mrb[151].mxu1  ;;  %v5153_v61 = vmul.f32 %v10012_v62, %v10012_v62 }
 0x507   : > { %v5112_v10 = vadd.f32 %v5111_v54, %v10017_v44  ;;  %v5151_v8 = vmul.f32 %v10017_v44, %v10017_v44  ;;  %v5181_v41 = vadd.f32 %v5180_v6, %v5150_v4  ;;  %v10027_v3 = vadd.f32 %v5001_v27, %v9910_v45 }
 0x508   : > { %v5154_v45 = vmul.f32 %v10021_v33, %v10021_v33 }
 0x509   : > { %v5182_v48 = vadd.f32 %v5181_v41, %v5151_v8  ;;  %v5113_v47 = vadd.f32 %v5112_v10, %v10027_v3  ;;  %v5152_v57 = vmul.f32 %v10027_v3, %v10027_v3 }
 0x50b   : > { %v5114_v58 = vadd.f32 %v5113_v47, %v10012_v62  ;;  %v5183_v20 = vadd.f32 %v5182_v48, %v5152_v57  ;;  %v6572_v53 = vpop.f32.mrb[152].mxu1 }
 0x50c   : > { %v10036_v22 = vadd.f32 %v6572_v53, %v9926_v46  ;;  %v5014_v16 = vpop.f32.mrb[153].mxu1 }
 0x50d   : > { %v5184_v43 = vadd.f32 %v5183_v20, %v5153_v61  ;;  %v10041_v50 = vadd.f32 %v5014_v16, %v9920_v5  ;;  %v5115_v24 = vadd.f32 %v5114_v58, %v10021_v33  ;;  %v6573_v38 = vpop.f32.mrb[154].mxu1 }
 0x50e   : > { %v10045_v39 = vadd.f32 %v6573_v38, %v9928_v35  ;;  %v5017_v23 = vpop.f32.mrb[155].mxu1  ;;  %v5157_v35 = vmul.f32 %v10036_v22, %v10036_v22 }
 0x50f   : > { %v5116_v14 = vadd.f32 %v5115_v24, %v10041_v50  ;;  %v5155_v46 = vmul.f32 %v10041_v50, %v10041_v50  ;;  %v5185_v0 = vadd.f32 %v5184_v43, %v5154_v45  ;;  %v10051_v1 = vadd.f32 %v5017_v23, %v9922_v32 }
 0x510   : > { %v5158_v32 = vmul.f32 %v10045_v39, %v10045_v39 }
 0x511   : > { %v5186_v12 = vadd.f32 %v5185_v0, %v5155_v46  ;;  %v5117_v5 = vadd.f32 %v5116_v14, %v10051_v1  ;;  %v5156_v9 = vmul.f32 %v10051_v1, %v10051_v1 }
 0x513   : > { %v5118_v42 = vadd.f32 %v5117_v5, %v10036_v22  ;;  %v5187_v51 = vadd.f32 %v5186_v12, %v5156_v9  ;;  %v6576_v52 = vpop.f32.mrb[156].mxu1 }
 0x514   : > { %v10060_v4 = vadd.f32 %v6576_v52, %v9938_v13  ;;  %v5030_v6 = vpop.f32.mrb[157].mxu1 }
 0x515   : > { %v5188_v54 = vadd.f32 %v5187_v51, %v5157_v35  ;;  %v10065_v36 = vadd.f32 %v5030_v6, %v9932_v60  ;;  %v5119_v27 = vadd.f32 %v5118_v42, %v10045_v39  ;;  %v6577_v10 = vpop.f32.mrb[158].mxu1 }
 0x516   : > { %v10069_v8 = vadd.f32 %v6577_v10, %v9940_v25  ;;  %v5033_v41 = vpop.f32.mrb[159].mxu1  ;;  %v5161_v25 = vmul.f32 %v10060_v4, %v10060_v4 }
 0x517   : > { %v5120_v48 = vadd.f32 %v5119_v27, %v10065_v36  ;;  %v5159_v13 = vmul.f32 %v10065_v36, %v10065_v36  ;;  %v5189_v47 = vadd.f32 %v5188_v54, %v5158_v32  ;;  %v10075_v57 = vadd.f32 %v5033_v41, %v9934_v21 }
 0x518   : > { %v5162_v21 = vmul.f32 %v10069_v8, %v10069_v8 }
 0x519   : > { %v5190_v61 = vadd.f32 %v5189_v47, %v5159_v13  ;;  %v5121_v60 = vadd.f32 %v5120_v48, %v10075_v57  ;;  %v5160_v58 = vmul.f32 %v10075_v57, %v10075_v57 }
 0x51b   : > { %v5122_v20 = vadd.f32 %v5121_v60, %v10060_v4  ;;  %v5191_v53 = vadd.f32 %v5190_v61, %v5160_v58  ;;  %v6580_v16 = vpop.f32.mrb[160].mxu1 }
 0x51c   : > { %v10084_v45 = vadd.f32 %v6580_v16, %v9950_v7  ;;  %v5046_v43 = vpop.f32.mrb[161].mxu1 }
 0x51d   : > { %v5192_v24 = vadd.f32 %v5191_v53, %v5161_v25  ;;  %v10089_v38 = vadd.f32 %v5046_v43, %v9944_v63  ;;  %v5123_v23 = vadd.f32 %v5122_v20, %v10069_v8  ;;  %v6581_v14 = vpop.f32.mrb[162].mxu1 }
 0x51e   : > { %v10093_v46 = vadd.f32 %v6581_v14, %v9952_v28  ;;  %v5049_v0 = vpop.f32.mrb[163].mxu1  ;;  %v5165_v28 = vmul.f32 %v10084_v45, %v10084_v45 }
 0x51f   : > { %v5124_v12 = vadd.f32 %v5123_v23, %v10089_v38  ;;  %v5163_v7 = vmul.f32 %v10089_v38, %v10089_v38  ;;  %v5193_v5 = vadd.f32 %v5192_v24, %v5162_v21  ;;  %v10099_v9 = vadd.f32 %v5049_v0, %v9946_v15 }
 0x520   : > { %v5166_v15 = vmul.f32 %v10093_v46, %v10093_v46 }
 0x521   : > { %v5194_v35 = vadd.f32 %v5193_v5, %v5163_v7  ;;  %v5125_v63 = vadd.f32 %v5124_v12, %v10099_v9  ;;  %v5164_v42 = vmul.f32 %v10099_v9, %v10099_v9 }
 0x523   : > { %v5126_v51 = vadd.f32 %v5125_v63, %v10084_v45  ;;  %v5195_v52 = vadd.f32 %v5194_v35, %v5164_v42  ;;  %v6584_v6 = vpop.f32.mrb[164].mxu1 }
 0x524   : > { %v10108_v32 = vadd.f32 %v6584_v6, %v9962_v34  ;;  %v5062_v54 = vpop.f32.mrb[165].mxu1 }
 0x525   : > { %v5196_v27 = vadd.f32 %v5195_v52, %v5165_v28  ;;  %v10113_v10 = vadd.f32 %v5062_v54, %v9956_v31  ;;  %v5127_v41 = vadd.f32 %v5126_v51, %v10093_v46  ;;  %v6585_v48 = vpop.f32.mrb[166].mxu1 }
 0x526   : > { %v10117_v13 = vadd.f32 %v6585_v48, %v9964_v2  ;;  %v5065_v47 = vpop.f32.mrb[167].mxu1  ;;  %v5169_v2 = vmul.f32 %v10108_v32, %v10108_v32 }
 0x527   : > { %v5128_v61 = vadd.f32 %v5127_v41, %v10113_v10  ;;  %v5167_v34 = vmul.f32 %v10113_v10, %v10113_v10  ;;  %v5197_v60 = vadd.f32 %v5196_v27, %v5166_v15  ;;  %v10123_v58 = vadd.f32 %v5065_v47, %v9958_v59 }
 0x528   : > { %v5170_v59 = vmul.f32 %v10117_v13, %v10117_v13 }
 0x529   : > { %v5198_v25 = vadd.f32 %v5197_v60, %v5167_v34  ;;  %v5129_v31 = vadd.f32 %v5128_v61, %v10123_v58  ;;  %v5168_v20 = vmul.f32 %v10123_v58, %v10123_v58 }
 0x52b   : > { %v5130_v53 = vadd.f32 %v5129_v31, %v10108_v32  ;;  %v5199_v16 = vadd.f32 %v5198_v25, %v5168_v20  ;;  %v6588_v43 = vpop.f32.mrb[168].mxu1 }
 0x52c   : > { %v10132_v21 = vadd.f32 %v6588_v43, %v9974_v18  ;;  %v5078_v24 = vpop.f32.mrb[169].mxu1 }
 0x52d   : > { %v5200_v23 = vadd.f32 %v5199_v16, %v5169_v2  ;;  %v10137_v14 = vadd.f32 %v5078_v24, %v9968_v30  ;;  %v5131_v0 = vadd.f32 %v5130_v53, %v10117_v13  ;;  %v6589_v12 = vpop.f32.mrb[170].mxu1 }
 0x52e   : > { %v10141_v7 = vadd.f32 %v6589_v12, %v9976_v55  ;;  %v5081_v5 = vpop.f32.mrb[171].mxu1  ;;  %v5173_v55 = vmul.f32 %v10132_v21, %v10132_v21 }
 0x52f   : > { %v5132_v35 = vadd.f32 %v5131_v0, %v10137_v14  ;;  %v5171_v18 = vmul.f32 %v10137_v14, %v10137_v14  ;;  %v5201_v63 = vadd.f32 %v5200_v23, %v5170_v59  ;;  %v10147_v42 = vadd.f32 %v5081_v5, %v9970_v11 }
 0x530   : > { %v5174_v11 = vmul.f32 %v10141_v7, %v10141_v7 }
 0x531   : > { %v5202_v28 = vadd.f32 %v5201_v63, %v5171_v18  ;;  %v5133_v30 = vadd.f32 %v5132_v35, %v10147_v42  ;;  %v5172_v51 = vmul.f32 %v10147_v42, %v10147_v42 }
 0x533   : > { %v5134_v52 = vadd.f32 %v5133_v30, %v10132_v21  ;;  %v5203_v6 = vadd.f32 %v5202_v28, %v5172_v51  ;;  %v6592_v54 = vpop.f32.mrb[172].mxu1 }
 0x534   : > { %v10156_v15 = vadd.f32 %v6592_v54, %v9986_v29  ;;  %v5094_v27 = vpop.f32.mrb[173].mxu1 }
 0x535   : > { %v5204_v41 = vadd.f32 %v5203_v6, %v5173_v55  ;;  %v10161_v48 = vadd.f32 %v5094_v27, %v9980_v26  ;;  %v5135_v47 = vadd.f32 %v5134_v52, %v10141_v7  ;;  %v6593_v61 = vpop.f32.mrb[174].mxu1 }
 0x536   : > { %v10165_v34 = vadd.f32 %v6593_v61, %v9988_v19  ;;  %v5097_v60 = vpop.f32.mrb[175].mxu1  ;;  %v5177_v19 = vmul.f32 %v10156_v15, %v10156_v15 }
 0x537   : > { %v5136_v25 = vadd.f32 %v5135_v47, %v10161_v48  ;;  %v5175_v29 = vmul.f32 %v10161_v48, %v10161_v48  ;;  %v5205_v31 = vadd.f32 %v5204_v41, %v5174_v11  ;;  %v10171_v20 = vadd.f32 %v5097_v60, %v9982_v56 }
 0x538   : > { %v5178_v24 = vmul.f32 %v10165_v34, %v10165_v34 }
 0x539   : > { %v5206_v2 = vadd.f32 %v5205_v31, %v5175_v29  ;;  %v5137_v26 = vadd.f32 %v5136_v25, %v10171_v20  ;;  %v5176_v53 = vmul.f32 %v10171_v20, %v10171_v20 }
 0x53b   : > { %v5138_v16 = vadd.f32 %v5137_v26, %v10156_v15  ;;  %v5207_v43 = vadd.f32 %v5206_v2, %v5176_v53 }
 0x53d   : > { %v5139_v59 = vadd.f32 %v5138_v16, %v10165_v34  ;;  %v5208_v23 = vadd.f32 %v5207_v43, %v5177_v19 }
 0x53f   : > { %v5140_v56 = vrot.slane %v5139_v59, 4  ;;  %v5209_v0 = vadd.f32 %v5208_v23, %v5178_v24 }
 0x541   : > { %v5141_v12 = vadd.f32 %v5140_v56, %v5139_v59  ;;  %v5210_v5 = vrot.slane %v5209_v0, 4 }
 0x543   : > { %v5142_v35 = vrot.slane %v5141_v12, 2  ;;  %v5211_v18 = vadd.f32 %v5210_v5, %v5209_v0  ;;  %v10731_v0 = vld [vmem:[#allocation37_spill] sm:$0xff] }
 0x545   : > { %v5143_v63 = vadd.f32 %v5142_v35, %v5141_v12  ;;  %v5212_v28 = vrot.slane %v5211_v18, 2 }
 0x547   : > { %v5144_v30 = vrot.slane %v5143_v63, 1  ;;  %v5213_v51 = vadd.f32 %v5212_v28, %v5211_v18 }
 0x549   : > { %v5145_v55 = vadd.f32 %v5144_v30, %v5143_v63  ;;  %v5214_v52 = vrot.slane %v5213_v51, 1 }
 0x54b   : > { %v10182_v6 = vmul.f32 0.00390625, %v5145_v55  ;;  %v5215_v54 = vadd.f32 %v5214_v52, %v5213_v51 }
 0x54d   : > { %v5216_v27 = vmul.f32 0.00390625, %v5215_v54  ;;  %v5217_v11 = vmul.f32 %v10182_v6, %v10182_v6  ;;  %v5248_v41 = vsub.f32 %v10161_v48, %v10182_v6  ;;  %v5249_v47 = vsub.f32 %v10171_v20, %v10182_v6 }
 0x54e   : > { %v5229_v60 = vsub.f32 %v10051_v1, %v10182_v6  ;;  %v5232_v29 = vsub.f32 %v10065_v36, %v10182_v6  ;;  %v5233_v31 = vsub.f32 %v10075_v57, %v10182_v6  ;;  %v5234_v2 = vsub.f32 %v10060_v4, %v10182_v6 }
 0x54f   : > { %v5218_v61 = vsub.f32 %v5216_v27, %v5217_v11  ;;  %v5235_v48 = vsub.f32 %v10069_v8, %v10182_v6  ;;  %v5236_v20 = vsub.f32 %v10089_v38, %v10182_v6  ;;  %v5237_v26 = vsub.f32 %v10099_v9, %v10182_v6 }
 0x550   : > { %v5238_v53 = vsub.f32 %v10084_v45, %v10182_v6  ;;  %v5239_v36 = vsub.f32 %v10093_v46, %v10182_v6  ;;  %v5240_v57 = vsub.f32 %v10113_v10, %v10182_v6  ;;  %v5241_v4 = vsub.f32 %v10123_v58, %v10182_v6 }
 0x551   : > { %v5219_v25 = vmax.f32 %v5218_v61, 0.0  ;;  %v5242_v8 = vsub.f32 %v10108_v32, %v10182_v6  ;;  %v5243_v38 = vsub.f32 %v10117_v13, %v10182_v6  ;;  %v5244_v9 = vsub.f32 %v10137_v14, %v10182_v6 }
 0x552   : > { %v5245_v45 = vsub.f32 %v10147_v42, %v10182_v6  ;;  %v5246_v46 = vsub.f32 %v10132_v21, %v10182_v6  ;;  %v5247_v10 = vsub.f32 %v10141_v7, %v10182_v6  ;;  %v5250_v32 = vsub.f32 %v10156_v15, %v10182_v6 }
 0x553   : > { %v5252_v1 = vadd.f32 1e-05, %v5219_v25  ;;  %v5251_v13 = vsub.f32 %v10165_v34, %v10182_v6  ;;  %v5220_v58 = vsub.f32 %v9994_v37, %v10182_v6  ;;  %v5221_v14 = vsub.f32 %v10000_v40, %v10182_v6 }
 0x554   : > { %v5222_v42 = vsub.f32 %v9991_v17, %v10182_v6  ;;  %v5223_v21 = vsub.f32 %v9997_v49, %v10182_v6  ;;  %v5224_v7 = vsub.f32 %v10017_v44, %v10182_v6  ;;  %v5225_v15 = vsub.f32 %v10027_v3, %v10182_v6 }
 0x555   : > { %6783 = vrsqrt.f32 %v5252_v1  ;;  %v5226_v34 = vsub.f32 %v10012_v62, %v10182_v6  ;;  %v5227_v40 = vsub.f32 %v10021_v33, %v10182_v6  ;;  %v5228_v17 = vsub.f32 %v10041_v50, %v10182_v6  ;;  %v10730_v33 = vld [vmem:[#allocation36_spill] sm:$0xff] }
 0x556   : > { %v5230_v49 = vsub.f32 %v10036_v22, %v10182_v6  ;;  %v5231_v44 = vsub.f32 %v10045_v39, %v10182_v6 }
 0x55f   : > { %v6784_v37 = vpop.eup %6783 }
 0x560   : > { %v5282_v19 = vmul.f32 %v6784_v37, %v5248_v41  ;;  %v5283_v3 = vmul.f32 %v6784_v37, %v5249_v47  ;;  %v5254_v16 = vmul.f32 %v6784_v37, %v5220_v58  ;;  %v5255_v43 = vmul.f32 %v6784_v37, %v5221_v14 }
 0x561   : > { %v5256_v24 = vmul.f32 %v6784_v37, %v5222_v42  ;;  %v5257_v62 = vmul.f32 %v6784_v37, %v5223_v21  ;;  %v5258_v59 = vmul.f32 %v6784_v37, %v5224_v7  ;;  %v5259_v23 = vmul.f32 %v6784_v37, %v5225_v15  ;;  %v10738_v7 = vld [vmem:[#allocation19_spill] sm:$0xff] }
 0x562   : > { %v5314_v56 = vadd.f32 %v5282_v19, %v10730_v33  ;;  %v5315_v50 = vadd.f32 %v5283_v3, %v10731_v0  ;;  %v5260_v12 = vmul.f32 %v6784_v37, %v5226_v34  ;;  %v5261_v5 = vmul.f32 %v6784_v37, %v5227_v40  ;;  %v10739_v34 = vld [vmem:[#allocation11_spill] sm:$0xff]  ;;  %v10745_v3 = vld [vmem:[#allocation21_spill] sm:$0xff] }
 0x563   : > { %v5262_v22 = vmul.f32 %v6784_v37, %v5228_v17  ;;  %v5263_v35 = vmul.f32 %v6784_v37, %v5229_v60  ;;  %v5264_v18 = vmul.f32 %v6784_v37, %v5230_v49  ;;  %v5265_v39 = vmul.f32 %v6784_v37, %v5231_v44  ;;  %v10743_v17 = vld [vmem:[#allocation44_spill] sm:$0xff] }
 0x564   : > { %v5346_v63 = vmax.f32 %v5314_v56, 0.0  ;;  %v5347_v28 = vmax.f32 %v5315_v50, 0.0  ;;  %v5266_v30 = vmul.f32 %v6784_v37, %v5232_v29  ;;  %v5267_v51 = vmul.f32 %v6784_v37, %v5233_v31  ;;  %v10744_v44 = vld [vmem:[#allocation20_spill] sm:$0xff]  ;;  %v10749_v56 = vld [vmem:[#allocation25_spill] sm:$0xff]  ;;  %v10750_v50 = vld [vmem:[#allocation26_spill] sm:$0xff] }
 0x565   : > { %v5268_v55 = vmul.f32 %v6784_v37, %v5234_v2  ;;  %v5269_v52 = vmul.f32 %v6784_v37, %v5235_v48  ;;  %v5270_v6 = vmul.f32 %v6784_v37, %v5236_v20  ;;  %v5271_v54 = vmul.f32 %v6784_v37, %v5237_v26  ;;  %v10732_v48 = vld [vmem:[#allocation13_spill] sm:$0xff]  ;;  %v10733_v26 = vld [vmem:[#allocation14_spill] sm:$0xff] }
 0x566   : > { %v6052_v27 = vpack.c.bf16 %v5347_v28, %v5346_v63  ;;  %v5272_v11 = vmul.f32 %v6784_v37, %v5238_v53  ;;  %v5273_v41 = vmul.f32 %v6784_v37, %v5239_v36  ;;  %v5274_v47 = vmul.f32 %v6784_v37, %v5240_v57  ;;  %v10734_v53 = vld [vmem:[#allocation15_spill] sm:$0xff]  ;;  %v10735_v57 = vld [vmem:[#allocation16_spill] sm:$0xff]  ;;  %v10754_v28 = vld [vmem:[#allocation34_spill] sm:$0xff] }
 0x567   : > { %v5275_v61 = vmul.f32 %v6784_v37, %v5241_v4  ;;  %v5276_v25 = vmul.f32 %v6784_v37, %v5242_v8  ;;  %v5277_v1 = vmul.f32 %v6784_v37, %v5243_v38  ;;  %v5278_v58 = vmul.f32 %v6784_v37, %v5244_v9  ;;  %v10736_v8 = vld [vmem:[#allocation17_spill] sm:$0xff]  ;;  %v10737_v9 = vld [vmem:[#allocation18_spill] sm:$0xff]  ;;  %v10753_v63 = vld [vmem:[#allocation31_spill] sm:$0xff] }
 0x568   : > { %6072 = vst [vmem:[%s10255_s26 + $0x70] sm:$0xff] %v6052_v27   ;;  %v5279_v60 = vmul.f32 %v6784_v37, %v5245_v45  ;;  %v5280_v14 = vmul.f32 %v6784_v37, %v5246_v46  ;;  %v5281_v29 = vmul.f32 %v6784_v37, %v5247_v10  ;;  %v5284_v31 = vmul.f32 %v6784_v37, %v5250_v32  ;;  %v10740_v46 = vld [vmem:[#allocation41_spill] sm:$0xff]  ;;  %v10741_v32 = vld [vmem:[#allocation42_spill] sm:$0xff]  ;;  %v10755_v27 = vld [vmem:[#allocation35_spill] sm:$0xff] }
 0x569   : > { %v5285_v2 = vmul.f32 %v6784_v37, %v5251_v13  ;;  %v5286_v20 = vadd.f32 %v5254_v16, %v10732_v48  ;;  %v5287_v42 = vadd.f32 %v5255_v43, %v10733_v26  ;;  %v5288_v36 = vadd.f32 %v5256_v24, %v10734_v53  ;;  %v10742_v37 = vld [vmem:[#allocation43_spill] sm:$0xff]  ;;  %v10746_v43 = vld [vmem:[#allocation22_spill] sm:$0xff]  ;;  %v10756_v48 = vld [vmem:[#allocation28_spill] sm:$0xff] }
 0x56a   : > { %v5289_v4 = vadd.f32 %v5257_v62, %v10735_v57  ;;  %v5290_v38 = vadd.f32 %v5258_v59, %v10736_v8  ;;  %v5291_v21 = vadd.f32 %v5259_v23, %v10737_v9  ;;  %v5292_v15 = vadd.f32 %v5260_v12, %v10738_v7  ;;  %v10747_v62 = vld [vmem:[#allocation23_spill] sm:$0xff]  ;;  %v10748_v23 = vld [vmem:[#allocation24_spill] sm:$0xff]  ;;  %v10757_v26 = vld [vmem:[#allocation29_spill] sm:$0xff] }
 0x56b   : > { %v5293_v45 = vadd.f32 %v5261_v5, %v10739_v34  ;;  %v5294_v10 = vadd.f32 %v5262_v22, %v10740_v46  ;;  %v5295_v13 = vadd.f32 %v5263_v35, %v10741_v32  ;;  %v5296_v40 = vadd.f32 %v5264_v18, %v10742_v37  ;;  %v10751_v5 = vld [vmem:[#allocation27_spill] sm:$0xff]  ;;  %v10752_v35 = vld [vmem:[#allocation30_spill] sm:$0xff]  ;;  %v10758_v53 = vld [vmem:[#allocation32_spill] sm:$0xff] }
 0x56c   : > { %v5297_v49 = vadd.f32 %v5265_v39, %v10743_v17  ;;  %v5298_v19 = vadd.f32 %v5266_v30, %v10744_v44  ;;  %v5299_v16 = vadd.f32 %v5267_v51, %v10745_v3  ;;  %v5300_v24 = vadd.f32 %v5268_v55, %v10746_v43  ;;  %v10759_v57 = vld [vmem:[#allocation33_spill] sm:$0xff]  ;;  %v10760_v8 = vld [vmem:[#allocation40_spill] sm:$0xff] }
 0x56d   : > { %v5301_v59 = vadd.f32 %v5269_v52, %v10747_v62  ;;  %v5302_v33 = vadd.f32 %v5270_v6, %v10748_v23  ;;  %v5303_v0 = vadd.f32 %v5271_v54, %v10749_v56  ;;  %v5304_v12 = vadd.f32 %v5272_v11, %v10750_v50  ;;  %v10761_v9 = vld [vmem:[#allocation12_spill] sm:$0xff] }
 0x56e   : > { %v5305_v22 = vadd.f32 %v5273_v41, %v10751_v5  ;;  %v5306_v18 = vadd.f32 %v5274_v47, %v10752_v35  ;;  %v5307_v39 = vadd.f32 %v5275_v61, %v10753_v63  ;;  %v5308_v30 = vadd.f32 %v5276_v25, %v10754_v28 }
 0x56f   : > { %v5309_v51 = vadd.f32 %v5277_v1, %v10755_v27  ;;  %v5310_v55 = vadd.f32 %v5278_v58, %v10756_v48  ;;  %v5311_v52 = vadd.f32 %v5279_v60, %v10757_v26  ;;  %v5312_v6 = vadd.f32 %v5280_v14, %v10758_v53 }
 0x570   : > { %v5313_v54 = vadd.f32 %v5281_v29, %v10759_v57  ;;  %v5316_v11 = vadd.f32 %v5284_v31, %v10760_v8  ;;  %v5317_v41 = vadd.f32 %v5285_v2, %v10761_v9  ;;  %v5318_v7 = vmax.f32 %v5286_v20, 0.0 }
 0x571   : > { %v5319_v47 = vmax.f32 %v5287_v42, 0.0  ;;  %v5320_v34 = vmax.f32 %v5288_v36, 0.0  ;;  %v5321_v61 = vmax.f32 %v5289_v4, 0.0  ;;  %v5322_v46 = vmax.f32 %v5290_v38, 0.0 }
 0x572   : > { %v5323_v25 = vmax.f32 %v5291_v21, 0.0  ;;  %v5324_v32 = vmax.f32 %v5292_v15, 0.0  ;;  %v5325_v1 = vmax.f32 %v5293_v45, 0.0  ;;  %v5326_v37 = vmax.f32 %v5294_v10, 0.0 }
 0x573   : > { %v5327_v58 = vmax.f32 %v5295_v13, 0.0  ;;  %v5328_v17 = vmax.f32 %v5296_v40, 0.0  ;;  %v5329_v60 = vmax.f32 %v5297_v49, 0.0  ;;  %v5330_v44 = vmax.f32 %v5298_v19, 0.0 }
 0x574   : > { %v5331_v14 = vmax.f32 %v5299_v16, 0.0  ;;  %v5332_v29 = vmax.f32 %v5300_v24, 0.0  ;;  %v5333_v3 = vmax.f32 %v5301_v59, 0.0  ;;  %v5334_v31 = vmax.f32 %v5302_v33, 0.0 }
 0x575   : > { %v5335_v43 = vmax.f32 %v5303_v0, 0.0  ;;  %v5336_v2 = vmax.f32 %v5304_v12, 0.0  ;;  %v5337_v20 = vmax.f32 %v5305_v22, 0.0  ;;  %v5338_v42 = vmax.f32 %v5306_v18, 0.0 }
 0x576   : > { %v5339_v36 = vmax.f32 %v5307_v39, 0.0  ;;  %v5340_v4 = vmax.f32 %v5308_v30, 0.0  ;;  %v5341_v38 = vmax.f32 %v5309_v51, 0.0  ;;  %v5342_v21 = vmax.f32 %v5310_v55, 0.0 }
 0x577   : > { %v5343_v15 = vmax.f32 %v5311_v52, 0.0  ;;  %v5344_v45 = vmax.f32 %v5312_v6, 0.0  ;;  %v5345_v10 = vmax.f32 %v5313_v54, 0.0  ;;  %v5348_v13 = vmax.f32 %v5316_v11, 0.0 }
 0x578   : > { %v5349_v40 = vmax.f32 %v5317_v41, 0.0  ;;  %v5982_v49 = vpack.c.bf16 %v5319_v47, %v5318_v7  ;;  %v5987_v19 = vpack.c.bf16 %v5321_v61, %v5320_v34  ;;  %v5992_v16 = vpack.c.bf16 %v5323_v25, %v5322_v46 }
 0x579   : > { %v5997_v24 = vpack.c.bf16 %v5325_v1, %v5324_v32  ;;  %v6002_v62 = vpack.c.bf16 %v5327_v58, %v5326_v37  ;;  %v6007_v59 = vpack.c.bf16 %v5329_v60, %v5328_v17  ;;  %v6012_v23 = vpack.c.bf16 %v5331_v14, %v5330_v44 }
 0x57a   : > { %5983 = vst [vmem:[%s10255_s26] sm:$0xff] %v5982_v49   ;;  %6059 = vst [vmem:[%s10255_s26 + $0x8] sm:$0xff] %v5987_v19   ;;  %v6017_v33 = vpack.c.bf16 %v5333_v3, %v5332_v29  ;;  %v6022_v56 = vpack.c.bf16 %v5335_v43, %v5334_v31  ;;  %v6027_v0 = vpack.c.bf16 %v5337_v20, %v5336_v2 }
 0x57b   : > { %6060 = vst [vmem:[%s10255_s26 + $0x10] sm:$0xff] %v5992_v16   ;;  %v6032_v50 = vpack.c.bf16 %v5339_v36, %v5338_v42  ;;  %6061 = vst [vmem:[%s10255_s26 + $0x18] sm:$0xff] %v5997_v24   ;;  %v6037_v12 = vpack.c.bf16 %v5341_v38, %v5340_v4  ;;  %v6042_v5 = vpack.c.bf16 %v5343_v15, %v5342_v21 }
 0x57c   : > { %6062 = vst [vmem:[%s10255_s26 + $0x20] sm:$0xff] %v6002_v62   ;;  %6063 = vst [vmem:[%s10255_s26 + $0x28] sm:$0xff] %v6007_v59   ;;  %v6047_v22 = vpack.c.bf16 %v5345_v10, %v5344_v45  ;;  %v6057_v35 = vpack.c.bf16 %v5349_v40, %v5348_v13 }
 0x57d   : > { %6064 = vst [vmem:[%s10255_s26 + $0x30] sm:$0xff] %v6012_v23   ;;  %6065 = vst [vmem:[%s10255_s26 + $0x38] sm:$0xff] %v6017_v33  }
 0x57e   : > { %6066 = vst [vmem:[%s10255_s26 + $0x40] sm:$0xff] %v6022_v56   ;;  %6067 = vst [vmem:[%s10255_s26 + $0x48] sm:$0xff] %v6027_v0  }
 0x57f   : > { %6068 = vst [vmem:[%s10255_s26 + $0x50] sm:$0xff] %v6032_v50   ;;  %6069 = vst [vmem:[%s10255_s26 + $0x58] sm:$0xff] %v6037_v12  }
 0x580   : > { %6070 = vst [vmem:[%s10255_s26 + $0x60] sm:$0xff] %v6042_v5   ;;  %6071 = vst [vmem:[%s10255_s26 + $0x68] sm:$0xff] %v6047_v22  }
 0x581   : > { %6073 = vst [vmem:[%s10255_s26 + $0x78] sm:$0xff] %v6057_v35  }
 0x582   : > { %6827 = shalt.err (!%p6824_p7)
}
 0x583   : > { %s6828_s19 = scalar_lea.hbm %s10296_s6, 2048  ;;  %s6832_s27 = scalar_lea.hbm %s10359_s3, 4096 }
 0x584   : > { %p6829_p8 = scmp.ne.s32.totalorder %s10296_s6, %s6828_s19  ;;  %p6833_p1 = scmp.lt.u32.totalorder %s10296_s6, %s10359_s3 }
 0x585   : > { %p6834_p0 = scmp.lt.u32.totalorder %s6832_s27, %s6828_s19  ;;  %p6836_p6 = scmp.lt.u32.totalorder %s6828_s19, %s10296_s6 }
 0x586   : > { %p6830_p11 = pnand %p6829_p8, %p10762_p9 }
 0x587   : > { %p6835_p5 = por %p6834_p0, %p6833_p1 }
 0x588   : > { %p6831_p13 = pneg %p6830_p11 }
 0x589   : > { %p6837_p10 = por %p6836_p6, %p6835_p5 }
 0x58b   : > { %p6838_p12 = pnand %p6837_p10, %p6831_p13 }
 0x58d   : > { %6841 = shalt.err (!%p6838_p12)
}
 0x58e   : > { %s6895_s24 = smov 64  }
 0x58f   : > { %6605 = dma.vmem_to_hbm [thread:$0]  (%p10762_p9), %s10302_s30, 2048, %s10296_s6, %s10314_s7, %s6895_s24, %s6895_s24, %s6890_s9  }
 0x590 PF: > { %p6617_p2 = scmp.ge.s32.totalorder %s6880_s15, 2  ;;  %s5539_s26 = sand.u32 1, %s6868_s12  }
 0x591   : > { %p10763_p3 = scmp.ne.s32.totalorder %s10453_s23, 0  ;;  %s5540_s29 = scalar_lea.sflag [#allocation5], %s5539_s26 }
 0x593   : > { %p6612_p4 = pnand %p6617_p2, %p10763_p3 }
 0x595   : > { %6863 = dma.done.wait (!%p6612_p4), %s5540_s29, 2048  }
 0x596   : > { %6865 = vsyncadd (!%p6612_p4), %s5540_s29, 4294965248  ;;  %p14_p7 = scmp.ge.s32.totalorder %s6941_s18, 4   ;;  %s10764_s12 = smov %s6872_s13 }
 0x597   : > { %s10765_s13 = smov %s6876_s14  ;;  %s10766_s14 = smov %s6952_s21 }
 0x598   : > { %s10767_s15 = smov %s6941_s18  ;;  %16 = sbr.rel (!%p14_p7) target bundleno = 4 (0x4), region = 74 }
 0x59f   :  { %5545 = vsyncpa [#allocation4], 1 }
 0x5a0   :  { %5547 = vsyncpa [#allocation4 + $0x1], 1 }
 0x5a1   :  { %5548 = vsyncpa [#allocation5], 1 }
 0x5a2   :  { %5550 = vsyncpa [#allocation5 + $0x1], 1 }

</bundles_post_ra>
